<compile_context>
chip_gen: v6e
topology: v6e:2x2x1
jax: 0.10.0
libtpu: 0.0.40
codegen_flags: <defaults>
</compile_context>

<pallas_src>
import functools

import jax
import jax.numpy as jnp
from jax.experimental import pallas as pl
from jax.experimental.pallas import tpu as pltpu


def _round_up(x, m):
    return ((x + m - 1) // m) * m


# --------------------------------------------------------------------------- matmul kernel
def _mm_kernel(a_ref, b_ref, bias_ref, o_ref, acc_ref, *, act_out):
    k = pl.program_id(3)

    @pl.when(k == 0)
    def _zero():
        acc_ref[...] = jnp.zeros_like(acc_ref)

    a = a_ref[...][0]                          # (tm, tk) bf16
    b = b_ref[...][0]                          # (tk, tn) bf16
    acc_ref[...] += jnp.dot(a, b, preferred_element_type=jnp.float32)

    @pl.when(k == pl.num_programs(3) - 1)
    def _finalize():
        y = acc_ref[...] + bias_ref[...]       # (tm, tn) + (1, tn), f32
        if act_out == "tanh":
            y = jnp.tanh(y)
        o_ref[...] = y[None]


def pallas_matmul(a, b, bias, act_out="none"):
    """Batched matmul: a (P,M,K) @ b (P,K,N) + bias (N,). bf16 on the MXU, f32 accumulate."""
    P, M, K = a.shape
    _, _, N = b.shape

    tm = min(512, _round_up(M, 8))
    tn = min(256, _round_up(N, 128))
    tk = min(1024, _round_up(K, 128))
    Mp, Kp, Np = _round_up(M, tm), _round_up(K, tk), _round_up(N, tn)

    a_p = jnp.pad(a, ((0, 0), (0, Mp - M), (0, Kp - K))).astype(jnp.bfloat16)
    b_p = jnp.pad(b, ((0, 0), (0, Kp - K), (0, Np - N))).astype(jnp.bfloat16)
    bias_p = jnp.pad(bias.astype(jnp.float32), (0, Np - N)).reshape(1, Np)

    grid = (P, Mp // tm, Np // tn, Kp // tk)

    # VMEM: double-buffered bf16 A/B blocks + f32 out block + f32 accumulator (+ margin).
    vmem_bytes = 2 * (tm * tk * 2 + tk * tn * 2 + tm * tn * 4 + tn * 4) + tm * tn * 4
    vmem_limit = int(min(max(2 * vmem_bytes, 8 << 20), 64 << 20))

    flops = 2 * P * Mp * Np * Kp
    transcendentals = P * Mp * Np if act_out == "tanh" else 0
    bytes_accessed = a_p.size * 2 + b_p.size * 2 + P * Mp * Np * 4 + bias_p.size * 4

    out = pl.pallas_call(
        functools.partial(_mm_kernel, act_out=act_out),
        out_shape=jax.ShapeDtypeStruct((P, Mp, Np), jnp.float32),
        grid_spec=pltpu.PrefetchScalarGridSpec(
            num_scalar_prefetch=0,
            grid=grid,
            in_specs=[
                pl.BlockSpec((1, tm, tk), lambda p, i, j, k: (p, i, k)),
                pl.BlockSpec((1, tk, tn), lambda p, i, j, k: (p, k, j)),
                pl.BlockSpec((1, tn), lambda p, i, j, k: (0, j)),
            ],
            out_specs=pl.BlockSpec((1, tm, tn), lambda p, i, j, k: (p, i, j)),
            scratch_shapes=[pltpu.VMEM((tm, tn), jnp.float32)],
        ),
        compiler_params=pltpu.CompilerParams(
            dimension_semantics=("parallel", "parallel", "parallel", "arbitrary"),
            vmem_limit_bytes=vmem_limit,
        ),
        cost_estimate=pl.CostEstimate(
            flops=flops, transcendentals=transcendentals, bytes_accessed=bytes_accessed),
    )(a_p, b_p, bias_p)
    return out[:, :M, :N]


# --------------------------------------------------------------------------- BatchNorm stats
def _bn_stats_kernel(x_ref, o_ref, *, inv_m, eps):
    i = pl.program_id(0)

    @pl.when(i == 0)
    def _zero():
        o_ref[...] = jnp.zeros_like(o_ref)

    x = x_ref[...]                                             # (tm, Cp) f32
    s = jnp.sum(x, axis=0, keepdims=True)
    ss = jnp.sum(x * x, axis=0, keepdims=True)
    o_ref[...] += jnp.concatenate([s, ss], axis=0)             # rows: [sum, sumsq]

    @pl.when(i == pl.num_programs(0) - 1)
    def _finalize():
        acc = o_ref[...]
        mean = acc[0:1, :] * inv_m
        var = jnp.maximum(acc[1:2, :] * inv_m - mean * mean, 0.0)   # biased batch variance
        scale = jax.lax.rsqrt(var + eps)
        shift = -mean * scale
        o_ref[...] = jnp.concatenate([scale, shift], axis=0)


def pallas_bn_scale_shift(x_nhwc, gamma, beta, eps=1e-5):
    """BatchNorm2d (training mode, batch statistics) expressed as a per-channel affine
    (scale, shift) so normalization can be folded into the consumer of x.
    TODO(synk): running_mean/running_var buffer updates are not modeled (forward-only)."""
    n, h, w, c = x_nhwc.shape
    m = n * h * w
    cp = _round_up(c, 128)
    tm = min(1024, _round_up(m, 8))
    mp = _round_up(m, tm)
    x2 = jnp.pad(x_nhwc.reshape(m, c).astype(jnp.float32), ((0, mp - m), (0, cp - c)))

    vmem_bytes = 2 * tm * cp * 4 + 2 * cp * 4
    vmem_limit = int(min(max(2 * vmem_bytes, 8 << 20), 64 << 20))

    stats = pl.pallas_call(
        functools.partial(_bn_stats_kernel, inv_m=1.0 / m, eps=eps),
        out_shape=jax.ShapeDtypeStruct((2, cp), jnp.float32),
        grid_spec=pltpu.PrefetchScalarGridSpec(
            num_scalar_prefetch=0,
            grid=(mp // tm,),
            in_specs=[pl.BlockSpec((tm, cp), lambda i: (i, 0))],
            out_specs=pl.BlockSpec((2, cp), lambda i: (0, 0)),
        ),
        compiler_params=pltpu.CompilerParams(
            dimension_semantics=("arbitrary",),
            vmem_limit_bytes=vmem_limit,
        ),
        cost_estimate=pl.CostEstimate(
            flops=3 * mp * cp, transcendentals=cp,
            bytes_accessed=x2.size * 4 + 2 * cp * 4),
    )(x2)
    scale = gamma * stats[0, :c]
    shift = gamma * stats[1, :c] + beta
    return scale, shift


# --------------------------------------------------------------------------- conv wrappers
def _apply_affine_act(x, scale, shift, act):
    """Lazy BN affine + pre-conv activation applied to the un-replicated NHWC feature map
    (XLA fuses this into the im2col gather that follows; never applied to 16x-replicated A)."""
    if scale is not None:
        x = x * scale + shift
    if act == "lrelu":
        x = jnp.where(x > 0, x, 0.2 * x)
    elif act == "relu":
        x = jnp.maximum(x, 0.0)
    return x


def conv_down(xt, w, bias, act):
    """Conv2d(k=4, s=2, p=1, bias=False).  w: (Cout, Cin, 4, 4) PyTorch layout."""
    x, scale, shift = xt
    n, h, w_sp, c = x.shape
    cout = w.shape[0]
    ho, wo = h // 2, w_sp // 2
    xa = _apply_affine_act(x, scale, shift, act)
    xp = jnp.pad(xa, ((0, 0), (1, 1), (1, 1), (0, 0)))
    taps = [xp[:, kh:kh + 2 * ho:2, kw:kw + 2 * wo:2, :]
            for kh in range(4) for kw in range(4)]
    A = jnp.concatenate(taps, axis=-1).reshape(n * ho * wo, 16 * c)
    B = jnp.transpose(w, (2, 3, 1, 0)).reshape(16 * c, cout)   # (kh, kw, cin) -> cout
    y = pallas_matmul(A[None], B[None], bias)
    return y[0].reshape(n, ho, wo, cout)


def conv_up(st, w, bias, act, act_out="none"):
    """ConvTranspose2d(k=4, s=2, p=1) decomposed into 4 sub-pixel (parity) matmuls batched
    on a leading grid axis (exact FLOPs, no dilated zeros).  w: (Cin, Cout, 4, 4)."""
    x, scale, shift = st
    n, h, w_sp, c = x.shape
    cout = w.shape[1]
    xa = _apply_affine_act(x, scale, shift, act)
    xp = jnp.pad(xa, ((0, 0), (1, 1), (1, 1), (0, 0)))
    a_list, b_list = [], []
    for di in range(2):
        for dj in range(2):
            taps = [xp[:, di + tr:di + tr + h, dj + tc:dj + tc + w_sp, :]
                    for tr in range(2) for tc in range(2)]
            a_list.append(jnp.concatenate(taps, axis=-1).reshape(n * h * w_sp, 4 * c))
            wtaps = [w[:, :, 3 - di - 2 * tr, 3 - dj - 2 * tc]      # (Cin, Cout) slices
                     for tr in range(2) for tc in range(2)]
            b_list.append(jnp.concatenate(wtaps, axis=0))           # (4*Cin, Cout)
    A = jnp.stack(a_list)                        # (4, N*H*W, 4*Cin)
    B = jnp.stack(b_list)                        # (4, 4*Cin, Cout)
    y = pallas_matmul(A, B, bias, act_out=act_out)                  # (4, N*H*W, Cout)
    # sub-pixel (depth-to-space) recombination of the 4 parities
    y = y.reshape(2, 2, n, h, w_sp, cout)
    y = jnp.transpose(y, (2, 3, 0, 4, 1, 5)).reshape(n, 2 * h, 2 * w_sp, cout)
    return y


# --------------------------------------------------------------------------- U-Net structure
def init_unet_params(key, input_nc, output_nc, num_downs, ngf):
    """Mirror of UnetGenerator(input_nc, output_nc, num_downs, ngf, BatchNorm2d).
    Returns (kinds, params): static block kinds + per-block weight dicts (arrays only)."""
    cfgs = [dict(outer=output_nc, inner=ngf, inp=input_nc, kind="outermost"),
            dict(outer=ngf, inner=ngf * 2, inp=ngf, kind="mid"),
            dict(outer=ngf * 2, inner=ngf * 4, inp=ngf * 2, kind="mid"),
            dict(outer=ngf * 4, inner=ngf * 8, inp=ngf * 4, kind="mid")]
    for _ in range(num_downs - 5):
        cfgs.append(dict(outer=ngf * 8, inner=ngf * 8, inp=ngf * 8, kind="mid"))
    cfgs.append(dict(outer=ngf * 8, inner=ngf * 8, inp=ngf * 8, kind="innermost"))

    kinds, params = [], []
    for cfg in cfgs:
        key, k1, k2, k3 = jax.random.split(key, 4)
        # downconv: Conv2d(inp, inner, 4, 2, 1, bias=False)   (BatchNorm2d -> use_bias=False)
        down_w = 0.05 * jax.random.normal(k1, (cfg["inner"], cfg["inp"], 4, 4), jnp.float32)
        up_cin = cfg["inner"] if cfg["kind"] == "innermost" else cfg["inner"] * 2
        up_w = 0.05 * jax.random.normal(k2, (up_cin, cfg["outer"], 4, 4), jnp.float32)
        if cfg["kind"] == "outermost":           # outermost upconv keeps default bias=True
            up_b = 0.05 * jax.random.normal(k3, (cfg["outer"],), jnp.float32)
        else:
            up_b = jnp.zeros((cfg["outer"],), jnp.float32)
        kinds.append(cfg["kind"])
        params.append(dict(
            down_w=down_w,
            down_b=jnp.zeros((cfg["inner"],), jnp.float32),
            down_gamma=jnp.ones((cfg["inner"],), jnp.float32),   # BatchNorm2d default init
            down_beta=jnp.zeros((cfg["inner"],), jnp.float32),
            up_w=up_w, up_b=up_b,
            up_gamma=jnp.ones((cfg["outer"],), jnp.float32),
            up_beta=jnp.zeros((cfg["outer"],), jnp.float32)))
    return tuple(kinds), params


def _concat_skip(xt, ut):
    """torch.cat([x, u], 1) in lazy (raw, scale, shift) form."""
    x, xs, xsh = xt
    u, us, ush = ut
    cx, cu = x.shape[-1], u.shape[-1]
    if xs is None:
        xs, xsh = jnp.ones((cx,), jnp.float32), jnp.zeros((cx,), jnp.float32)
    if us is None:
        us, ush = jnp.ones((cu,), jnp.float32), jnp.zeros((cu,), jnp.float32)
    return (jnp.concatenate([x, u], axis=-1),
            jnp.concatenate([xs, us]),
            jnp.concatenate([xsh, ush]))


def unet_forward(xt, kinds, params, level=0):
    """UnetSkipConnectionBlock recursion on lazy (raw, bn_scale, bn_shift) tuples."""
    p = params[level]
    kind = kinds[level]
    if kind == "outermost":
        d = conv_down(xt, p["down_w"], p["down_b"], act="none")
        s = unet_forward((d, None, None), kinds, params, level + 1)
        return conv_up(s, p["up_w"], p["up_b"], act="relu", act_out="tanh")
    elif kind == "innermost":
        d = conv_down(xt, p["down_w"], p["down_b"], act="lrelu")
        u = conv_up((d, None, None), p["up_w"], p["up_b"], act="relu")
        u_aff = pallas_bn_scale_shift(u, p["up_gamma"], p["up_beta"])
        return _concat_skip(xt, (u, *u_aff))
    else:
        d = conv_down(xt, p["down_w"], p["down_b"], act="lrelu")
        d_aff = pallas_bn_scale_shift(d, p["down_gamma"], p["down_beta"])
        s = unet_forward((d, *d_aff), kinds, params, level + 1)
        u = conv_up(s, p["up_w"], p["up_b"], act="relu")
        u_aff = pallas_bn_scale_shift(u, p["up_gamma"], p["up_beta"])
        return _concat_skip(xt, (u, *u_aff))


@functools.partial(jax.jit, static_argnames=("kinds",))
def unet_generator2(x_nchw, params1, params2, kinds):
    """UnetGenerator2.forward: two U-Nets on the same input, concat along channels."""
    x = jnp.transpose(x_nchw, (0, 2, 3, 1))              # NCHW -> NHWC
    xt = (x, None, None)
    o1 = unet_forward(xt, kinds, params1)
    o2 = unet_forward(xt, kinds, params2)
    o = jnp.concatenate([o1, o2], axis=-1)
    return jnp.transpose(o, (0, 3, 1, 2))                # NHWC -> NCHW


# --------------------------------------------------------------------------- main
if __name__ == "__main__":
    key = jax.random.PRNGKey(0)
    kx, kp1, kp2 = jax.random.split(key, 3)

    # Small but structurally faithful config: num_downs=5 needs spatial >= 2**5 = 32.
    input_nc = 3
    output_nc = (2, 1)
    num_downs = 5
    ngf = 8
    B, H, W = 2, 32, 32

    x = jax.random.normal(kx, (B, input_nc, H, W), jnp.float32)
    kinds, params1 = init_unet_params(kp1, input_nc, output_nc[0], num_downs, ngf)
    _, params2 = init_unet_params(kp2, input_nc, output_nc[1], num_downs, ngf)

    out = unet_generator2(x, params1, params2, kinds=kinds)
    out = jax.block_until_ready(out)

    assert out.shape == (B, output_nc[0] + output_nc[1], H, W), out.shape
    assert bool(jnp.all(jnp.isfinite(out)))
    # outputs of both U-Nets end in tanh -> bounded in [-1, 1]
    assert float(jnp.max(jnp.abs(out))) <= 1.0 + 1e-5
    print("KERNEL_OK")
</pallas_src>

<mosaic_0001>
module attributes {stable_mosaic.version = 11 : i64} {
  func.func @_mm_kernel(%arg0: i32, %arg1: i32, %arg2: i32, %arg3: i32, %arg4: memref<1x512x128xbf16, #tpu.memory_space<vmem>>, %arg5: memref<1x128x128xbf16, #tpu.memory_space<vmem>>, %arg6: memref<1x128xf32, #tpu.memory_space<vmem>>, %arg7: memref<1x512x128xf32, #tpu.memory_space<vmem>>, %arg8: memref<512x128xf32, #tpu.memory_space<vmem>>) attributes {dimension_semantics = [#tpu.dimension_semantics<parallel>, #tpu.dimension_semantics<parallel>, #tpu.dimension_semantics<parallel>, #tpu.dimension_semantics<arbitrary>], iteration_bounds = array<i64: 1, 1, 1, 1>, scalar_prefetch = 0 : i64, scratch_operands = 1 : i64, tpu.core_type = #tpu.core_type<tc>, window_params = [{transform_indices = @transform_0, window_bounds = array<i64: 1, 512, 128>}, {transform_indices = @transform_1, window_bounds = array<i64: 1, 128, 128>}, {transform_indices = @transform_2, window_bounds = array<i64: 1, 128>}, {transform_indices = @transform_3, window_bounds = array<i64: 1, 512, 128>}]} {
    %c0_i32 = arith.constant 0 : i32
    %0 = arith.cmpi eq, %arg3, %c0_i32 : i32
    %1 = arith.extui %0 : i1 to i32
    %c0_i32_0 = arith.constant 0 : i32
    %2 = arith.cmpi ne, %1, %c0_i32_0 : i32
    scf.if %2 {
      %cst_12 = arith.constant 0.000000e+00 : f32
      %14 = vector.broadcast %cst_12 : f32 to vector<512x128xf32>
      %c0_13 = arith.constant 0 : index
      %c0_14 = arith.constant 0 : index
      %15 = vector.load %arg8[%c0_13, %c0_14] : memref<512x128xf32, #tpu.memory_space<vmem>>, vector<512x128xf32>
      tpu.vector_store %arg8[%c0_13, %c0_14], %14 {strides = array<i32>} : memref<512x128xf32, #tpu.memory_space<vmem>>, vector<512x128xf32>,
    } else {
    }
    %c0 = arith.constant 0 : index
    %c0_1 = arith.constant 0 : index
    %c0_2 = arith.constant 0 : index
    %3 = vector.load %arg4[%c0, %c0_1, %c0_2] : memref<1x512x128xbf16, #tpu.memory_space<vmem>>, vector<1x512x128xbf16>
    %4 = vector.shape_cast %3 : vector<1x512x128xbf16> to vector<512x128xbf16>
    %c0_3 = arith.constant 0 : index
    %c0_4 = arith.constant 0 : index
    %c0_5 = arith.constant 0 : index
    %5 = vector.load %arg5[%c0_3, %c0_4, %c0_5] : memref<1x128x128xbf16, #tpu.memory_space<vmem>>, vector<1x128x128xbf16>
    %6 = vector.shape_cast %5 : vector<1x128x128xbf16> to vector<128x128xbf16>
    %c0_6 = arith.constant 0 : index
    %c0_7 = arith.constant 0 : index
    %7 = vector.load %arg8[%c0_6, %c0_7] : memref<512x128xf32, #tpu.memory_space<vmem>>, vector<512x128xf32>
    %cst = arith.constant dense<0.000000e+00> : vector<512x128xf32>
    %8 = tpu.matmul %4, %6, %cst {dimension_numbers = #tpu.dot_dimension_numbers<[1], [0], [0], [1], [0, 0, 1, 1], [], []>} : vector<512x128xbf16>, vector<128x128xbf16>, vector<512x128xf32> -> vector<512x128xf32>
    %9 = arith.addf %7, %8 : vector<512x128xf32>
    %c0_8 = arith.constant 0 : index
    %c0_9 = arith.constant 0 : index
    %10 = vector.load %arg8[%c0_8, %c0_9] : memref<512x128xf32, #tpu.memory_space<vmem>>, vector<512x128xf32>
    tpu.vector_store %arg8[%c0_8, %c0_9], %9 {strides = array<i32>} : memref<512x128xf32, #tpu.memory_space<vmem>>, vector<512x128xf32>,
    %c0_i32_10 = arith.constant 0 : i32
    %11 = arith.cmpi eq, %arg3, %c0_i32_10 : i32
    %12 = arith.extui %11 : i1 to i32
    %c0_i32_11 = arith.constant 0 : i32
    %13 = arith.cmpi ne, %12, %c0_i32_11 : i32
    scf.if %13 {
      %c0_12 = arith.constant 0 : index
      %c0_13 = arith.constant 0 : index
      %14 = vector.load %arg8[%c0_12, %c0_13] : memref<512x128xf32, #tpu.memory_space<vmem>>, vector<512x128xf32>
      %c0_14 = arith.constant 0 : index
      %c0_15 = arith.constant 0 : index
      %15 = vector.load %arg6[%c0_14, %c0_15] : memref<1x128xf32, #tpu.memory_space<vmem>>, vector<1x128xf32>
      %16 = vector.broadcast %15 : vector<1x128xf32> to vector<512x128xf32>
      %17 = arith.addf %14, %16 : vector<512x128xf32>
      %18 = vector.shape_cast %17 : vector<512x128xf32> to vector<1x512x128xf32>
      %c0_16 = arith.constant 0 : index
      %c0_17 = arith.constant 0 : index
      %c0_18 = arith.constant 0 : index
      %19 = vector.load %arg7[%c0_16, %c0_17, %c0_18] : memref<1x512x128xf32, #tpu.memory_space<vmem>>, vector<1x512x128xf32>
      tpu.vector_store %arg7[%c0_16, %c0_17, %c0_18], %18 {strides = array<i32>} : memref<1x512x128xf32, #tpu.memory_space<vmem>>, vector<1x512x128xf32>,
    } else {
    }
    return
  }
  func.func @transform_0(%arg0: i32, %arg1: i32, %arg2: i32, %arg3: i32) -> (i32, i32, i32) {
    %c0_i32 = arith.constant 0 : i32
    return %arg0, %arg1, %arg3 : i32, i32, i32
  }
  func.func @transform_1(%arg0: i32, %arg1: i32, %arg2: i32, %arg3: i32) -> (i32, i32, i32) {
    %c0_i32 = arith.constant 0 : i32
    return %arg0, %arg3, %arg2 : i32, i32, i32
  }
  func.func @transform_2(%arg0: i32, %arg1: i32, %arg2: i32, %arg3: i32) -> (i32, i32) {
    %c0_i32 = arith.constant 0 : i32
    %c0_i32_0 = arith.constant 0 : i32
    return %c0_i32, %arg2 : i32, i32
  }
  func.func @transform_3(%arg0: i32, %arg1: i32, %arg2: i32, %arg3: i32) -> (i32, i32, i32) {
    %c0_i32 = arith.constant 0 : i32
    return %arg0, %arg1, %arg2 : i32, i32, i32
  }
}

module attributes {stable_mosaic.version = 11 : i64} {
  func.func @_mm_kernel(%arg0: i32, %arg1: i32, %arg2: i32, %arg3: i32, %arg4: memref<1x128x128xbf16, #tpu.memory_space<vmem>>, %arg5: memref<1x128x128xbf16, #tpu.memory_space<vmem>>, %arg6: memref<1x128xf32, #tpu.memory_space<vmem>>, %arg7: memref<1x128x128xf32, #tpu.memory_space<vmem>>, %arg8: memref<128x128xf32, #tpu.memory_space<vmem>>) attributes {dimension_semantics = [#tpu.dimension_semantics<parallel>, #tpu.dimension_semantics<parallel>, #tpu.dimension_semantics<parallel>, #tpu.dimension_semantics<arbitrary>], iteration_bounds = array<i64: 1, 1, 1, 1>, scalar_prefetch = 0 : i64, scratch_operands = 1 : i64, tpu.core_type = #tpu.core_type<tc>, window_params = [{transform_indices = @transform_0, window_bounds = array<i64: 1, 128, 128>}, {transform_indices = @transform_1, window_bounds = array<i64: 1, 128, 128>}, {transform_indices = @transform_2, window_bounds = array<i64: 1, 128>}, {transform_indices = @transform_3, window_bounds = array<i64: 1, 128, 128>}]} {
    %c0_i32 = arith.constant 0 : i32
    %0 = arith.cmpi eq, %arg3, %c0_i32 : i32
    %1 = arith.extui %0 : i1 to i32
    %c0_i32_0 = arith.constant 0 : i32
    %2 = arith.cmpi ne, %1, %c0_i32_0 : i32
    scf.if %2 {
      %cst_12 = arith.constant 0.000000e+00 : f32
      %14 = vector.broadcast %cst_12 : f32 to vector<128x128xf32>
      %c0_13 = arith.constant 0 : index
      %c0_14 = arith.constant 0 : index
      %15 = vector.load %arg8[%c0_13, %c0_14] : memref<128x128xf32, #tpu.memory_space<vmem>>, vector<128x128xf32>
      tpu.vector_store %arg8[%c0_13, %c0_14], %14 {strides = array<i32>} : memref<128x128xf32, #tpu.memory_space<vmem>>, vector<128x128xf32>,
    } else {
    }
    %c0 = arith.constant 0 : index
    %c0_1 = arith.constant 0 : index
    %c0_2 = arith.constant 0 : index
    %3 = vector.load %arg4[%c0, %c0_1, %c0_2] : memref<1x128x128xbf16, #tpu.memory_space<vmem>>, vector<1x128x128xbf16>
    %4 = vector.shape_cast %3 : vector<1x128x128xbf16> to vector<128x128xbf16>
    %c0_3 = arith.constant 0 : index
    %c0_4 = arith.constant 0 : index
    %c0_5 = arith.constant 0 : index
    %5 = vector.load %arg5[%c0_3, %c0_4, %c0_5] : memref<1x128x128xbf16, #tpu.memory_space<vmem>>, vector<1x128x128xbf16>
    %6 = vector.shape_cast %5 : vector<1x128x128xbf16> to vector<128x128xbf16>
    %c0_6 = arith.constant 0 : index
    %c0_7 = arith.constant 0 : index
    %7 = vector.load %arg8[%c0_6, %c0_7] : memref<128x128xf32, #tpu.memory_space<vmem>>, vector<128x128xf32>
    %cst = arith.constant dense<0.000000e+00> : vector<128x128xf32>
    %8 = tpu.matmul %4, %6, %cst {dimension_numbers = #tpu.dot_dimension_numbers<[1], [0], [0], [1], [0, 0, 1, 1], [], []>} : vector<128x128xbf16>, vector<128x128xbf16>, vector<128x128xf32> -> vector<128x128xf32>
    %9 = arith.addf %7, %8 : vector<128x128xf32>
    %c0_8 = arith.constant 0 : index
    %c0_9 = arith.constant 0 : index
    %10 = vector.load %arg8[%c0_8, %c0_9] : memref<128x128xf32, #tpu.memory_space<vmem>>, vector<128x128xf32>
    tpu.vector_store %arg8[%c0_8, %c0_9], %9 {strides = array<i32>} : memref<128x128xf32, #tpu.memory_space<vmem>>, vector<128x128xf32>,
    %c0_i32_10 = arith.constant 0 : i32
    %11 = arith.cmpi eq, %arg3, %c0_i32_10 : i32
    %12 = arith.extui %11 : i1 to i32
    %c0_i32_11 = arith.constant 0 : i32
    %13 = arith.cmpi ne, %12, %c0_i32_11 : i32
    scf.if %13 {
      %c0_12 = arith.constant 0 : index
      %c0_13 = arith.constant 0 : index
      %14 = vector.load %arg8[%c0_12, %c0_13] : memref<128x128xf32, #tpu.memory_space<vmem>>, vector<128x128xf32>
      %c0_14 = arith.constant 0 : index
      %c0_15 = arith.constant 0 : index
      %15 = vector.load %arg6[%c0_14, %c0_15] : memref<1x128xf32, #tpu.memory_space<vmem>>, vector<1x128xf32>
      %16 = vector.broadcast %15 : vector<1x128xf32> to vector<128x128xf32>
      %17 = arith.addf %14, %16 : vector<128x128xf32>
      %18 = vector.shape_cast %17 : vector<128x128xf32> to vector<1x128x128xf32>
      %c0_16 = arith.constant 0 : index
      %c0_17 = arith.constant 0 : index
      %c0_18 = arith.constant 0 : index
      %19 = vector.load %arg7[%c0_16, %c0_17, %c0_18] : memref<1x128x128xf32, #tpu.memory_space<vmem>>, vector<1x128x128xf32>
      tpu.vector_store %arg7[%c0_16, %c0_17, %c0_18], %18 {strides = array<i32>} : memref<1x128x128xf32, #tpu.memory_space<vmem>>, vector<1x128x128xf32>,
    } else {
    }
    return
  }
  func.func @transform_0(%arg0: i32, %arg1: i32, %arg2: i32, %arg3: i32) -> (i32, i32, i32) {
    %c0_i32 = arith.constant 0 : i32
    return %arg0, %arg1, %arg3 : i32, i32, i32
  }
  func.func @transform_1(%arg0: i32, %arg1: i32, %arg2: i32, %arg3: i32) -> (i32, i32, i32) {
    %c0_i32 = arith.constant 0 : i32
    return %arg0, %arg3, %arg2 : i32, i32, i32
  }
  func.func @transform_2(%arg0: i32, %arg1: i32, %arg2: i32, %arg3: i32) -> (i32, i32) {
    %c0_i32 = arith.constant 0 : i32
    %c0_i32_0 = arith.constant 0 : i32
    return %c0_i32, %arg2 : i32, i32
  }
  func.func @transform_3(%arg0: i32, %arg1: i32, %arg2: i32, %arg3: i32) -> (i32, i32, i32) {
    %c0_i32 = arith.constant 0 : i32
    return %arg0, %arg1, %arg2 : i32, i32, i32
  }
}

module attributes {stable_mosaic.version = 11 : i64} {
  func.func @_bn_stats_kernel(%arg0: i32, %arg1: memref<128x128xf32, #tpu.memory_space<vmem>>, %arg2: memref<2x128xf32, #tpu.memory_space<vmem>>) attributes {dimension_semantics = [#tpu.dimension_semantics<arbitrary>], iteration_bounds = array<i64: 1>, scalar_prefetch = 0 : i64, scratch_operands = 0 : i64, tpu.core_type = #tpu.core_type<tc>, window_params = [{transform_indices = @transform_0, window_bounds = array<i64: 128, 128>}, {pipeline_mode = #tpu.pipeline_mode<synchronous>, transform_indices = @transform_1, window_bounds = array<i64: 2, 128>}]} {
    %c0_i32 = arith.constant 0 : i32
    %0 = arith.cmpi eq, %arg0, %c0_i32 : i32
    %1 = arith.extui %0 : i1 to i32
    %c0_i32_0 = arith.constant 0 : i32
    %2 = arith.cmpi ne, %1, %c0_i32_0 : i32
    scf.if %2 {
      %cst_9 = arith.constant 0.000000e+00 : f32
      %16 = vector.broadcast %cst_9 : f32 to vector<2x128xf32>
      %c0_10 = arith.constant 0 : index
      %c0_11 = arith.constant 0 : index
      %17 = vector.load %arg2[%c0_10, %c0_11] : memref<2x128xf32, #tpu.memory_space<vmem>>, vector<2x128xf32>
      tpu.vector_store %arg2[%c0_10, %c0_11], %16 {strides = array<i32>} : memref<2x128xf32, #tpu.memory_space<vmem>>, vector<2x128xf32>,
    } else {
    }
    %c0 = arith.constant 0 : index
    %c0_1 = arith.constant 0 : index
    %3 = vector.load %arg1[%c0, %c0_1] : memref<128x128xf32, #tpu.memory_space<vmem>>, vector<128x128xf32>
    %cst = arith.constant dense<0.000000e+00> : vector<128xf32>
    %4 = vector.multi_reduction <add>, %3, %cst [0] : vector<128x128xf32> to vector<128xf32>
    %5 = vector.shape_cast %4 : vector<128xf32> to vector<1x128xf32>
    %6 = arith.mulf %3, %3 : vector<128x128xf32>
    %cst_2 = arith.constant dense<0.000000e+00> : vector<128xf32>
    %7 = vector.multi_reduction <add>, %6, %cst_2 [0] : vector<128x128xf32> to vector<128xf32>
    %8 = vector.shape_cast %7 : vector<128xf32> to vector<1x128xf32>
    %c0_3 = arith.constant 0 : index
    %c0_4 = arith.constant 0 : index
    %9 = vector.load %arg2[%c0_3, %c0_4] : memref<2x128xf32, #tpu.memory_space<vmem>>, vector<2x128xf32>
    %10 = tpu.concatenate %5, %8 in 0 : vector<1x128xf32>, vector<1x128xf32> -> vector<2x128xf32>
    %11 = arith.addf %9, %10 : vector<2x128xf32>
    %c0_5 = arith.constant 0 : index
    %c0_6 = arith.constant 0 : index
    %12 = vector.load %arg2[%c0_5, %c0_6] : memref<2x128xf32, #tpu.memory_space<vmem>>, vector<2x128xf32>
    tpu.vector_store %arg2[%c0_5, %c0_6], %11 {strides = array<i32>} : memref<2x128xf32, #tpu.memory_space<vmem>>, vector<2x128xf32>,
    %c0_i32_7 = arith.constant 0 : i32
    %13 = arith.cmpi eq, %arg0, %c0_i32_7 : i32
    %14 = arith.extui %13 : i1 to i32
    %c0_i32_8 = arith.constant 0 : i32
    %15 = arith.cmpi ne, %14, %c0_i32_8 : i32
    scf.if %15 {
      %c0_9 = arith.constant 0 : index
      %c0_10 = arith.constant 0 : index
      %16 = vector.load %arg2[%c0_9, %c0_10] : memref<2x128xf32, #tpu.memory_space<vmem>>, vector<2x128xf32>
      %17 = vector.extract_strided_slice %16 {offsets = [0, 0], sizes = [1, 128], strides = [1, 1]} : vector<2x128xf32> to vector<1x128xf32>
      %cst_11 = arith.constant 7.812500e-03 : f32
      %18 = vector.broadcast %cst_11 : f32 to vector<1x128xf32>
      %19 = arith.mulf %17, %18 : vector<1x128xf32>
      %20 = vector.extract_strided_slice %16 {offsets = [1, 0], sizes = [1, 128], strides = [1, 1]} : vector<2x128xf32> to vector<1x128xf32>
      %cst_12 = arith.constant 7.812500e-03 : f32
      %21 = vector.broadcast %cst_12 : f32 to vector<1x128xf32>
      %22 = arith.mulf %20, %21 : vector<1x128xf32>
      %23 = arith.mulf %19, %19 : vector<1x128xf32>
      %24 = arith.subf %22, %23 : vector<1x128xf32>
      %cst_13 = arith.constant 0.000000e+00 : f32
      %25 = vector.broadcast %cst_13 : f32 to vector<1x128xf32>
      %26 = arith.maximumf %24, %25 : vector<1x128xf32>
      %cst_14 = arith.constant 9.99999974E-6 : f32
      %27 = vector.broadcast %cst_14 : f32 to vector<1x128xf32>
      %28 = arith.addf %26, %27 : vector<1x128xf32>
      %29 = math.rsqrt %28 : vector<1x128xf32>
      %cst_15 = arith.constant 0.000000e+00 : f32
      %30 = vector.broadcast %cst_15 : f32 to vector<1x128xf32>
      %31 = arith.subf %30, %19 : vector<1x128xf32>
      %32 = arith.mulf %31, %29 : vector<1x128xf32>
      %33 = tpu.concatenate %29, %32 in 0 : vector<1x128xf32>, vector<1x128xf32> -> vector<2x128xf32>
      %c0_16 = arith.constant 0 : index
      %c0_17 = arith.constant 0 : index
      %34 = vector.load %arg2[%c0_16, %c0_17] : memref<2x128xf32, #tpu.memory_space<vmem>>, vector<2x128xf32>
      tpu.vector_store %arg2[%c0_16, %c0_17], %33 {strides = array<i32>} : memref<2x128xf32, #tpu.memory_space<vmem>>, vector<2x128xf32>,
    } else {
    }
    return
  }
  func.func @transform_0(%arg0: i32) -> (i32, i32) {
    %c0_i32 = arith.constant 0 : i32
    %c0_i32_0 = arith.constant 0 : i32
    return %arg0, %c0_i32 : i32, i32
  }
  func.func @transform_1(%arg0: i32) -> (i32, i32) {
    %c0_i32 = arith.constant 0 : i32
    %c0_i32_0 = arith.constant 0 : i32
    %c0_i32_1 = arith.constant 0 : i32
    return %c0_i32, %c0_i32_0 : i32, i32
  }
}

module attributes {stable_mosaic.version = 11 : i64} {
  func.func @_bn_stats_kernel(%arg0: i32, %arg1: memref<32x128xf32, #tpu.memory_space<vmem>>, %arg2: memref<2x128xf32, #tpu.memory_space<vmem>>) attributes {dimension_semantics = [#tpu.dimension_semantics<arbitrary>], iteration_bounds = array<i64: 1>, scalar_prefetch = 0 : i64, scratch_operands = 0 : i64, tpu.core_type = #tpu.core_type<tc>, window_params = [{transform_indices = @transform_0, window_bounds = array<i64: 32, 128>}, {pipeline_mode = #tpu.pipeline_mode<synchronous>, transform_indices = @transform_1, window_bounds = array<i64: 2, 128>}]} {
    %c0_i32 = arith.constant 0 : i32
    %0 = arith.cmpi eq, %arg0, %c0_i32 : i32
    %1 = arith.extui %0 : i1 to i32
    %c0_i32_0 = arith.constant 0 : i32
    %2 = arith.cmpi ne, %1, %c0_i32_0 : i32
    scf.if %2 {
      %cst_9 = arith.constant 0.000000e+00 : f32
      %16 = vector.broadcast %cst_9 : f32 to vector<2x128xf32>
      %c0_10 = arith.constant 0 : index
      %c0_11 = arith.constant 0 : index
      %17 = vector.load %arg2[%c0_10, %c0_11] : memref<2x128xf32, #tpu.memory_space<vmem>>, vector<2x128xf32>
      tpu.vector_store %arg2[%c0_10, %c0_11], %16 {strides = array<i32>} : memref<2x128xf32, #tpu.memory_space<vmem>>, vector<2x128xf32>,
    } else {
    }
    %c0 = arith.constant 0 : index
    %c0_1 = arith.constant 0 : index
    %3 = vector.load %arg1[%c0, %c0_1] : memref<32x128xf32, #tpu.memory_space<vmem>>, vector<32x128xf32>
    %cst = arith.constant dense<0.000000e+00> : vector<128xf32>
    %4 = vector.multi_reduction <add>, %3, %cst [0] : vector<32x128xf32> to vector<128xf32>
    %5 = vector.shape_cast %4 : vector<128xf32> to vector<1x128xf32>
    %6 = arith.mulf %3, %3 : vector<32x128xf32>
    %cst_2 = arith.constant dense<0.000000e+00> : vector<128xf32>
    %7 = vector.multi_reduction <add>, %6, %cst_2 [0] : vector<32x128xf32> to vector<128xf32>
    %8 = vector.shape_cast %7 : vector<128xf32> to vector<1x128xf32>
    %c0_3 = arith.constant 0 : index
    %c0_4 = arith.constant 0 : index
    %9 = vector.load %arg2[%c0_3, %c0_4] : memref<2x128xf32, #tpu.memory_space<vmem>>, vector<2x128xf32>
    %10 = tpu.concatenate %5, %8 in 0 : vector<1x128xf32>, vector<1x128xf32> -> vector<2x128xf32>
    %11 = arith.addf %9, %10 : vector<2x128xf32>
    %c0_5 = arith.constant 0 : index
    %c0_6 = arith.constant 0 : index
    %12 = vector.load %arg2[%c0_5, %c0_6] : memref<2x128xf32, #tpu.memory_space<vmem>>, vector<2x128xf32>
    tpu.vector_store %arg2[%c0_5, %c0_6], %11 {strides = array<i32>} : memref<2x128xf32, #tpu.memory_space<vmem>>, vector<2x128xf32>,
    %c0_i32_7 = arith.constant 0 : i32
    %13 = arith.cmpi eq, %arg0, %c0_i32_7 : i32
    %14 = arith.extui %13 : i1 to i32
    %c0_i32_8 = arith.constant 0 : i32
    %15 = arith.cmpi ne, %14, %c0_i32_8 : i32
    scf.if %15 {
      %c0_9 = arith.constant 0 : index
      %c0_10 = arith.constant 0 : index
      %16 = vector.load %arg2[%c0_9, %c0_10] : memref<2x128xf32, #tpu.memory_space<vmem>>, vector<2x128xf32>
      %17 = vector.extract_strided_slice %16 {offsets = [0, 0], sizes = [1, 128], strides = [1, 1]} : vector<2x128xf32> to vector<1x128xf32>
      %cst_11 = arith.constant 3.125000e-02 : f32
      %18 = vector.broadcast %cst_11 : f32 to vector<1x128xf32>
      %19 = arith.mulf %17, %18 : vector<1x128xf32>
      %20 = vector.extract_strided_slice %16 {offsets = [1, 0], sizes = [1, 128], strides = [1, 1]} : vector<2x128xf32> to vector<1x128xf32>
      %cst_12 = arith.constant 3.125000e-02 : f32
      %21 = vector.broadcast %cst_12 : f32 to vector<1x128xf32>
      %22 = arith.mulf %20, %21 : vector<1x128xf32>
      %23 = arith.mulf %19, %19 : vector<1x128xf32>
      %24 = arith.subf %22, %23 : vector<1x128xf32>
      %cst_13 = arith.constant 0.000000e+00 : f32
      %25 = vector.broadcast %cst_13 : f32 to vector<1x128xf32>
      %26 = arith.maximumf %24, %25 : vector<1x128xf32>
      %cst_14 = arith.constant 9.99999974E-6 : f32
      %27 = vector.broadcast %cst_14 : f32 to vector<1x128xf32>
      %28 = arith.addf %26, %27 : vector<1x128xf32>
      %29 = math.rsqrt %28 : vector<1x128xf32>
      %cst_15 = arith.constant 0.000000e+00 : f32
      %30 = vector.broadcast %cst_15 : f32 to vector<1x128xf32>
      %31 = arith.subf %30, %19 : vector<1x128xf32>
      %32 = arith.mulf %31, %29 : vector<1x128xf32>
      %33 = tpu.concatenate %29, %32 in 0 : vector<1x128xf32>, vector<1x128xf32> -> vector<2x128xf32>
      %c0_16 = arith.constant 0 : index
      %c0_17 = arith.constant 0 : index
      %34 = vector.load %arg2[%c0_16, %c0_17] : memref<2x128xf32, #tpu.memory_space<vmem>>, vector<2x128xf32>
      tpu.vector_store %arg2[%c0_16, %c0_17], %33 {strides = array<i32>} : memref<2x128xf32, #tpu.memory_space<vmem>>, vector<2x128xf32>,
    } else {
    }
    return
  }
  func.func @transform_0(%arg0: i32) -> (i32, i32) {
    %c0_i32 = arith.constant 0 : i32
    %c0_i32_0 = arith.constant 0 : i32
    return %arg0, %c0_i32 : i32, i32
  }
  func.func @transform_1(%arg0: i32) -> (i32, i32) {
    %c0_i32 = arith.constant 0 : i32
    %c0_i32_0 = arith.constant 0 : i32
    %c0_i32_1 = arith.constant 0 : i32
    return %c0_i32, %c0_i32_0 : i32, i32
  }
}

module attributes {stable_mosaic.version = 11 : i64} {
  func.func @_mm_kernel(%arg0: i32, %arg1: i32, %arg2: i32, %arg3: i32, %arg4: memref<1x32x256xbf16, #tpu.memory_space<vmem>>, %arg5: memref<1x256x128xbf16, #tpu.memory_space<vmem>>, %arg6: memref<1x128xf32, #tpu.memory_space<vmem>>, %arg7: memref<1x32x128xf32, #tpu.memory_space<vmem>>, %arg8: memref<32x128xf32, #tpu.memory_space<vmem>>) attributes {dimension_semantics = [#tpu.dimension_semantics<parallel>, #tpu.dimension_semantics<parallel>, #tpu.dimension_semantics<parallel>, #tpu.dimension_semantics<arbitrary>], iteration_bounds = array<i64: 1, 1, 1, 1>, scalar_prefetch = 0 : i64, scratch_operands = 1 : i64, tpu.core_type = #tpu.core_type<tc>, window_params = [{transform_indices = @transform_0, window_bounds = array<i64: 1, 32, 256>}, {transform_indices = @transform_1, window_bounds = array<i64: 1, 256, 128>}, {transform_indices = @transform_2, window_bounds = array<i64: 1, 128>}, {transform_indices = @transform_3, window_bounds = array<i64: 1, 32, 128>}]} {
    %c0_i32 = arith.constant 0 : i32
    %0 = arith.cmpi eq, %arg3, %c0_i32 : i32
    %1 = arith.extui %0 : i1 to i32
    %c0_i32_0 = arith.constant 0 : i32
    %2 = arith.cmpi ne, %1, %c0_i32_0 : i32
    scf.if %2 {
      %cst_12 = arith.constant 0.000000e+00 : f32
      %14 = vector.broadcast %cst_12 : f32 to vector<32x128xf32>
      %c0_13 = arith.constant 0 : index
      %c0_14 = arith.constant 0 : index
      %15 = vector.load %arg8[%c0_13, %c0_14] : memref<32x128xf32, #tpu.memory_space<vmem>>, vector<32x128xf32>
      tpu.vector_store %arg8[%c0_13, %c0_14], %14 {strides = array<i32>} : memref<32x128xf32, #tpu.memory_space<vmem>>, vector<32x128xf32>,
    } else {
    }
    %c0 = arith.constant 0 : index
    %c0_1 = arith.constant 0 : index
    %c0_2 = arith.constant 0 : index
    %3 = vector.load %arg4[%c0, %c0_1, %c0_2] : memref<1x32x256xbf16, #tpu.memory_space<vmem>>, vector<1x32x256xbf16>
    %4 = vector.shape_cast %3 : vector<1x32x256xbf16> to vector<32x256xbf16>
    %c0_3 = arith.constant 0 : index
    %c0_4 = arith.constant 0 : index
    %c0_5 = arith.constant 0 : index
    %5 = vector.load %arg5[%c0_3, %c0_4, %c0_5] : memref<1x256x128xbf16, #tpu.memory_space<vmem>>, vector<1x256x128xbf16>
    %6 = vector.shape_cast %5 : vector<1x256x128xbf16> to vector<256x128xbf16>
    %c0_6 = arith.constant 0 : index
    %c0_7 = arith.constant 0 : index
    %7 = vector.load %arg8[%c0_6, %c0_7] : memref<32x128xf32, #tpu.memory_space<vmem>>, vector<32x128xf32>
    %cst = arith.constant dense<0.000000e+00> : vector<32x128xf32>
    %8 = tpu.matmul %4, %6, %cst {dimension_numbers = #tpu.dot_dimension_numbers<[1], [0], [0], [1], [0, 0, 1, 1], [], []>} : vector<32x256xbf16>, vector<256x128xbf16>, vector<32x128xf32> -> vector<32x128xf32>
    %9 = arith.addf %7, %8 : vector<32x128xf32>
    %c0_8 = arith.constant 0 : index
    %c0_9 = arith.constant 0 : index
    %10 = vector.load %arg8[%c0_8, %c0_9] : memref<32x128xf32, #tpu.memory_space<vmem>>, vector<32x128xf32>
    tpu.vector_store %arg8[%c0_8, %c0_9], %9 {strides = array<i32>} : memref<32x128xf32, #tpu.memory_space<vmem>>, vector<32x128xf32>,
    %c0_i32_10 = arith.constant 0 : i32
    %11 = arith.cmpi eq, %arg3, %c0_i32_10 : i32
    %12 = arith.extui %11 : i1 to i32
    %c0_i32_11 = arith.constant 0 : i32
    %13 = arith.cmpi ne, %12, %c0_i32_11 : i32
    scf.if %13 {
      %c0_12 = arith.constant 0 : index
      %c0_13 = arith.constant 0 : index
      %14 = vector.load %arg8[%c0_12, %c0_13] : memref<32x128xf32, #tpu.memory_space<vmem>>, vector<32x128xf32>
      %c0_14 = arith.constant 0 : index
      %c0_15 = arith.constant 0 : index
      %15 = vector.load %arg6[%c0_14, %c0_15] : memref<1x128xf32, #tpu.memory_space<vmem>>, vector<1x128xf32>
      %16 = vector.broadcast %15 : vector<1x128xf32> to vector<32x128xf32>
      %17 = arith.addf %14, %16 : vector<32x128xf32>
      %18 = vector.shape_cast %17 : vector<32x128xf32> to vector<1x32x128xf32>
      %c0_16 = arith.constant 0 : index
      %c0_17 = arith.constant 0 : index
      %c0_18 = arith.constant 0 : index
      %19 = vector.load %arg7[%c0_16, %c0_17, %c0_18] : memref<1x32x128xf32, #tpu.memory_space<vmem>>, vector<1x32x128xf32>
      tpu.vector_store %arg7[%c0_16, %c0_17, %c0_18], %18 {strides = array<i32>} : memref<1x32x128xf32, #tpu.memory_space<vmem>>, vector<1x32x128xf32>,
    } else {
    }
    return
  }
  func.func @transform_0(%arg0: i32, %arg1: i32, %arg2: i32, %arg3: i32) -> (i32, i32, i32) {
    %c0_i32 = arith.constant 0 : i32
    return %arg0, %arg1, %arg3 : i32, i32, i32
  }
  func.func @transform_1(%arg0: i32, %arg1: i32, %arg2: i32, %arg3: i32) -> (i32, i32, i32) {
    %c0_i32 = arith.constant 0 : i32
    return %arg0, %arg3, %arg2 : i32, i32, i32
  }
  func.func @transform_2(%arg0: i32, %arg1: i32, %arg2: i32, %arg3: i32) -> (i32, i32) {
    %c0_i32 = arith.constant 0 : i32
    %c0_i32_0 = arith.constant 0 : i32
    return %c0_i32, %arg2 : i32, i32
  }
  func.func @transform_3(%arg0: i32, %arg1: i32, %arg2: i32, %arg3: i32) -> (i32, i32, i32) {
    %c0_i32 = arith.constant 0 : i32
    return %arg0, %arg1, %arg2 : i32, i32, i32
  }
}

module attributes {stable_mosaic.version = 11 : i64} {
  func.func @_mm_kernel(%arg0: i32, %arg1: i32, %arg2: i32, %arg3: i32, %arg4: memref<1x8x512xbf16, #tpu.memory_space<vmem>>, %arg5: memref<1x512x128xbf16, #tpu.memory_space<vmem>>, %arg6: memref<1x128xf32, #tpu.memory_space<vmem>>, %arg7: memref<1x8x128xf32, #tpu.memory_space<vmem>>, %arg8: memref<8x128xf32, #tpu.memory_space<vmem>>) attributes {dimension_semantics = [#tpu.dimension_semantics<parallel>, #tpu.dimension_semantics<parallel>, #tpu.dimension_semantics<parallel>, #tpu.dimension_semantics<arbitrary>], iteration_bounds = array<i64: 1, 1, 1, 1>, scalar_prefetch = 0 : i64, scratch_operands = 1 : i64, tpu.core_type = #tpu.core_type<tc>, window_params = [{transform_indices = @transform_0, window_bounds = array<i64: 1, 8, 512>}, {transform_indices = @transform_1, window_bounds = array<i64: 1, 512, 128>}, {transform_indices = @transform_2, window_bounds = array<i64: 1, 128>}, {transform_indices = @transform_3, window_bounds = array<i64: 1, 8, 128>}]} {
    %c0_i32 = arith.constant 0 : i32
    %0 = arith.cmpi eq, %arg3, %c0_i32 : i32
    %1 = arith.extui %0 : i1 to i32
    %c0_i32_0 = arith.constant 0 : i32
    %2 = arith.cmpi ne, %1, %c0_i32_0 : i32
    scf.if %2 {
      %cst_12 = arith.constant 0.000000e+00 : f32
      %14 = vector.broadcast %cst_12 : f32 to vector<8x128xf32>
      %c0_13 = arith.constant 0 : index
      %c0_14 = arith.constant 0 : index
      %15 = vector.load %arg8[%c0_13, %c0_14] : memref<8x128xf32, #tpu.memory_space<vmem>>, vector<8x128xf32>
      tpu.vector_store %arg8[%c0_13, %c0_14], %14 {strides = array<i32>} : memref<8x128xf32, #tpu.memory_space<vmem>>, vector<8x128xf32>,
    } else {
    }
    %c0 = arith.constant 0 : index
    %c0_1 = arith.constant 0 : index
    %c0_2 = arith.constant 0 : index
    %3 = vector.load %arg4[%c0, %c0_1, %c0_2] : memref<1x8x512xbf16, #tpu.memory_space<vmem>>, vector<1x8x512xbf16>
    %4 = vector.shape_cast %3 : vector<1x8x512xbf16> to vector<8x512xbf16>
    %c0_3 = arith.constant 0 : index
    %c0_4 = arith.constant 0 : index
    %c0_5 = arith.constant 0 : index
    %5 = vector.load %arg5[%c0_3, %c0_4, %c0_5] : memref<1x512x128xbf16, #tpu.memory_space<vmem>>, vector<1x512x128xbf16>
    %6 = vector.shape_cast %5 : vector<1x512x128xbf16> to vector<512x128xbf16>
    %c0_6 = arith.constant 0 : index
    %c0_7 = arith.constant 0 : index
    %7 = vector.load %arg8[%c0_6, %c0_7] : memref<8x128xf32, #tpu.memory_space<vmem>>, vector<8x128xf32>
    %cst = arith.constant dense<0.000000e+00> : vector<8x128xf32>
    %8 = tpu.matmul %4, %6, %cst {dimension_numbers = #tpu.dot_dimension_numbers<[1], [0], [0], [1], [0, 0, 1, 1], [], []>} : vector<8x512xbf16>, vector<512x128xbf16>, vector<8x128xf32> -> vector<8x128xf32>
    %9 = arith.addf %7, %8 : vector<8x128xf32>
    %c0_8 = arith.constant 0 : index
    %c0_9 = arith.constant 0 : index
    %10 = vector.load %arg8[%c0_8, %c0_9] : memref<8x128xf32, #tpu.memory_space<vmem>>, vector<8x128xf32>
    tpu.vector_store %arg8[%c0_8, %c0_9], %9 {strides = array<i32>} : memref<8x128xf32, #tpu.memory_space<vmem>>, vector<8x128xf32>,
    %c0_i32_10 = arith.constant 0 : i32
    %11 = arith.cmpi eq, %arg3, %c0_i32_10 : i32
    %12 = arith.extui %11 : i1 to i32
    %c0_i32_11 = arith.constant 0 : i32
    %13 = arith.cmpi ne, %12, %c0_i32_11 : i32
    scf.if %13 {
      %c0_12 = arith.constant 0 : index
      %c0_13 = arith.constant 0 : index
      %14 = vector.load %arg8[%c0_12, %c0_13] : memref<8x128xf32, #tpu.memory_space<vmem>>, vector<8x128xf32>
      %c0_14 = arith.constant 0 : index
      %c0_15 = arith.constant 0 : index
      %15 = vector.load %arg6[%c0_14, %c0_15] : memref<1x128xf32, #tpu.memory_space<vmem>>, vector<1x128xf32>
      %16 = vector.broadcast %15 : vector<1x128xf32> to vector<8x128xf32>
      %17 = arith.addf %14, %16 : vector<8x128xf32>
      %18 = vector.shape_cast %17 : vector<8x128xf32> to vector<1x8x128xf32>
      %c0_16 = arith.constant 0 : index
      %c0_17 = arith.constant 0 : index
      %c0_18 = arith.constant 0 : index
      %19 = vector.load %arg7[%c0_16, %c0_17, %c0_18] : memref<1x8x128xf32, #tpu.memory_space<vmem>>, vector<1x8x128xf32>
      tpu.vector_store %arg7[%c0_16, %c0_17, %c0_18], %18 {strides = array<i32>} : memref<1x8x128xf32, #tpu.memory_space<vmem>>, vector<1x8x128xf32>,
    } else {
    }
    return
  }
  func.func @transform_0(%arg0: i32, %arg1: i32, %arg2: i32, %arg3: i32) -> (i32, i32, i32) {
    %c0_i32 = arith.constant 0 : i32
    return %arg0, %arg1, %arg3 : i32, i32, i32
  }
  func.func @transform_1(%arg0: i32, %arg1: i32, %arg2: i32, %arg3: i32) -> (i32, i32, i32) {
    %c0_i32 = arith.constant 0 : i32
    return %arg0, %arg3, %arg2 : i32, i32, i32
  }
  func.func @transform_2(%arg0: i32, %arg1: i32, %arg2: i32, %arg3: i32) -> (i32, i32) {
    %c0_i32 = arith.constant 0 : i32
    %c0_i32_0 = arith.constant 0 : i32
    return %c0_i32, %arg2 : i32, i32
  }
  func.func @transform_3(%arg0: i32, %arg1: i32, %arg2: i32, %arg3: i32) -> (i32, i32, i32) {
    %c0_i32 = arith.constant 0 : i32
    return %arg0, %arg1, %arg2 : i32, i32, i32
  }
}

module attributes {stable_mosaic.version = 11 : i64} {
  func.func @_bn_stats_kernel(%arg0: i32, %arg1: memref<8x128xf32, #tpu.memory_space<vmem>>, %arg2: memref<2x128xf32, #tpu.memory_space<vmem>>) attributes {dimension_semantics = [#tpu.dimension_semantics<arbitrary>], iteration_bounds = array<i64: 1>, scalar_prefetch = 0 : i64, scratch_operands = 0 : i64, tpu.core_type = #tpu.core_type<tc>, window_params = [{transform_indices = @transform_0, window_bounds = array<i64: 8, 128>}, {pipeline_mode = #tpu.pipeline_mode<synchronous>, transform_indices = @transform_1, window_bounds = array<i64: 2, 128>}]} {
    %c0_i32 = arith.constant 0 : i32
    %0 = arith.cmpi eq, %arg0, %c0_i32 : i32
    %1 = arith.extui %0 : i1 to i32
    %c0_i32_0 = arith.constant 0 : i32
    %2 = arith.cmpi ne, %1, %c0_i32_0 : i32
    scf.if %2 {
      %cst_9 = arith.constant 0.000000e+00 : f32
      %16 = vector.broadcast %cst_9 : f32 to vector<2x128xf32>
      %c0_10 = arith.constant 0 : index
      %c0_11 = arith.constant 0 : index
      %17 = vector.load %arg2[%c0_10, %c0_11] : memref<2x128xf32, #tpu.memory_space<vmem>>, vector<2x128xf32>
      tpu.vector_store %arg2[%c0_10, %c0_11], %16 {strides = array<i32>} : memref<2x128xf32, #tpu.memory_space<vmem>>, vector<2x128xf32>,
    } else {
    }
    %c0 = arith.constant 0 : index
    %c0_1 = arith.constant 0 : index
    %3 = vector.load %arg1[%c0, %c0_1] : memref<8x128xf32, #tpu.memory_space<vmem>>, vector<8x128xf32>
    %cst = arith.constant dense<0.000000e+00> : vector<128xf32>
    %4 = vector.multi_reduction <add>, %3, %cst [0] : vector<8x128xf32> to vector<128xf32>
    %5 = vector.shape_cast %4 : vector<128xf32> to vector<1x128xf32>
    %6 = arith.mulf %3, %3 : vector<8x128xf32>
    %cst_2 = arith.constant dense<0.000000e+00> : vector<128xf32>
    %7 = vector.multi_reduction <add>, %6, %cst_2 [0] : vector<8x128xf32> to vector<128xf32>
    %8 = vector.shape_cast %7 : vector<128xf32> to vector<1x128xf32>
    %c0_3 = arith.constant 0 : index
    %c0_4 = arith.constant 0 : index
    %9 = vector.load %arg2[%c0_3, %c0_4] : memref<2x128xf32, #tpu.memory_space<vmem>>, vector<2x128xf32>
    %10 = tpu.concatenate %5, %8 in 0 : vector<1x128xf32>, vector<1x128xf32> -> vector<2x128xf32>
    %11 = arith.addf %9, %10 : vector<2x128xf32>
    %c0_5 = arith.constant 0 : index
    %c0_6 = arith.constant 0 : index
    %12 = vector.load %arg2[%c0_5, %c0_6] : memref<2x128xf32, #tpu.memory_space<vmem>>, vector<2x128xf32>
    tpu.vector_store %arg2[%c0_5, %c0_6], %11 {strides = array<i32>} : memref<2x128xf32, #tpu.memory_space<vmem>>, vector<2x128xf32>,
    %c0_i32_7 = arith.constant 0 : i32
    %13 = arith.cmpi eq, %arg0, %c0_i32_7 : i32
    %14 = arith.extui %13 : i1 to i32
    %c0_i32_8 = arith.constant 0 : i32
    %15 = arith.cmpi ne, %14, %c0_i32_8 : i32
    scf.if %15 {
      %c0_9 = arith.constant 0 : index
      %c0_10 = arith.constant 0 : index
      %16 = vector.load %arg2[%c0_9, %c0_10] : memref<2x128xf32, #tpu.memory_space<vmem>>, vector<2x128xf32>
      %17 = vector.extract_strided_slice %16 {offsets = [0, 0], sizes = [1, 128], strides = [1, 1]} : vector<2x128xf32> to vector<1x128xf32>
      %cst_11 = arith.constant 1.250000e-01 : f32
      %18 = vector.broadcast %cst_11 : f32 to vector<1x128xf32>
      %19 = arith.mulf %17, %18 : vector<1x128xf32>
      %20 = vector.extract_strided_slice %16 {offsets = [1, 0], sizes = [1, 128], strides = [1, 1]} : vector<2x128xf32> to vector<1x128xf32>
      %cst_12 = arith.constant 1.250000e-01 : f32
      %21 = vector.broadcast %cst_12 : f32 to vector<1x128xf32>
      %22 = arith.mulf %20, %21 : vector<1x128xf32>
      %23 = arith.mulf %19, %19 : vector<1x128xf32>
      %24 = arith.subf %22, %23 : vector<1x128xf32>
      %cst_13 = arith.constant 0.000000e+00 : f32
      %25 = vector.broadcast %cst_13 : f32 to vector<1x128xf32>
      %26 = arith.maximumf %24, %25 : vector<1x128xf32>
      %cst_14 = arith.constant 9.99999974E-6 : f32
      %27 = vector.broadcast %cst_14 : f32 to vector<1x128xf32>
      %28 = arith.addf %26, %27 : vector<1x128xf32>
      %29 = math.rsqrt %28 : vector<1x128xf32>
      %cst_15 = arith.constant 0.000000e+00 : f32
      %30 = vector.broadcast %cst_15 : f32 to vector<1x128xf32>
      %31 = arith.subf %30, %19 : vector<1x128xf32>
      %32 = arith.mulf %31, %29 : vector<1x128xf32>
      %33 = tpu.concatenate %29, %32 in 0 : vector<1x128xf32>, vector<1x128xf32> -> vector<2x128xf32>
      %c0_16 = arith.constant 0 : index
      %c0_17 = arith.constant 0 : index
      %34 = vector.load %arg2[%c0_16, %c0_17] : memref<2x128xf32, #tpu.memory_space<vmem>>, vector<2x128xf32>
      tpu.vector_store %arg2[%c0_16, %c0_17], %33 {strides = array<i32>} : memref<2x128xf32, #tpu.memory_space<vmem>>, vector<2x128xf32>,
    } else {
    }
    return
  }
  func.func @transform_0(%arg0: i32) -> (i32, i32) {
    %c0_i32 = arith.constant 0 : i32
    %c0_i32_0 = arith.constant 0 : i32
    return %arg0, %c0_i32 : i32, i32
  }
  func.func @transform_1(%arg0: i32) -> (i32, i32) {
    %c0_i32 = arith.constant 0 : i32
    %c0_i32_0 = arith.constant 0 : i32
    %c0_i32_1 = arith.constant 0 : i32
    return %c0_i32, %c0_i32_0 : i32, i32
  }
}

module attributes {stable_mosaic.version = 11 : i64} {
  func.func @_mm_kernel(%arg0: i32, %arg1: i32, %arg2: i32, %arg3: i32, %arg4: memref<1x8x1024xbf16, #tpu.memory_space<vmem>>, %arg5: memref<1x1024x128xbf16, #tpu.memory_space<vmem>>, %arg6: memref<1x128xf32, #tpu.memory_space<vmem>>, %arg7: memref<1x8x128xf32, #tpu.memory_space<vmem>>, %arg8: memref<8x128xf32, #tpu.memory_space<vmem>>) attributes {dimension_semantics = [#tpu.dimension_semantics<parallel>, #tpu.dimension_semantics<parallel>, #tpu.dimension_semantics<parallel>, #tpu.dimension_semantics<arbitrary>], iteration_bounds = array<i64: 1, 1, 1, 1>, scalar_prefetch = 0 : i64, scratch_operands = 1 : i64, tpu.core_type = #tpu.core_type<tc>, window_params = [{transform_indices = @transform_0, window_bounds = array<i64: 1, 8, 1024>}, {transform_indices = @transform_1, window_bounds = array<i64: 1, 1024, 128>}, {transform_indices = @transform_2, window_bounds = array<i64: 1, 128>}, {transform_indices = @transform_3, window_bounds = array<i64: 1, 8, 128>}]} {
    %c0_i32 = arith.constant 0 : i32
    %0 = arith.cmpi eq, %arg3, %c0_i32 : i32
    %1 = arith.extui %0 : i1 to i32
    %c0_i32_0 = arith.constant 0 : i32
    %2 = arith.cmpi ne, %1, %c0_i32_0 : i32
    scf.if %2 {
      %cst_12 = arith.constant 0.000000e+00 : f32
      %14 = vector.broadcast %cst_12 : f32 to vector<8x128xf32>
      %c0_13 = arith.constant 0 : index
      %c0_14 = arith.constant 0 : index
      %15 = vector.load %arg8[%c0_13, %c0_14] : memref<8x128xf32, #tpu.memory_space<vmem>>, vector<8x128xf32>
      tpu.vector_store %arg8[%c0_13, %c0_14], %14 {strides = array<i32>} : memref<8x128xf32, #tpu.memory_space<vmem>>, vector<8x128xf32>,
    } else {
    }
    %c0 = arith.constant 0 : index
    %c0_1 = arith.constant 0 : index
    %c0_2 = arith.constant 0 : index
    %3 = vector.load %arg4[%c0, %c0_1, %c0_2] : memref<1x8x1024xbf16, #tpu.memory_space<vmem>>, vector<1x8x1024xbf16>
    %4 = vector.shape_cast %3 : vector<1x8x1024xbf16> to vector<8x1024xbf16>
    %c0_3 = arith.constant 0 : index
    %c0_4 = arith.constant 0 : index
    %c0_5 = arith.constant 0 : index
    %5 = vector.load %arg5[%c0_3, %c0_4, %c0_5] : memref<1x1024x128xbf16, #tpu.memory_space<vmem>>, vector<1x1024x128xbf16>
    %6 = vector.shape_cast %5 : vector<1x1024x128xbf16> to vector<1024x128xbf16>
    %c0_6 = arith.constant 0 : index
    %c0_7 = arith.constant 0 : index
    %7 = vector.load %arg8[%c0_6, %c0_7] : memref<8x128xf32, #tpu.memory_space<vmem>>, vector<8x128xf32>
    %cst = arith.constant dense<0.000000e+00> : vector<8x128xf32>
    %8 = tpu.matmul %4, %6, %cst {dimension_numbers = #tpu.dot_dimension_numbers<[1], [0], [0], [1], [0, 0, 1, 1], [], []>} : vector<8x1024xbf16>, vector<1024x128xbf16>, vector<8x128xf32> -> vector<8x128xf32>
    %9 = arith.addf %7, %8 : vector<8x128xf32>
    %c0_8 = arith.constant 0 : index
    %c0_9 = arith.constant 0 : index
    %10 = vector.load %arg8[%c0_8, %c0_9] : memref<8x128xf32, #tpu.memory_space<vmem>>, vector<8x128xf32>
    tpu.vector_store %arg8[%c0_8, %c0_9], %9 {strides = array<i32>} : memref<8x128xf32, #tpu.memory_space<vmem>>, vector<8x128xf32>,
    %c0_i32_10 = arith.constant 0 : i32
    %11 = arith.cmpi eq, %arg3, %c0_i32_10 : i32
    %12 = arith.extui %11 : i1 to i32
    %c0_i32_11 = arith.constant 0 : i32
    %13 = arith.cmpi ne, %12, %c0_i32_11 : i32
    scf.if %13 {
      %c0_12 = arith.constant 0 : index
      %c0_13 = arith.constant 0 : index
      %14 = vector.load %arg8[%c0_12, %c0_13] : memref<8x128xf32, #tpu.memory_space<vmem>>, vector<8x128xf32>
      %c0_14 = arith.constant 0 : index
      %c0_15 = arith.constant 0 : index
      %15 = vector.load %arg6[%c0_14, %c0_15] : memref<1x128xf32, #tpu.memory_space<vmem>>, vector<1x128xf32>
      %16 = vector.broadcast %15 : vector<1x128xf32> to vector<8x128xf32>
      %17 = arith.addf %14, %16 : vector<8x128xf32>
      %18 = vector.shape_cast %17 : vector<8x128xf32> to vector<1x8x128xf32>
      %c0_16 = arith.constant 0 : index
      %c0_17 = arith.constant 0 : index
      %c0_18 = arith.constant 0 : index
      %19 = vector.load %arg7[%c0_16, %c0_17, %c0_18] : memref<1x8x128xf32, #tpu.memory_space<vmem>>, vector<1x8x128xf32>
      tpu.vector_store %arg7[%c0_16, %c0_17, %c0_18], %18 {strides = array<i32>} : memref<1x8x128xf32, #tpu.memory_space<vmem>>, vector<1x8x128xf32>,
    } else {
    }
    return
  }
  func.func @transform_0(%arg0: i32, %arg1: i32, %arg2: i32, %arg3: i32) -> (i32, i32, i32) {
    %c0_i32 = arith.constant 0 : i32
    return %arg0, %arg1, %arg3 : i32, i32, i32
  }
  func.func @transform_1(%arg0: i32, %arg1: i32, %arg2: i32, %arg3: i32) -> (i32, i32, i32) {
    %c0_i32 = arith.constant 0 : i32
    return %arg0, %arg3, %arg2 : i32, i32, i32
  }
  func.func @transform_2(%arg0: i32, %arg1: i32, %arg2: i32, %arg3: i32) -> (i32, i32) {
    %c0_i32 = arith.constant 0 : i32
    %c0_i32_0 = arith.constant 0 : i32
    return %c0_i32, %arg2 : i32, i32
  }
  func.func @transform_3(%arg0: i32, %arg1: i32, %arg2: i32, %arg3: i32) -> (i32, i32, i32) {
    %c0_i32 = arith.constant 0 : i32
    return %arg0, %arg1, %arg2 : i32, i32, i32
  }
}

module attributes {stable_mosaic.version = 11 : i64} {
  func.func @_mm_kernel(%arg0: i32, %arg1: i32, %arg2: i32, %arg3: i32, %arg4: memref<1x8x256xbf16, #tpu.memory_space<vmem>>, %arg5: memref<1x256x128xbf16, #tpu.memory_space<vmem>>, %arg6: memref<1x128xf32, #tpu.memory_space<vmem>>, %arg7: memref<1x8x128xf32, #tpu.memory_space<vmem>>, %arg8: memref<8x128xf32, #tpu.memory_space<vmem>>) attributes {dimension_semantics = [#tpu.dimension_semantics<parallel>, #tpu.dimension_semantics<parallel>, #tpu.dimension_semantics<parallel>, #tpu.dimension_semantics<arbitrary>], iteration_bounds = array<i64: 4, 1, 1, 1>, scalar_prefetch = 0 : i64, scratch_operands = 1 : i64, tpu.core_type = #tpu.core_type<tc>, window_params = [{transform_indices = @transform_0, window_bounds = array<i64: 1, 8, 256>}, {transform_indices = @transform_1, window_bounds = array<i64: 1, 256, 128>}, {transform_indices = @transform_2, window_bounds = array<i64: 1, 128>}, {transform_indices = @transform_3, window_bounds = array<i64: 1, 8, 128>}]} {
    %c0_i32 = arith.constant 0 : i32
    %0 = arith.cmpi eq, %arg3, %c0_i32 : i32
    %1 = arith.extui %0 : i1 to i32
    %c0_i32_0 = arith.constant 0 : i32
    %2 = arith.cmpi ne, %1, %c0_i32_0 : i32
    scf.if %2 {
      %cst_12 = arith.constant 0.000000e+00 : f32
      %14 = vector.broadcast %cst_12 : f32 to vector<8x128xf32>
      %c0_13 = arith.constant 0 : index
      %c0_14 = arith.constant 0 : index
      %15 = vector.load %arg8[%c0_13, %c0_14] : memref<8x128xf32, #tpu.memory_space<vmem>>, vector<8x128xf32>
      tpu.vector_store %arg8[%c0_13, %c0_14], %14 {strides = array<i32>} : memref<8x128xf32, #tpu.memory_space<vmem>>, vector<8x128xf32>,
    } else {
    }
    %c0 = arith.constant 0 : index
    %c0_1 = arith.constant 0 : index
    %c0_2 = arith.constant 0 : index
    %3 = vector.load %arg4[%c0, %c0_1, %c0_2] : memref<1x8x256xbf16, #tpu.memory_space<vmem>>, vector<1x8x256xbf16>
    %4 = vector.shape_cast %3 : vector<1x8x256xbf16> to vector<8x256xbf16>
    %c0_3 = arith.constant 0 : index
    %c0_4 = arith.constant 0 : index
    %c0_5 = arith.constant 0 : index
    %5 = vector.load %arg5[%c0_3, %c0_4, %c0_5] : memref<1x256x128xbf16, #tpu.memory_space<vmem>>, vector<1x256x128xbf16>
    %6 = vector.shape_cast %5 : vector<1x256x128xbf16> to vector<256x128xbf16>
    %c0_6 = arith.constant 0 : index
    %c0_7 = arith.constant 0 : index
    %7 = vector.load %arg8[%c0_6, %c0_7] : memref<8x128xf32, #tpu.memory_space<vmem>>, vector<8x128xf32>
    %cst = arith.constant dense<0.000000e+00> : vector<8x128xf32>
    %8 = tpu.matmul %4, %6, %cst {dimension_numbers = #tpu.dot_dimension_numbers<[1], [0], [0], [1], [0, 0, 1, 1], [], []>} : vector<8x256xbf16>, vector<256x128xbf16>, vector<8x128xf32> -> vector<8x128xf32>
    %9 = arith.addf %7, %8 : vector<8x128xf32>
    %c0_8 = arith.constant 0 : index
    %c0_9 = arith.constant 0 : index
    %10 = vector.load %arg8[%c0_8, %c0_9] : memref<8x128xf32, #tpu.memory_space<vmem>>, vector<8x128xf32>
    tpu.vector_store %arg8[%c0_8, %c0_9], %9 {strides = array<i32>} : memref<8x128xf32, #tpu.memory_space<vmem>>, vector<8x128xf32>,
    %c0_i32_10 = arith.constant 0 : i32
    %11 = arith.cmpi eq, %arg3, %c0_i32_10 : i32
    %12 = arith.extui %11 : i1 to i32
    %c0_i32_11 = arith.constant 0 : i32
    %13 = arith.cmpi ne, %12, %c0_i32_11 : i32
    scf.if %13 {
      %c0_12 = arith.constant 0 : index
      %c0_13 = arith.constant 0 : index
      %14 = vector.load %arg8[%c0_12, %c0_13] : memref<8x128xf32, #tpu.memory_space<vmem>>, vector<8x128xf32>
      %c0_14 = arith.constant 0 : index
      %c0_15 = arith.constant 0 : index
      %15 = vector.load %arg6[%c0_14, %c0_15] : memref<1x128xf32, #tpu.memory_space<vmem>>, vector<1x128xf32>
      %16 = vector.broadcast %15 : vector<1x128xf32> to vector<8x128xf32>
      %17 = arith.addf %14, %16 : vector<8x128xf32>
      %18 = vector.shape_cast %17 : vector<8x128xf32> to vector<1x8x128xf32>
      %c0_16 = arith.constant 0 : index
      %c0_17 = arith.constant 0 : index
      %c0_18 = arith.constant 0 : index
      %19 = vector.load %arg7[%c0_16, %c0_17, %c0_18] : memref<1x8x128xf32, #tpu.memory_space<vmem>>, vector<1x8x128xf32>
      tpu.vector_store %arg7[%c0_16, %c0_17, %c0_18], %18 {strides = array<i32>} : memref<1x8x128xf32, #tpu.memory_space<vmem>>, vector<1x8x128xf32>,
    } else {
    }
    return
  }
  func.func @transform_0(%arg0: i32, %arg1: i32, %arg2: i32, %arg3: i32) -> (i32, i32, i32) {
    %c0_i32 = arith.constant 0 : i32
    return %arg0, %arg1, %arg3 : i32, i32, i32
  }
  func.func @transform_1(%arg0: i32, %arg1: i32, %arg2: i32, %arg3: i32) -> (i32, i32, i32) {
    %c0_i32 = arith.constant 0 : i32
    return %arg0, %arg3, %arg2 : i32, i32, i32
  }
  func.func @transform_2(%arg0: i32, %arg1: i32, %arg2: i32, %arg3: i32) -> (i32, i32) {
    %c0_i32 = arith.constant 0 : i32
    %c0_i32_0 = arith.constant 0 : i32
    return %c0_i32, %arg2 : i32, i32
  }
  func.func @transform_3(%arg0: i32, %arg1: i32, %arg2: i32, %arg3: i32) -> (i32, i32, i32) {
    %c0_i32 = arith.constant 0 : i32
    return %arg0, %arg1, %arg2 : i32, i32, i32
  }
}

module attributes {stable_mosaic.version = 11 : i64} {
  func.func @_mm_kernel(%arg0: i32, %arg1: i32, %arg2: i32, %arg3: i32, %arg4: memref<1x8x512xbf16, #tpu.memory_space<vmem>>, %arg5: memref<1x512x128xbf16, #tpu.memory_space<vmem>>, %arg6: memref<1x128xf32, #tpu.memory_space<vmem>>, %arg7: memref<1x8x128xf32, #tpu.memory_space<vmem>>, %arg8: memref<8x128xf32, #tpu.memory_space<vmem>>) attributes {dimension_semantics = [#tpu.dimension_semantics<parallel>, #tpu.dimension_semantics<parallel>, #tpu.dimension_semantics<parallel>, #tpu.dimension_semantics<arbitrary>], iteration_bounds = array<i64: 4, 1, 1, 1>, scalar_prefetch = 0 : i64, scratch_operands = 1 : i64, tpu.core_type = #tpu.core_type<tc>, window_params = [{transform_indices = @transform_0, window_bounds = array<i64: 1, 8, 512>}, {transform_indices = @transform_1, window_bounds = array<i64: 1, 512, 128>}, {transform_indices = @transform_2, window_bounds = array<i64: 1, 128>}, {transform_indices = @transform_3, window_bounds = array<i64: 1, 8, 128>}]} {
    %c0_i32 = arith.constant 0 : i32
    %0 = arith.cmpi eq, %arg3, %c0_i32 : i32
    %1 = arith.extui %0 : i1 to i32
    %c0_i32_0 = arith.constant 0 : i32
    %2 = arith.cmpi ne, %1, %c0_i32_0 : i32
    scf.if %2 {
      %cst_12 = arith.constant 0.000000e+00 : f32
      %14 = vector.broadcast %cst_12 : f32 to vector<8x128xf32>
      %c0_13 = arith.constant 0 : index
      %c0_14 = arith.constant 0 : index
      %15 = vector.load %arg8[%c0_13, %c0_14] : memref<8x128xf32, #tpu.memory_space<vmem>>, vector<8x128xf32>
      tpu.vector_store %arg8[%c0_13, %c0_14], %14 {strides = array<i32>} : memref<8x128xf32, #tpu.memory_space<vmem>>, vector<8x128xf32>,
    } else {
    }
    %c0 = arith.constant 0 : index
    %c0_1 = arith.constant 0 : index
    %c0_2 = arith.constant 0 : index
    %3 = vector.load %arg4[%c0, %c0_1, %c0_2] : memref<1x8x512xbf16, #tpu.memory_space<vmem>>, vector<1x8x512xbf16>
    %4 = vector.shape_cast %3 : vector<1x8x512xbf16> to vector<8x512xbf16>
    %c0_3 = arith.constant 0 : index
    %c0_4 = arith.constant 0 : index
    %c0_5 = arith.constant 0 : index
    %5 = vector.load %arg5[%c0_3, %c0_4, %c0_5] : memref<1x512x128xbf16, #tpu.memory_space<vmem>>, vector<1x512x128xbf16>
    %6 = vector.shape_cast %5 : vector<1x512x128xbf16> to vector<512x128xbf16>
    %c0_6 = arith.constant 0 : index
    %c0_7 = arith.constant 0 : index
    %7 = vector.load %arg8[%c0_6, %c0_7] : memref<8x128xf32, #tpu.memory_space<vmem>>, vector<8x128xf32>
    %cst = arith.constant dense<0.000000e+00> : vector<8x128xf32>
    %8 = tpu.matmul %4, %6, %cst {dimension_numbers = #tpu.dot_dimension_numbers<[1], [0], [0], [1], [0, 0, 1, 1], [], []>} : vector<8x512xbf16>, vector<512x128xbf16>, vector<8x128xf32> -> vector<8x128xf32>
    %9 = arith.addf %7, %8 : vector<8x128xf32>
    %c0_8 = arith.constant 0 : index
    %c0_9 = arith.constant 0 : index
    %10 = vector.load %arg8[%c0_8, %c0_9] : memref<8x128xf32, #tpu.memory_space<vmem>>, vector<8x128xf32>
    tpu.vector_store %arg8[%c0_8, %c0_9], %9 {strides = array<i32>} : memref<8x128xf32, #tpu.memory_space<vmem>>, vector<8x128xf32>,
    %c0_i32_10 = arith.constant 0 : i32
    %11 = arith.cmpi eq, %arg3, %c0_i32_10 : i32
    %12 = arith.extui %11 : i1 to i32
    %c0_i32_11 = arith.constant 0 : i32
    %13 = arith.cmpi ne, %12, %c0_i32_11 : i32
    scf.if %13 {
      %c0_12 = arith.constant 0 : index
      %c0_13 = arith.constant 0 : index
      %14 = vector.load %arg8[%c0_12, %c0_13] : memref<8x128xf32, #tpu.memory_space<vmem>>, vector<8x128xf32>
      %c0_14 = arith.constant 0 : index
      %c0_15 = arith.constant 0 : index
      %15 = vector.load %arg6[%c0_14, %c0_15] : memref<1x128xf32, #tpu.memory_space<vmem>>, vector<1x128xf32>
      %16 = vector.broadcast %15 : vector<1x128xf32> to vector<8x128xf32>
      %17 = arith.addf %14, %16 : vector<8x128xf32>
      %18 = vector.shape_cast %17 : vector<8x128xf32> to vector<1x8x128xf32>
      %c0_16 = arith.constant 0 : index
      %c0_17 = arith.constant 0 : index
      %c0_18 = arith.constant 0 : index
      %19 = vector.load %arg7[%c0_16, %c0_17, %c0_18] : memref<1x8x128xf32, #tpu.memory_space<vmem>>, vector<1x8x128xf32>
      tpu.vector_store %arg7[%c0_16, %c0_17, %c0_18], %18 {strides = array<i32>} : memref<1x8x128xf32, #tpu.memory_space<vmem>>, vector<1x8x128xf32>,
    } else {
    }
    return
  }
  func.func @transform_0(%arg0: i32, %arg1: i32, %arg2: i32, %arg3: i32) -> (i32, i32, i32) {
    %c0_i32 = arith.constant 0 : i32
    return %arg0, %arg1, %arg3 : i32, i32, i32
  }
  func.func @transform_1(%arg0: i32, %arg1: i32, %arg2: i32, %arg3: i32) -> (i32, i32, i32) {
    %c0_i32 = arith.constant 0 : i32
    return %arg0, %arg3, %arg2 : i32, i32, i32
  }
  func.func @transform_2(%arg0: i32, %arg1: i32, %arg2: i32, %arg3: i32) -> (i32, i32) {
    %c0_i32 = arith.constant 0 : i32
    %c0_i32_0 = arith.constant 0 : i32
    return %c0_i32, %arg2 : i32, i32
  }
  func.func @transform_3(%arg0: i32, %arg1: i32, %arg2: i32, %arg3: i32) -> (i32, i32, i32) {
    %c0_i32 = arith.constant 0 : i32
    return %arg0, %arg1, %arg2 : i32, i32, i32
  }
}

module attributes {stable_mosaic.version = 11 : i64} {
  func.func @_mm_kernel(%arg0: i32, %arg1: i32, %arg2: i32, %arg3: i32, %arg4: memref<1x32x256xbf16, #tpu.memory_space<vmem>>, %arg5: memref<1x256x128xbf16, #tpu.memory_space<vmem>>, %arg6: memref<1x128xf32, #tpu.memory_space<vmem>>, %arg7: memref<1x32x128xf32, #tpu.memory_space<vmem>>, %arg8: memref<32x128xf32, #tpu.memory_space<vmem>>) attributes {dimension_semantics = [#tpu.dimension_semantics<parallel>, #tpu.dimension_semantics<parallel>, #tpu.dimension_semantics<parallel>, #tpu.dimension_semantics<arbitrary>], iteration_bounds = array<i64: 4, 1, 1, 1>, scalar_prefetch = 0 : i64, scratch_operands = 1 : i64, tpu.core_type = #tpu.core_type<tc>, window_params = [{transform_indices = @transform_0, window_bounds = array<i64: 1, 32, 256>}, {transform_indices = @transform_1, window_bounds = array<i64: 1, 256, 128>}, {transform_indices = @transform_2, window_bounds = array<i64: 1, 128>}, {transform_indices = @transform_3, window_bounds = array<i64: 1, 32, 128>}]} {
    %c0_i32 = arith.constant 0 : i32
    %0 = arith.cmpi eq, %arg3, %c0_i32 : i32
    %1 = arith.extui %0 : i1 to i32
    %c0_i32_0 = arith.constant 0 : i32
    %2 = arith.cmpi ne, %1, %c0_i32_0 : i32
    scf.if %2 {
      %cst_12 = arith.constant 0.000000e+00 : f32
      %14 = vector.broadcast %cst_12 : f32 to vector<32x128xf32>
      %c0_13 = arith.constant 0 : index
      %c0_14 = arith.constant 0 : index
      %15 = vector.load %arg8[%c0_13, %c0_14] : memref<32x128xf32, #tpu.memory_space<vmem>>, vector<32x128xf32>
      tpu.vector_store %arg8[%c0_13, %c0_14], %14 {strides = array<i32>} : memref<32x128xf32, #tpu.memory_space<vmem>>, vector<32x128xf32>,
    } else {
    }
    %c0 = arith.constant 0 : index
    %c0_1 = arith.constant 0 : index
    %c0_2 = arith.constant 0 : index
    %3 = vector.load %arg4[%c0, %c0_1, %c0_2] : memref<1x32x256xbf16, #tpu.memory_space<vmem>>, vector<1x32x256xbf16>
    %4 = vector.shape_cast %3 : vector<1x32x256xbf16> to vector<32x256xbf16>
    %c0_3 = arith.constant 0 : index
    %c0_4 = arith.constant 0 : index
    %c0_5 = arith.constant 0 : index
    %5 = vector.load %arg5[%c0_3, %c0_4, %c0_5] : memref<1x256x128xbf16, #tpu.memory_space<vmem>>, vector<1x256x128xbf16>
    %6 = vector.shape_cast %5 : vector<1x256x128xbf16> to vector<256x128xbf16>
    %c0_6 = arith.constant 0 : index
    %c0_7 = arith.constant 0 : index
    %7 = vector.load %arg8[%c0_6, %c0_7] : memref<32x128xf32, #tpu.memory_space<vmem>>, vector<32x128xf32>
    %cst = arith.constant dense<0.000000e+00> : vector<32x128xf32>
    %8 = tpu.matmul %4, %6, %cst {dimension_numbers = #tpu.dot_dimension_numbers<[1], [0], [0], [1], [0, 0, 1, 1], [], []>} : vector<32x256xbf16>, vector<256x128xbf16>, vector<32x128xf32> -> vector<32x128xf32>
    %9 = arith.addf %7, %8 : vector<32x128xf32>
    %c0_8 = arith.constant 0 : index
    %c0_9 = arith.constant 0 : index
    %10 = vector.load %arg8[%c0_8, %c0_9] : memref<32x128xf32, #tpu.memory_space<vmem>>, vector<32x128xf32>
    tpu.vector_store %arg8[%c0_8, %c0_9], %9 {strides = array<i32>} : memref<32x128xf32, #tpu.memory_space<vmem>>, vector<32x128xf32>,
    %c0_i32_10 = arith.constant 0 : i32
    %11 = arith.cmpi eq, %arg3, %c0_i32_10 : i32
    %12 = arith.extui %11 : i1 to i32
    %c0_i32_11 = arith.constant 0 : i32
    %13 = arith.cmpi ne, %12, %c0_i32_11 : i32
    scf.if %13 {
      %c0_12 = arith.constant 0 : index
      %c0_13 = arith.constant 0 : index
      %14 = vector.load %arg8[%c0_12, %c0_13] : memref<32x128xf32, #tpu.memory_space<vmem>>, vector<32x128xf32>
      %c0_14 = arith.constant 0 : index
      %c0_15 = arith.constant 0 : index
      %15 = vector.load %arg6[%c0_14, %c0_15] : memref<1x128xf32, #tpu.memory_space<vmem>>, vector<1x128xf32>
      %16 = vector.broadcast %15 : vector<1x128xf32> to vector<32x128xf32>
      %17 = arith.addf %14, %16 : vector<32x128xf32>
      %18 = vector.shape_cast %17 : vector<32x128xf32> to vector<1x32x128xf32>
      %c0_16 = arith.constant 0 : index
      %c0_17 = arith.constant 0 : index
      %c0_18 = arith.constant 0 : index
      %19 = vector.load %arg7[%c0_16, %c0_17, %c0_18] : memref<1x32x128xf32, #tpu.memory_space<vmem>>, vector<1x32x128xf32>
      tpu.vector_store %arg7[%c0_16, %c0_17, %c0_18], %18 {strides = array<i32>} : memref<1x32x128xf32, #tpu.memory_space<vmem>>, vector<1x32x128xf32>,
    } else {
    }
    return
  }
  func.func @transform_0(%arg0: i32, %arg1: i32, %arg2: i32, %arg3: i32) -> (i32, i32, i32) {
    %c0_i32 = arith.constant 0 : i32
    return %arg0, %arg1, %arg3 : i32, i32, i32
  }
  func.func @transform_1(%arg0: i32, %arg1: i32, %arg2: i32, %arg3: i32) -> (i32, i32, i32) {
    %c0_i32 = arith.constant 0 : i32
    return %arg0, %arg3, %arg2 : i32, i32, i32
  }
  func.func @transform_2(%arg0: i32, %arg1: i32, %arg2: i32, %arg3: i32) -> (i32, i32) {
    %c0_i32 = arith.constant 0 : i32
    %c0_i32_0 = arith.constant 0 : i32
    return %c0_i32, %arg2 : i32, i32
  }
  func.func @transform_3(%arg0: i32, %arg1: i32, %arg2: i32, %arg3: i32) -> (i32, i32, i32) {
    %c0_i32 = arith.constant 0 : i32
    return %arg0, %arg1, %arg2 : i32, i32, i32
  }
}

module attributes {stable_mosaic.version = 11 : i64} {
  func.func @_mm_kernel(%arg0: i32, %arg1: i32, %arg2: i32, %arg3: i32, %arg4: memref<1x128x128xbf16, #tpu.memory_space<vmem>>, %arg5: memref<1x128x128xbf16, #tpu.memory_space<vmem>>, %arg6: memref<1x128xf32, #tpu.memory_space<vmem>>, %arg7: memref<1x128x128xf32, #tpu.memory_space<vmem>>, %arg8: memref<128x128xf32, #tpu.memory_space<vmem>>) attributes {dimension_semantics = [#tpu.dimension_semantics<parallel>, #tpu.dimension_semantics<parallel>, #tpu.dimension_semantics<parallel>, #tpu.dimension_semantics<arbitrary>], iteration_bounds = array<i64: 4, 1, 1, 1>, scalar_prefetch = 0 : i64, scratch_operands = 1 : i64, tpu.core_type = #tpu.core_type<tc>, window_params = [{transform_indices = @transform_0, window_bounds = array<i64: 1, 128, 128>}, {transform_indices = @transform_1, window_bounds = array<i64: 1, 128, 128>}, {transform_indices = @transform_2, window_bounds = array<i64: 1, 128>}, {transform_indices = @transform_3, window_bounds = array<i64: 1, 128, 128>}]} {
    %c0_i32 = arith.constant 0 : i32
    %0 = arith.cmpi eq, %arg3, %c0_i32 : i32
    %1 = arith.extui %0 : i1 to i32
    %c0_i32_0 = arith.constant 0 : i32
    %2 = arith.cmpi ne, %1, %c0_i32_0 : i32
    scf.if %2 {
      %cst_12 = arith.constant 0.000000e+00 : f32
      %14 = vector.broadcast %cst_12 : f32 to vector<128x128xf32>
      %c0_13 = arith.constant 0 : index
      %c0_14 = arith.constant 0 : index
      %15 = vector.load %arg8[%c0_13, %c0_14] : memref<128x128xf32, #tpu.memory_space<vmem>>, vector<128x128xf32>
      tpu.vector_store %arg8[%c0_13, %c0_14], %14 {strides = array<i32>} : memref<128x128xf32, #tpu.memory_space<vmem>>, vector<128x128xf32>,
    } else {
    }
    %c0 = arith.constant 0 : index
    %c0_1 = arith.constant 0 : index
    %c0_2 = arith.constant 0 : index
    %3 = vector.load %arg4[%c0, %c0_1, %c0_2] : memref<1x128x128xbf16, #tpu.memory_space<vmem>>, vector<1x128x128xbf16>
    %4 = vector.shape_cast %3 : vector<1x128x128xbf16> to vector<128x128xbf16>
    %c0_3 = arith.constant 0 : index
    %c0_4 = arith.constant 0 : index
    %c0_5 = arith.constant 0 : index
    %5 = vector.load %arg5[%c0_3, %c0_4, %c0_5] : memref<1x128x128xbf16, #tpu.memory_space<vmem>>, vector<1x128x128xbf16>
    %6 = vector.shape_cast %5 : vector<1x128x128xbf16> to vector<128x128xbf16>
    %c0_6 = arith.constant 0 : index
    %c0_7 = arith.constant 0 : index
    %7 = vector.load %arg8[%c0_6, %c0_7] : memref<128x128xf32, #tpu.memory_space<vmem>>, vector<128x128xf32>
    %cst = arith.constant dense<0.000000e+00> : vector<128x128xf32>
    %8 = tpu.matmul %4, %6, %cst {dimension_numbers = #tpu.dot_dimension_numbers<[1], [0], [0], [1], [0, 0, 1, 1], [], []>} : vector<128x128xbf16>, vector<128x128xbf16>, vector<128x128xf32> -> vector<128x128xf32>
    %9 = arith.addf %7, %8 : vector<128x128xf32>
    %c0_8 = arith.constant 0 : index
    %c0_9 = arith.constant 0 : index
    %10 = vector.load %arg8[%c0_8, %c0_9] : memref<128x128xf32, #tpu.memory_space<vmem>>, vector<128x128xf32>
    tpu.vector_store %arg8[%c0_8, %c0_9], %9 {strides = array<i32>} : memref<128x128xf32, #tpu.memory_space<vmem>>, vector<128x128xf32>,
    %c0_i32_10 = arith.constant 0 : i32
    %11 = arith.cmpi eq, %arg3, %c0_i32_10 : i32
    %12 = arith.extui %11 : i1 to i32
    %c0_i32_11 = arith.constant 0 : i32
    %13 = arith.cmpi ne, %12, %c0_i32_11 : i32
    scf.if %13 {
      %c0_12 = arith.constant 0 : index
      %c0_13 = arith.constant 0 : index
      %14 = vector.load %arg8[%c0_12, %c0_13] : memref<128x128xf32, #tpu.memory_space<vmem>>, vector<128x128xf32>
      %c0_14 = arith.constant 0 : index
      %c0_15 = arith.constant 0 : index
      %15 = vector.load %arg6[%c0_14, %c0_15] : memref<1x128xf32, #tpu.memory_space<vmem>>, vector<1x128xf32>
      %16 = vector.broadcast %15 : vector<1x128xf32> to vector<128x128xf32>
      %17 = arith.addf %14, %16 : vector<128x128xf32>
      %18 = vector.shape_cast %17 : vector<128x128xf32> to vector<1x128x128xf32>
      %c0_16 = arith.constant 0 : index
      %c0_17 = arith.constant 0 : index
      %c0_18 = arith.constant 0 : index
      %19 = vector.load %arg7[%c0_16, %c0_17, %c0_18] : memref<1x128x128xf32, #tpu.memory_space<vmem>>, vector<1x128x128xf32>
      tpu.vector_store %arg7[%c0_16, %c0_17, %c0_18], %18 {strides = array<i32>} : memref<1x128x128xf32, #tpu.memory_space<vmem>>, vector<1x128x128xf32>,
    } else {
    }
    return
  }
  func.func @transform_0(%arg0: i32, %arg1: i32, %arg2: i32, %arg3: i32) -> (i32, i32, i32) {
    %c0_i32 = arith.constant 0 : i32
    return %arg0, %arg1, %arg3 : i32, i32, i32
  }
  func.func @transform_1(%arg0: i32, %arg1: i32, %arg2: i32, %arg3: i32) -> (i32, i32, i32) {
    %c0_i32 = arith.constant 0 : i32
    return %arg0, %arg3, %arg2 : i32, i32, i32
  }
  func.func @transform_2(%arg0: i32, %arg1: i32, %arg2: i32, %arg3: i32) -> (i32, i32) {
    %c0_i32 = arith.constant 0 : i32
    %c0_i32_0 = arith.constant 0 : i32
    return %c0_i32, %arg2 : i32, i32
  }
  func.func @transform_3(%arg0: i32, %arg1: i32, %arg2: i32, %arg3: i32) -> (i32, i32, i32) {
    %c0_i32 = arith.constant 0 : i32
    return %arg0, %arg1, %arg2 : i32, i32, i32
  }
}

module attributes {stable_mosaic.version = 11 : i64} {
  func.func @_bn_stats_kernel(%arg0: i32, %arg1: memref<512x128xf32, #tpu.memory_space<vmem>>, %arg2: memref<2x128xf32, #tpu.memory_space<vmem>>) attributes {dimension_semantics = [#tpu.dimension_semantics<arbitrary>], iteration_bounds = array<i64: 1>, scalar_prefetch = 0 : i64, scratch_operands = 0 : i64, tpu.core_type = #tpu.core_type<tc>, window_params = [{transform_indices = @transform_0, window_bounds = array<i64: 512, 128>}, {pipeline_mode = #tpu.pipeline_mode<synchronous>, transform_indices = @transform_1, window_bounds = array<i64: 2, 128>}]} {
    %c0_i32 = arith.constant 0 : i32
    %0 = arith.cmpi eq, %arg0, %c0_i32 : i32
    %1 = arith.extui %0 : i1 to i32
    %c0_i32_0 = arith.constant 0 : i32
    %2 = arith.cmpi ne, %1, %c0_i32_0 : i32
    scf.if %2 {
      %cst_9 = arith.constant 0.000000e+00 : f32
      %16 = vector.broadcast %cst_9 : f32 to vector<2x128xf32>
      %c0_10 = arith.constant 0 : index
      %c0_11 = arith.constant 0 : index
      %17 = vector.load %arg2[%c0_10, %c0_11] : memref<2x128xf32, #tpu.memory_space<vmem>>, vector<2x128xf32>
      tpu.vector_store %arg2[%c0_10, %c0_11], %16 {strides = array<i32>} : memref<2x128xf32, #tpu.memory_space<vmem>>, vector<2x128xf32>,
    } else {
    }
    %c0 = arith.constant 0 : index
    %c0_1 = arith.constant 0 : index
    %3 = vector.load %arg1[%c0, %c0_1] : memref<512x128xf32, #tpu.memory_space<vmem>>, vector<512x128xf32>
    %cst = arith.constant dense<0.000000e+00> : vector<128xf32>
    %4 = vector.multi_reduction <add>, %3, %cst [0] : vector<512x128xf32> to vector<128xf32>
    %5 = vector.shape_cast %4 : vector<128xf32> to vector<1x128xf32>
    %6 = arith.mulf %3, %3 : vector<512x128xf32>
    %cst_2 = arith.constant dense<0.000000e+00> : vector<128xf32>
    %7 = vector.multi_reduction <add>, %6, %cst_2 [0] : vector<512x128xf32> to vector<128xf32>
    %8 = vector.shape_cast %7 : vector<128xf32> to vector<1x128xf32>
    %c0_3 = arith.constant 0 : index
    %c0_4 = arith.constant 0 : index
    %9 = vector.load %arg2[%c0_3, %c0_4] : memref<2x128xf32, #tpu.memory_space<vmem>>, vector<2x128xf32>
    %10 = tpu.concatenate %5, %8 in 0 : vector<1x128xf32>, vector<1x128xf32> -> vector<2x128xf32>
    %11 = arith.addf %9, %10 : vector<2x128xf32>
    %c0_5 = arith.constant 0 : index
    %c0_6 = arith.constant 0 : index
    %12 = vector.load %arg2[%c0_5, %c0_6] : memref<2x128xf32, #tpu.memory_space<vmem>>, vector<2x128xf32>
    tpu.vector_store %arg2[%c0_5, %c0_6], %11 {strides = array<i32>} : memref<2x128xf32, #tpu.memory_space<vmem>>, vector<2x128xf32>,
    %c0_i32_7 = arith.constant 0 : i32
    %13 = arith.cmpi eq, %arg0, %c0_i32_7 : i32
    %14 = arith.extui %13 : i1 to i32
    %c0_i32_8 = arith.constant 0 : i32
    %15 = arith.cmpi ne, %14, %c0_i32_8 : i32
    scf.if %15 {
      %c0_9 = arith.constant 0 : index
      %c0_10 = arith.constant 0 : index
      %16 = vector.load %arg2[%c0_9, %c0_10] : memref<2x128xf32, #tpu.memory_space<vmem>>, vector<2x128xf32>
      %17 = vector.extract_strided_slice %16 {offsets = [0, 0], sizes = [1, 128], strides = [1, 1]} : vector<2x128xf32> to vector<1x128xf32>
      %cst_11 = arith.constant 0.001953125 : f32
      %18 = vector.broadcast %cst_11 : f32 to vector<1x128xf32>
      %19 = arith.mulf %17, %18 : vector<1x128xf32>
      %20 = vector.extract_strided_slice %16 {offsets = [1, 0], sizes = [1, 128], strides = [1, 1]} : vector<2x128xf32> to vector<1x128xf32>
      %cst_12 = arith.constant 0.001953125 : f32
      %21 = vector.broadcast %cst_12 : f32 to vector<1x128xf32>
      %22 = arith.mulf %20, %21 : vector<1x128xf32>
      %23 = arith.mulf %19, %19 : vector<1x128xf32>
      %24 = arith.subf %22, %23 : vector<1x128xf32>
      %cst_13 = arith.constant 0.000000e+00 : f32
      %25 = vector.broadcast %cst_13 : f32 to vector<1x128xf32>
      %26 = arith.maximumf %24, %25 : vector<1x128xf32>
      %cst_14 = arith.constant 9.99999974E-6 : f32
      %27 = vector.broadcast %cst_14 : f32 to vector<1x128xf32>
      %28 = arith.addf %26, %27 : vector<1x128xf32>
      %29 = math.rsqrt %28 : vector<1x128xf32>
      %cst_15 = arith.constant 0.000000e+00 : f32
      %30 = vector.broadcast %cst_15 : f32 to vector<1x128xf32>
      %31 = arith.subf %30, %19 : vector<1x128xf32>
      %32 = arith.mulf %31, %29 : vector<1x128xf32>
      %33 = tpu.concatenate %29, %32 in 0 : vector<1x128xf32>, vector<1x128xf32> -> vector<2x128xf32>
      %c0_16 = arith.constant 0 : index
      %c0_17 = arith.constant 0 : index
      %34 = vector.load %arg2[%c0_16, %c0_17] : memref<2x128xf32, #tpu.memory_space<vmem>>, vector<2x128xf32>
      tpu.vector_store %arg2[%c0_16, %c0_17], %33 {strides = array<i32>} : memref<2x128xf32, #tpu.memory_space<vmem>>, vector<2x128xf32>,
    } else {
    }
    return
  }
  func.func @transform_0(%arg0: i32) -> (i32, i32) {
    %c0_i32 = arith.constant 0 : i32
    %c0_i32_0 = arith.constant 0 : i32
    return %arg0, %c0_i32 : i32, i32
  }
  func.func @transform_1(%arg0: i32) -> (i32, i32) {
    %c0_i32 = arith.constant 0 : i32
    %c0_i32_0 = arith.constant 0 : i32
    %c0_i32_1 = arith.constant 0 : i32
    return %c0_i32, %c0_i32_0 : i32, i32
  }
}

module attributes {stable_mosaic.version = 11 : i64} {
  func.func @_mm_kernel(%arg0: i32, %arg1: i32, %arg2: i32, %arg3: i32, %arg4: memref<1x512x128xbf16, #tpu.memory_space<vmem>>, %arg5: memref<1x128x128xbf16, #tpu.memory_space<vmem>>, %arg6: memref<1x128xf32, #tpu.memory_space<vmem>>, %arg7: memref<1x512x128xf32, #tpu.memory_space<vmem>>, %arg8: memref<512x128xf32, #tpu.memory_space<vmem>>) attributes {dimension_semantics = [#tpu.dimension_semantics<parallel>, #tpu.dimension_semantics<parallel>, #tpu.dimension_semantics<parallel>, #tpu.dimension_semantics<arbitrary>], iteration_bounds = array<i64: 4, 1, 1, 1>, scalar_prefetch = 0 : i64, scratch_operands = 1 : i64, tpu.core_type = #tpu.core_type<tc>, window_params = [{transform_indices = @transform_0, window_bounds = array<i64: 1, 512, 128>}, {transform_indices = @transform_1, window_bounds = array<i64: 1, 128, 128>}, {transform_indices = @transform_2, window_bounds = array<i64: 1, 128>}, {transform_indices = @transform_3, window_bounds = array<i64: 1, 512, 128>}]} {
    %c0_i32 = arith.constant 0 : i32
    %0 = arith.cmpi eq, %arg3, %c0_i32 : i32
    %1 = arith.extui %0 : i1 to i32
    %c0_i32_0 = arith.constant 0 : i32
    %2 = arith.cmpi ne, %1, %c0_i32_0 : i32
    scf.if %2 {
      %cst_12 = arith.constant 0.000000e+00 : f32
      %14 = vector.broadcast %cst_12 : f32 to vector<512x128xf32>
      %c0_13 = arith.constant 0 : index
      %c0_14 = arith.constant 0 : index
      %15 = vector.load %arg8[%c0_13, %c0_14] : memref<512x128xf32, #tpu.memory_space<vmem>>, vector<512x128xf32>
      tpu.vector_store %arg8[%c0_13, %c0_14], %14 {strides = array<i32>} : memref<512x128xf32, #tpu.memory_space<vmem>>, vector<512x128xf32>,
    } else {
    }
    %c0 = arith.constant 0 : index
    %c0_1 = arith.constant 0 : index
    %c0_2 = arith.constant 0 : index
    %3 = vector.load %arg4[%c0, %c0_1, %c0_2] : memref<1x512x128xbf16, #tpu.memory_space<vmem>>, vector<1x512x128xbf16>
    %4 = vector.shape_cast %3 : vector<1x512x128xbf16> to vector<512x128xbf16>
    %c0_3 = arith.constant 0 : index
    %c0_4 = arith.constant 0 : index
    %c0_5 = arith.constant 0 : index
    %5 = vector.load %arg5[%c0_3, %c0_4, %c0_5] : memref<1x128x128xbf16, #tpu.memory_space<vmem>>, vector<1x128x128xbf16>
    %6 = vector.shape_cast %5 : vector<1x128x128xbf16> to vector<128x128xbf16>
    %c0_6 = arith.constant 0 : index
    %c0_7 = arith.constant 0 : index
    %7 = vector.load %arg8[%c0_6, %c0_7] : memref<512x128xf32, #tpu.memory_space<vmem>>, vector<512x128xf32>
    %cst = arith.constant dense<0.000000e+00> : vector<512x128xf32>
    %8 = tpu.matmul %4, %6, %cst {dimension_numbers = #tpu.dot_dimension_numbers<[1], [0], [0], [1], [0, 0, 1, 1], [], []>} : vector<512x128xbf16>, vector<128x128xbf16>, vector<512x128xf32> -> vector<512x128xf32>
    %9 = arith.addf %7, %8 : vector<512x128xf32>
    %c0_8 = arith.constant 0 : index
    %c0_9 = arith.constant 0 : index
    %10 = vector.load %arg8[%c0_8, %c0_9] : memref<512x128xf32, #tpu.memory_space<vmem>>, vector<512x128xf32>
    tpu.vector_store %arg8[%c0_8, %c0_9], %9 {strides = array<i32>} : memref<512x128xf32, #tpu.memory_space<vmem>>, vector<512x128xf32>,
    %c0_i32_10 = arith.constant 0 : i32
    %11 = arith.cmpi eq, %arg3, %c0_i32_10 : i32
    %12 = arith.extui %11 : i1 to i32
    %c0_i32_11 = arith.constant 0 : i32
    %13 = arith.cmpi ne, %12, %c0_i32_11 : i32
    scf.if %13 {
      %c0_12 = arith.constant 0 : index
      %c0_13 = arith.constant 0 : index
      %14 = vector.load %arg8[%c0_12, %c0_13] : memref<512x128xf32, #tpu.memory_space<vmem>>, vector<512x128xf32>
      %c0_14 = arith.constant 0 : index
      %c0_15 = arith.constant 0 : index
      %15 = vector.load %arg6[%c0_14, %c0_15] : memref<1x128xf32, #tpu.memory_space<vmem>>, vector<1x128xf32>
      %16 = vector.broadcast %15 : vector<1x128xf32> to vector<512x128xf32>
      %17 = arith.addf %14, %16 : vector<512x128xf32>
      %18 = math.tanh %17 : vector<512x128xf32>
      %19 = vector.shape_cast %18 : vector<512x128xf32> to vector<1x512x128xf32>
      %c0_16 = arith.constant 0 : index
      %c0_17 = arith.constant 0 : index
      %c0_18 = arith.constant 0 : index
      %20 = vector.load %arg7[%c0_16, %c0_17, %c0_18] : memref<1x512x128xf32, #tpu.memory_space<vmem>>, vector<1x512x128xf32>
      tpu.vector_store %arg7[%c0_16, %c0_17, %c0_18], %19 {strides = array<i32>} : memref<1x512x128xf32, #tpu.memory_space<vmem>>, vector<1x512x128xf32>,
    } else {
    }
    return
  }
  func.func @transform_0(%arg0: i32, %arg1: i32, %arg2: i32, %arg3: i32) -> (i32, i32, i32) {
    %c0_i32 = arith.constant 0 : i32
    return %arg0, %arg1, %arg3 : i32, i32, i32
  }
  func.func @transform_1(%arg0: i32, %arg1: i32, %arg2: i32, %arg3: i32) -> (i32, i32, i32) {
    %c0_i32 = arith.constant 0 : i32
    return %arg0, %arg3, %arg2 : i32, i32, i32
  }
  func.func @transform_2(%arg0: i32, %arg1: i32, %arg2: i32, %arg3: i32) -> (i32, i32) {
    %c0_i32 = arith.constant 0 : i32
    %c0_i32_0 = arith.constant 0 : i32
    return %c0_i32, %arg2 : i32, i32
  }
  func.func @transform_3(%arg0: i32, %arg1: i32, %arg2: i32, %arg3: i32) -> (i32, i32, i32) {
    %c0_i32 = arith.constant 0 : i32
    return %arg0, %arg1, %arg2 : i32, i32, i32
  }
}

</mosaic_0001>

<bundles_post_ra>
// kernel: unet_generator2.34
= control target key start
LH: loop header
LB: loop body
LE: loop exit
PB: predicated region body
PF: predicated region fallthrough
CT: control target
= control target key end

     0   :  { %s1708_s1 = inlined_call_operand.vmem [shape: bf16[1,128,128], index: 1, kind: input, shape index: {}]   ;;  %s1709_s0 = inlined_call_operand.vmem [shape: bf16[1,512,128], index: 0, kind: input, shape index: {}]   ;;  %s1710_s2 = inlined_call_operand.vmem [shape: f32[1,128], index: 2, kind: input, shape index: {}]   ;;  %s1711_s3 = inlined_call_operand.vmem [shape: f32[1,512,128], index: 3, kind: output, shape index: {}]  }
   0x1   :  { %v1267_v0 = vld [vmem:[%s1708_s1 + $0x38] sm:$0xff]   ;;  %v1268_v1 = vld [vmem:[%s1708_s1 + $0x30] sm:$0xff]   ;;  %v1269_v2 = vld [vmem:[%s1708_s1 + $0x28] sm:$0xff]  }
   0x2   :  { %1171 = vmatprep.subr.bf16.mxu0 %v1267_v0  ;;  %1251 = vmatprep.subr.bf16.mxu1 %v1267_v0  ;;  %v1270_v3 = vld [vmem:[%s1708_s1 + $0x20] sm:$0xff]   ;;  %v1271_v6 = vld [vmem:[%s1708_s1 + $0x18] sm:$0xff]   ;;  %v1272_v7 = vld [vmem:[%s1708_s1 + $0x10] sm:$0xff]  }
   0x3   :  { %1172 = vmatpush3.bf16.msra.mxu0 %v1267_v0  ;;  %1259 = vmatpush3.bf16.msra.mxu1 %v1267_v0  ;;  %v1275_v4 = vld [vmem:[%s1709_s0] sm:$0xff]   ;;  %v1273_v8 = vld [vmem:[%s1708_s1 + $0x8] sm:$0xff]   ;;  %v1279_v12 = vld [vmem:[%s1709_s0 + $0x10] sm:$0xff]  }
   0x4   :  { %1173 = vmatprep.subr.bf16.mxu0 %v1268_v1  ;;  %1252 = vmatprep.subr.bf16.mxu1 %v1268_v1  ;;  %v1276_v5 = vld [vmem:[%s1709_s0 + $0x80] sm:$0xff]   ;;  %v1277_v10 = vld [vmem:[%s1709_s0 + $0x8] sm:$0xff]   ;;  %v1280_v13 = vld [vmem:[%s1709_s0 + $0x90] sm:$0xff]  }
   0x5   :  { %1187 = vmatprep.mubr.bf16.mxu0 %v1275_v4  ;;  %1219 = vmatprep.mubr.bf16.mxu1 %v1276_v5  ;;  %v1274_v9 = vld [vmem:[%s1708_s1] sm:$0xff]   ;;  %v1278_v11 = vld [vmem:[%s1709_s0 + $0x88] sm:$0xff]   ;;  %v1281_v14 = vld [vmem:[%s1709_s0 + $0x18] sm:$0xff]  }
   0x6   :  { %v1282_v15 = vld [vmem:[%s1709_s0 + $0x98] sm:$0xff]   ;;  %v1283_v16 = vld [vmem:[%s1709_s0 + $0x20] sm:$0xff]   ;;  %v1285_v18 = vld [vmem:[%s1709_s0 + $0x28] sm:$0xff]  }
   0x7   :  { %1174 = vmatpush3.bf16.msra.mxu0 %v1268_v1  ;;  %1260 = vmatpush3.bf16.msra.mxu1 %v1268_v1  ;;  %v1284_v17 = vld [vmem:[%s1709_s0 + $0xa0] sm:$0xff]   ;;  %v1286_v19 = vld [vmem:[%s1709_s0 + $0xa8] sm:$0xff]   ;;  %v1287_v20 = vld [vmem:[%s1709_s0 + $0x30] sm:$0xff]  }
   0x8   :  { %1175 = vmatprep.subr.bf16.mxu0 %v1269_v2  ;;  %1253 = vmatprep.subr.bf16.mxu1 %v1269_v2  ;;  %v1288_v21 = vld [vmem:[%s1709_s0 + $0xb0] sm:$0xff]   ;;  %v1289_v22 = vld [vmem:[%s1709_s0 + $0x38] sm:$0xff]   ;;  %v1291_v24 = vld [vmem:[%s1709_s0 + $0x40] sm:$0xff]  }
   0x9   :  { %v1290_v23 = vld [vmem:[%s1709_s0 + $0xb8] sm:$0xff]   ;;  %v1292_v25 = vld [vmem:[%s1709_s0 + $0xc0] sm:$0xff]   ;;  %v1293_v26 = vld [vmem:[%s1709_s0 + $0x48] sm:$0xff]  }
   0xa   :  { %v1294_v27 = vld [vmem:[%s1709_s0 + $0xc8] sm:$0xff]   ;;  %v1295_v28 = vld [vmem:[%s1709_s0 + $0x50] sm:$0xff]   ;;  %v1297_v30 = vld [vmem:[%s1709_s0 + $0x58] sm:$0xff]  }
   0xb   :  { %1176 = vmatpush3.bf16.msra.mxu0 %v1269_v2  ;;  %1261 = vmatpush3.bf16.msra.mxu1 %v1269_v2  ;;  %v1296_v29 = vld [vmem:[%s1709_s0 + $0xd0] sm:$0xff]   ;;  %v1298_v31 = vld [vmem:[%s1709_s0 + $0xd8] sm:$0xff]   ;;  %v1299_v32 = vld [vmem:[%s1709_s0 + $0x60] sm:$0xff]  }
   0xc   :  { %1177 = vmatprep.subr.bf16.mxu0 %v1270_v3  ;;  %1254 = vmatprep.subr.bf16.mxu1 %v1270_v3  ;;  %v1300_v33 = vld [vmem:[%s1709_s0 + $0xe0] sm:$0xff]   ;;  %v1301_v34 = vld [vmem:[%s1709_s0 + $0x68] sm:$0xff]   ;;  %v1303_v36 = vld [vmem:[%s1709_s0 + $0x70] sm:$0xff]  }
   0xd   :  { %v1302_v35 = vld [vmem:[%s1709_s0 + $0xe8] sm:$0xff]   ;;  %v1304_v37 = vld [vmem:[%s1709_s0 + $0xf0] sm:$0xff]   ;;  %v1305_v38 = vld [vmem:[%s1709_s0 + $0x78] sm:$0xff]  }
   0xe   :  { %v1306_v39 = vld [vmem:[%s1709_s0 + $0xf8] sm:$0xff]   ;;  %v1450_v40 = vld [vmem:[%s1710_s2] ss:$0 sm:$0xff] }
   0xf   :  { %1178 = vmatpush3.bf16.msra.mxu0 %v1270_v3  ;;  %1262 = vmatpush3.bf16.msra.mxu1 %v1270_v3 }
  0x10   :  { %1179 = vmatprep.subr.bf16.mxu0 %v1271_v6  ;;  %1255 = vmatprep.subr.bf16.mxu1 %v1271_v6 }
  0x13   :  { %1180 = vmatpush3.bf16.msra.mxu0 %v1271_v6  ;;  %1263 = vmatpush3.bf16.msra.mxu1 %v1271_v6 }
  0x14   :  { %1181 = vmatprep.subr.bf16.mxu0 %v1272_v7  ;;  %1256 = vmatprep.subr.bf16.mxu1 %v1272_v7 }
  0x17   :  { %1182 = vmatpush3.bf16.msra.mxu0 %v1272_v7  ;;  %1264 = vmatpush3.bf16.msra.mxu1 %v1272_v7 }
  0x18   :  { %1183 = vmatprep.subr.bf16.mxu0 %v1273_v8  ;;  %1257 = vmatprep.subr.bf16.mxu1 %v1273_v8 }
  0x1b   :  { %1184 = vmatpush3.bf16.msra.mxu0 %v1273_v8  ;;  %1265 = vmatpush3.bf16.msra.mxu1 %v1273_v8 }
  0x1c   :  { %1185 = vmatprep.subr.bf16.mxu0 %v1274_v9  ;;  %1258 = vmatprep.subr.bf16.mxu1 %v1274_v9 }
  0x1f   :  { %1186 = vmatpush3.bf16.msra.mxu0 %v1274_v9  ;;  %1266 = vmatpush3.bf16.msra.mxu1 %v1274_v9 }
  0x22   :  { %1188 = vmatmul.mubr.bf16.vlgmr.msra.gmra.mxu0 %v1277_v10  ;;  %1220 = vmatmul.mubr.bf16.vlgmr.msra.gmra.mxu1 %v1278_v11 }
  0x23   :  { %1191 = vmatprep.mubr.bf16.mxu0 %v1279_v12  ;;  %1223 = vmatprep.mubr.bf16.mxu1 %v1280_v13 }
  0x2a   :  { %1192 = vmatmul.mubr.bf16.gmra.mxu0 %v1281_v14  ;;  %1224 = vmatmul.mubr.bf16.gmra.mxu1 %v1282_v15 }
  0x2b   :  { %1195 = vmatprep.mubr.bf16.mxu0 %v1283_v16  ;;  %1227 = vmatprep.mubr.bf16.mxu1 %v1284_v17 }
  0x32   :  { %1196 = vmatmul.mubr.bf16.gmra.mxu0 %v1285_v18  ;;  %1228 = vmatmul.mubr.bf16.gmra.mxu1 %v1286_v19 }
  0x33   :  { %1199 = vmatprep.mubr.bf16.mxu0 %v1287_v20  ;;  %1231 = vmatprep.mubr.bf16.mxu1 %v1288_v21 }
  0x3a   :  { %1200 = vmatmul.mubr.bf16.gmra.mxu0 %v1289_v22  ;;  %1232 = vmatmul.mubr.bf16.gmra.mxu1 %v1290_v23 }
  0x3b   :  { %1203 = vmatprep.mubr.bf16.mxu0 %v1291_v24  ;;  %1235 = vmatprep.mubr.bf16.mxu1 %v1292_v25 }
  0x42   :  { %1204 = vmatmul.mubr.bf16.gmra.mxu0 %v1293_v26  ;;  %1236 = vmatmul.mubr.bf16.gmra.mxu1 %v1294_v27 }
  0x43   :  { %1207 = vmatprep.mubr.bf16.mxu0 %v1295_v28  ;;  %1239 = vmatprep.mubr.bf16.mxu1 %v1296_v29 }
  0x4a   :  { %1208 = vmatmul.mubr.bf16.gmra.mxu0 %v1297_v30  ;;  %1240 = vmatmul.mubr.bf16.gmra.mxu1 %v1298_v31 }
  0x4b   :  { %1211 = vmatprep.mubr.bf16.mxu0 %v1299_v32  ;;  %1243 = vmatprep.mubr.bf16.mxu1 %v1300_v33 }
  0x52   :  { %1212 = vmatmul.mubr.bf16.gmra.mxu0 %v1301_v34  ;;  %1244 = vmatmul.mubr.bf16.gmra.mxu1 %v1302_v35 }
  0x53   :  { %1215 = vmatprep.mubr.bf16.mxu0 %v1303_v36  ;;  %1247 = vmatprep.mubr.bf16.mxu1 %v1304_v37 }
  0x5a   :  { %1216 = vmatmul.mubr.bf16.gmra.mxu0 %v1305_v38  ;;  %1248 = vmatmul.mubr.bf16.gmra.mxu1 %v1306_v39 }
  0xe2   :  { %v1189_v41 = vpop.f32.mrf.mxu0  ;;  %v1221_v42 = vpop.f32.mrf.mxu1 }
  0xe3   :  { %v960_v43 = vadd.f32 %v1189_v41, %v1450_v40  ;;  %v992_v44 = vadd.f32 %v1221_v42, %v1450_v40 }
  0xe4   :  { %v501_v45 = vpop.f32.mrf.mxu0  ;;  %v629_v46 = vpop.f32.mrf.mxu1 }
  0xe5   :  { %1024 = vst [vmem:[%s1711_s3 + $0x10] sm:$0xff] %v960_v43  ;;  %1056 = vst [vmem:[%s1711_s3 + $0x110] sm:$0xff] %v992_v44  ;;  %v958_v47 = vadd.f32 %v1450_v40, %v501_v45  ;;  %v990_v48 = vadd.f32 %v1450_v40, %v629_v46 }
  0xe6   :  { %v1190_v49 = vpop.f32.mrf.mxu0  ;;  %v1222_v50 = vpop.f32.mrf.mxu1 }
  0xe7   :  { %1022 = vst [vmem:[%s1711_s3] sm:$0xff] %v958_v47  ;;  %1054 = vst [vmem:[%s1711_s3 + $0x100] sm:$0xff] %v990_v48  ;;  %v961_v51 = vadd.f32 %v1190_v49, %v1450_v40  ;;  %v993_v52 = vadd.f32 %v1222_v50, %v1450_v40 }
  0xe8   :  { %v504_v53 = vpop.f32.mrf.mxu0  ;;  %v632_v54 = vpop.f32.mrf.mxu1 }
  0xe9   :  { %1025 = vst [vmem:[%s1711_s3 + $0x18] sm:$0xff] %v961_v51  ;;  %1057 = vst [vmem:[%s1711_s3 + $0x118] sm:$0xff] %v993_v52  ;;  %v959_v55 = vadd.f32 %v1450_v40, %v504_v53  ;;  %v991_v56 = vadd.f32 %v1450_v40, %v632_v54 }
  0xea   :  { %v1193_v57 = vpop.f32.mrf.mxu0  ;;  %v1225_v58 = vpop.f32.mrf.mxu1 }
  0xeb   :  { %1023 = vst [vmem:[%s1711_s3 + $0x8] sm:$0xff] %v959_v55  ;;  %1055 = vst [vmem:[%s1711_s3 + $0x108] sm:$0xff] %v991_v56  ;;  %v964_v59 = vadd.f32 %v1193_v57, %v1450_v40  ;;  %v996_v60 = vadd.f32 %v1225_v58, %v1450_v40 }
  0xec   :  { %v517_v61 = vpop.f32.mrf.mxu0  ;;  %v645_v62 = vpop.f32.mrf.mxu1 }
  0xed   :  { %1028 = vst [vmem:[%s1711_s3 + $0x30] sm:$0xff] %v964_v59  ;;  %1060 = vst [vmem:[%s1711_s3 + $0x130] sm:$0xff] %v996_v60  ;;  %v962_v63 = vadd.f32 %v1450_v40, %v517_v61  ;;  %v994_v0 = vadd.f32 %v1450_v40, %v645_v62 }
  0xee   :  { %v1194_v1 = vpop.f32.mrf.mxu0  ;;  %v1226_v2 = vpop.f32.mrf.mxu1 }
  0xef   :  { %1026 = vst [vmem:[%s1711_s3 + $0x20] sm:$0xff] %v962_v63  ;;  %1058 = vst [vmem:[%s1711_s3 + $0x120] sm:$0xff] %v994_v0  ;;  %v965_v3 = vadd.f32 %v1194_v1, %v1450_v40  ;;  %v997_v4 = vadd.f32 %v1226_v2, %v1450_v40 }
  0xf0   :  { %v520_v5 = vpop.f32.mrf.mxu0  ;;  %v648_v6 = vpop.f32.mrf.mxu1 }
  0xf1   :  { %1029 = vst [vmem:[%s1711_s3 + $0x38] sm:$0xff] %v965_v3  ;;  %1061 = vst [vmem:[%s1711_s3 + $0x138] sm:$0xff] %v997_v4  ;;  %v963_v7 = vadd.f32 %v1450_v40, %v520_v5  ;;  %v995_v8 = vadd.f32 %v1450_v40, %v648_v6 }
  0xf2   :  { %v1197_v9 = vpop.f32.mrf.mxu0  ;;  %v1229_v10 = vpop.f32.mrf.mxu1 }
  0xf3   :  { %1027 = vst [vmem:[%s1711_s3 + $0x28] sm:$0xff] %v963_v7  ;;  %1059 = vst [vmem:[%s1711_s3 + $0x128] sm:$0xff] %v995_v8  ;;  %v968_v11 = vadd.f32 %v1197_v9, %v1450_v40  ;;  %v1000_v12 = vadd.f32 %v1229_v10, %v1450_v40 }
  0xf4   :  { %v533_v13 = vpop.f32.mrf.mxu0  ;;  %v661_v14 = vpop.f32.mrf.mxu1 }
  0xf5   :  { %1032 = vst [vmem:[%s1711_s3 + $0x50] sm:$0xff] %v968_v11  ;;  %1064 = vst [vmem:[%s1711_s3 + $0x150] sm:$0xff] %v1000_v12  ;;  %v966_v15 = vadd.f32 %v1450_v40, %v533_v13  ;;  %v998_v16 = vadd.f32 %v1450_v40, %v661_v14 }
  0xf6   :  { %v1198_v17 = vpop.f32.mrf.mxu0  ;;  %v1230_v18 = vpop.f32.mrf.mxu1 }
  0xf7   :  { %1030 = vst [vmem:[%s1711_s3 + $0x40] sm:$0xff] %v966_v15  ;;  %1062 = vst [vmem:[%s1711_s3 + $0x140] sm:$0xff] %v998_v16  ;;  %v969_v19 = vadd.f32 %v1198_v17, %v1450_v40  ;;  %v1001_v20 = vadd.f32 %v1230_v18, %v1450_v40 }
  0xf8   :  { %v536_v21 = vpop.f32.mrf.mxu0  ;;  %v664_v22 = vpop.f32.mrf.mxu1 }
  0xf9   :  { %1033 = vst [vmem:[%s1711_s3 + $0x58] sm:$0xff] %v969_v19  ;;  %1065 = vst [vmem:[%s1711_s3 + $0x158] sm:$0xff] %v1001_v20  ;;  %v967_v23 = vadd.f32 %v1450_v40, %v536_v21  ;;  %v999_v24 = vadd.f32 %v1450_v40, %v664_v22 }
  0xfa   :  { %v1201_v25 = vpop.f32.mrf.mxu0  ;;  %v1233_v26 = vpop.f32.mrf.mxu1 }
  0xfb   :  { %1031 = vst [vmem:[%s1711_s3 + $0x48] sm:$0xff] %v967_v23  ;;  %1063 = vst [vmem:[%s1711_s3 + $0x148] sm:$0xff] %v999_v24  ;;  %v972_v27 = vadd.f32 %v1201_v25, %v1450_v40  ;;  %v1004_v28 = vadd.f32 %v1233_v26, %v1450_v40 }
  0xfc   :  { %v549_v29 = vpop.f32.mrf.mxu0  ;;  %v677_v30 = vpop.f32.mrf.mxu1 }
  0xfd   :  { %1036 = vst [vmem:[%s1711_s3 + $0x70] sm:$0xff] %v972_v27  ;;  %1068 = vst [vmem:[%s1711_s3 + $0x170] sm:$0xff] %v1004_v28  ;;  %v970_v31 = vadd.f32 %v1450_v40, %v549_v29  ;;  %v1002_v32 = vadd.f32 %v1450_v40, %v677_v30 }
  0xfe   :  { %v1202_v33 = vpop.f32.mrf.mxu0  ;;  %v1234_v34 = vpop.f32.mrf.mxu1 }
  0xff   :  { %1034 = vst [vmem:[%s1711_s3 + $0x60] sm:$0xff] %v970_v31  ;;  %1066 = vst [vmem:[%s1711_s3 + $0x160] sm:$0xff] %v1002_v32  ;;  %v973_v35 = vadd.f32 %v1202_v33, %v1450_v40  ;;  %v1005_v36 = vadd.f32 %v1234_v34, %v1450_v40 }
 0x100   :  { %v552_v37 = vpop.f32.mrf.mxu0  ;;  %v680_v38 = vpop.f32.mrf.mxu1 }
 0x101   :  { %1037 = vst [vmem:[%s1711_s3 + $0x78] sm:$0xff] %v973_v35  ;;  %1069 = vst [vmem:[%s1711_s3 + $0x178] sm:$0xff] %v1005_v36  ;;  %v971_v39 = vadd.f32 %v1450_v40, %v552_v37  ;;  %v1003_v41 = vadd.f32 %v1450_v40, %v680_v38 }
 0x102   :  { %v1205_v42 = vpop.f32.mrf.mxu0  ;;  %v1237_v43 = vpop.f32.mrf.mxu1 }
 0x103   :  { %1035 = vst [vmem:[%s1711_s3 + $0x68] sm:$0xff] %v971_v39  ;;  %1067 = vst [vmem:[%s1711_s3 + $0x168] sm:$0xff] %v1003_v41  ;;  %v976_v44 = vadd.f32 %v1205_v42, %v1450_v40  ;;  %v1008_v45 = vadd.f32 %v1237_v43, %v1450_v40 }
 0x104   :  { %v565_v46 = vpop.f32.mrf.mxu0  ;;  %v693_v47 = vpop.f32.mrf.mxu1 }
 0x105   :  { %1040 = vst [vmem:[%s1711_s3 + $0x90] sm:$0xff] %v976_v44  ;;  %1072 = vst [vmem:[%s1711_s3 + $0x190] sm:$0xff] %v1008_v45  ;;  %v974_v48 = vadd.f32 %v1450_v40, %v565_v46  ;;  %v1006_v49 = vadd.f32 %v1450_v40, %v693_v47 }
 0x106   :  { %v1206_v50 = vpop.f32.mrf.mxu0  ;;  %v1238_v51 = vpop.f32.mrf.mxu1 }
 0x107   :  { %1038 = vst [vmem:[%s1711_s3 + $0x80] sm:$0xff] %v974_v48  ;;  %1070 = vst [vmem:[%s1711_s3 + $0x180] sm:$0xff] %v1006_v49  ;;  %v977_v52 = vadd.f32 %v1206_v50, %v1450_v40  ;;  %v1009_v53 = vadd.f32 %v1238_v51, %v1450_v40 }
 0x108   :  { %v568_v54 = vpop.f32.mrf.mxu0  ;;  %v696_v55 = vpop.f32.mrf.mxu1 }
 0x109   :  { %1041 = vst [vmem:[%s1711_s3 + $0x98] sm:$0xff] %v977_v52  ;;  %1073 = vst [vmem:[%s1711_s3 + $0x198] sm:$0xff] %v1009_v53  ;;  %v975_v56 = vadd.f32 %v1450_v40, %v568_v54  ;;  %v1007_v57 = vadd.f32 %v1450_v40, %v696_v55 }
 0x10a   :  { %v1209_v58 = vpop.f32.mrf.mxu0  ;;  %v1241_v59 = vpop.f32.mrf.mxu1 }
 0x10b   :  { %1039 = vst [vmem:[%s1711_s3 + $0x88] sm:$0xff] %v975_v56  ;;  %1071 = vst [vmem:[%s1711_s3 + $0x188] sm:$0xff] %v1007_v57  ;;  %v980_v60 = vadd.f32 %v1209_v58, %v1450_v40  ;;  %v1012_v61 = vadd.f32 %v1241_v59, %v1450_v40 }
 0x10c   :  { %v581_v62 = vpop.f32.mrf.mxu0  ;;  %v709_v63 = vpop.f32.mrf.mxu1 }
 0x10d   :  { %1044 = vst [vmem:[%s1711_s3 + $0xb0] sm:$0xff] %v980_v60  ;;  %1076 = vst [vmem:[%s1711_s3 + $0x1b0] sm:$0xff] %v1012_v61  ;;  %v978_v0 = vadd.f32 %v1450_v40, %v581_v62  ;;  %v1010_v1 = vadd.f32 %v1450_v40, %v709_v63 }
 0x10e   :  { %v1210_v2 = vpop.f32.mrf.mxu0  ;;  %v1242_v3 = vpop.f32.mrf.mxu1 }
 0x10f   :  { %1042 = vst [vmem:[%s1711_s3 + $0xa0] sm:$0xff] %v978_v0  ;;  %1074 = vst [vmem:[%s1711_s3 + $0x1a0] sm:$0xff] %v1010_v1  ;;  %v981_v4 = vadd.f32 %v1210_v2, %v1450_v40  ;;  %v1013_v5 = vadd.f32 %v1242_v3, %v1450_v40 }
 0x110   :  { %v584_v6 = vpop.f32.mrf.mxu0  ;;  %v712_v7 = vpop.f32.mrf.mxu1 }
 0x111   :  { %1045 = vst [vmem:[%s1711_s3 + $0xb8] sm:$0xff] %v981_v4  ;;  %1077 = vst [vmem:[%s1711_s3 + $0x1b8] sm:$0xff] %v1013_v5  ;;  %v979_v8 = vadd.f32 %v1450_v40, %v584_v6  ;;  %v1011_v9 = vadd.f32 %v1450_v40, %v712_v7 }
 0x112   :  { %v1213_v10 = vpop.f32.mrf.mxu0  ;;  %v1245_v11 = vpop.f32.mrf.mxu1 }
 0x113   :  { %1043 = vst [vmem:[%s1711_s3 + $0xa8] sm:$0xff] %v979_v8  ;;  %1075 = vst [vmem:[%s1711_s3 + $0x1a8] sm:$0xff] %v1011_v9  ;;  %v984_v12 = vadd.f32 %v1213_v10, %v1450_v40  ;;  %v1016_v13 = vadd.f32 %v1245_v11, %v1450_v40 }
 0x114   :  { %v597_v14 = vpop.f32.mrf.mxu0  ;;  %v725_v15 = vpop.f32.mrf.mxu1 }
 0x115   :  { %1048 = vst [vmem:[%s1711_s3 + $0xd0] sm:$0xff] %v984_v12  ;;  %1080 = vst [vmem:[%s1711_s3 + $0x1d0] sm:$0xff] %v1016_v13  ;;  %v982_v16 = vadd.f32 %v1450_v40, %v597_v14  ;;  %v1014_v17 = vadd.f32 %v1450_v40, %v725_v15 }
 0x116   :  { %v1214_v18 = vpop.f32.mrf.mxu0  ;;  %v1246_v19 = vpop.f32.mrf.mxu1 }
 0x117   :  { %1046 = vst [vmem:[%s1711_s3 + $0xc0] sm:$0xff] %v982_v16  ;;  %1078 = vst [vmem:[%s1711_s3 + $0x1c0] sm:$0xff] %v1014_v17  ;;  %v985_v20 = vadd.f32 %v1214_v18, %v1450_v40  ;;  %v1017_v21 = vadd.f32 %v1246_v19, %v1450_v40 }
 0x118   :  { %v600_v22 = vpop.f32.mrf.mxu0  ;;  %v728_v23 = vpop.f32.mrf.mxu1 }
 0x119   :  { %1049 = vst [vmem:[%s1711_s3 + $0xd8] sm:$0xff] %v985_v20  ;;  %1081 = vst [vmem:[%s1711_s3 + $0x1d8] sm:$0xff] %v1017_v21  ;;  %v983_v24 = vadd.f32 %v1450_v40, %v600_v22  ;;  %v1015_v25 = vadd.f32 %v1450_v40, %v728_v23 }
 0x11a   :  { %v1217_v26 = vpop.f32.mrf.mxu0  ;;  %v1249_v27 = vpop.f32.mrf.mxu1 }
 0x11b   :  { %1047 = vst [vmem:[%s1711_s3 + $0xc8] sm:$0xff] %v983_v24  ;;  %1079 = vst [vmem:[%s1711_s3 + $0x1c8] sm:$0xff] %v1015_v25  ;;  %v988_v28 = vadd.f32 %v1217_v26, %v1450_v40  ;;  %v1020_v29 = vadd.f32 %v1249_v27, %v1450_v40 }
 0x11c   :  { %v613_v30 = vpop.f32.mrf.mxu0  ;;  %v741_v31 = vpop.f32.mrf.mxu1 }
 0x11d   :  { %1052 = vst [vmem:[%s1711_s3 + $0xf0] sm:$0xff] %v988_v28  ;;  %1084 = vst [vmem:[%s1711_s3 + $0x1f0] sm:$0xff] %v1020_v29  ;;  %v986_v32 = vadd.f32 %v1450_v40, %v613_v30  ;;  %v1018_v33 = vadd.f32 %v1450_v40, %v741_v31 }
 0x11e   :  { %v1218_v34 = vpop.f32.mrf.mxu0  ;;  %v1250_v35 = vpop.f32.mrf.mxu1 }
 0x11f   :  { %1050 = vst [vmem:[%s1711_s3 + $0xe0] sm:$0xff] %v986_v32  ;;  %1082 = vst [vmem:[%s1711_s3 + $0x1e0] sm:$0xff] %v1018_v33  ;;  %v989_v36 = vadd.f32 %v1218_v34, %v1450_v40  ;;  %v1021_v37 = vadd.f32 %v1250_v35, %v1450_v40 }
 0x120   :  { %v616_v38 = vpop.f32.mrf.mxu0  ;;  %v744_v39 = vpop.f32.mrf.mxu1 }
 0x121   :  { %1053 = vst [vmem:[%s1711_s3 + $0xf8] sm:$0xff] %v989_v36  ;;  %1085 = vst [vmem:[%s1711_s3 + $0x1f8] sm:$0xff] %v1021_v37  ;;  %v987_v41 = vadd.f32 %v1450_v40, %v616_v38  ;;  %v1019_v42 = vadd.f32 %v1450_v40, %v744_v39 }
 0x123   :  { %1051 = vst [vmem:[%s1711_s3 + $0xe8] sm:$0xff] %v987_v41  ;;  %1083 = vst [vmem:[%s1711_s3 + $0x1e8] sm:$0xff] %v1019_v42 }

// kernel: unet_generator2.35
= control target key start
LH: loop header
LB: loop body
LE: loop exit
PB: predicated region body
PF: predicated region fallthrough
CT: control target
= control target key end

     0   :  { %s586_s1 = inlined_call_operand.vmem [shape: bf16[1,128,128], index: 1, kind: input, shape index: {}]   ;;  %s587_s0 = inlined_call_operand.vmem [shape: bf16[1,128,128], index: 0, kind: input, shape index: {}]   ;;  %s588_s2 = inlined_call_operand.vmem [shape: f32[1,128], index: 2, kind: input, shape index: {}]   ;;  %s589_s3 = inlined_call_operand.vmem [shape: f32[1,128,128], index: 3, kind: output, shape index: {}]  }
   0x1   :  { %v451_v0 = vld [vmem:[%s586_s1 + $0x38] sm:$0xff]   ;;  %v452_v1 = vld [vmem:[%s586_s1 + $0x30] sm:$0xff]   ;;  %v453_v2 = vld [vmem:[%s586_s1 + $0x28] sm:$0xff]  }
   0x2   :  { %403 = vmatprep.subr.bf16.mxu0 %v451_v0  ;;  %435 = vmatprep.subr.bf16.mxu1 %v451_v0  ;;  %v454_v3 = vld [vmem:[%s586_s1 + $0x20] sm:$0xff]   ;;  %v455_v6 = vld [vmem:[%s586_s1 + $0x18] sm:$0xff]   ;;  %v456_v7 = vld [vmem:[%s586_s1 + $0x10] sm:$0xff]  }
   0x3   :  { %404 = vmatpush3.bf16.msra.mxu0 %v451_v0  ;;  %443 = vmatpush3.bf16.msra.mxu1 %v451_v0  ;;  %v459_v4 = vld [vmem:[%s587_s0] sm:$0xff]   ;;  %v457_v8 = vld [vmem:[%s586_s1 + $0x8] sm:$0xff]   ;;  %v463_v12 = vld [vmem:[%s587_s0 + $0x10] sm:$0xff]  }
   0x4   :  { %405 = vmatprep.subr.bf16.mxu0 %v452_v1  ;;  %436 = vmatprep.subr.bf16.mxu1 %v452_v1  ;;  %v460_v5 = vld [vmem:[%s587_s0 + $0x20] sm:$0xff]   ;;  %v461_v10 = vld [vmem:[%s587_s0 + $0x8] sm:$0xff]   ;;  %v464_v13 = vld [vmem:[%s587_s0 + $0x30] sm:$0xff]  }
   0x5   :  { %419 = vmatprep.mubr.bf16.mxu0 %v459_v4  ;;  %427 = vmatprep.mubr.bf16.mxu1 %v460_v5  ;;  %v458_v9 = vld [vmem:[%s586_s1] sm:$0xff]   ;;  %v462_v11 = vld [vmem:[%s587_s0 + $0x28] sm:$0xff]   ;;  %v465_v14 = vld [vmem:[%s587_s0 + $0x18] sm:$0xff]  }
   0x6   :  { %v466_v15 = vld [vmem:[%s587_s0 + $0x38] sm:$0xff]   ;;  %v386_v16 = vld [vmem:[%s588_s2] ss:$0 sm:$0xff] }
   0x7   :  { %406 = vmatpush3.bf16.msra.mxu0 %v452_v1  ;;  %444 = vmatpush3.bf16.msra.mxu1 %v452_v1 }
   0x8   :  { %407 = vmatprep.subr.bf16.mxu0 %v453_v2  ;;  %437 = vmatprep.subr.bf16.mxu1 %v453_v2 }
   0xb   :  { %408 = vmatpush3.bf16.msra.mxu0 %v453_v2  ;;  %445 = vmatpush3.bf16.msra.mxu1 %v453_v2 }
   0xc   :  { %409 = vmatprep.subr.bf16.mxu0 %v454_v3  ;;  %438 = vmatprep.subr.bf16.mxu1 %v454_v3 }
   0xf   :  { %410 = vmatpush3.bf16.msra.mxu0 %v454_v3  ;;  %446 = vmatpush3.bf16.msra.mxu1 %v454_v3 }
  0x10   :  { %411 = vmatprep.subr.bf16.mxu0 %v455_v6  ;;  %439 = vmatprep.subr.bf16.mxu1 %v455_v6 }
  0x13   :  { %412 = vmatpush3.bf16.msra.mxu0 %v455_v6  ;;  %447 = vmatpush3.bf16.msra.mxu1 %v455_v6 }
  0x14   :  { %413 = vmatprep.subr.bf16.mxu0 %v456_v7  ;;  %440 = vmatprep.subr.bf16.mxu1 %v456_v7 }
  0x17   :  { %414 = vmatpush3.bf16.msra.mxu0 %v456_v7  ;;  %448 = vmatpush3.bf16.msra.mxu1 %v456_v7 }
  0x18   :  { %415 = vmatprep.subr.bf16.mxu0 %v457_v8  ;;  %441 = vmatprep.subr.bf16.mxu1 %v457_v8 }
  0x1b   :  { %416 = vmatpush3.bf16.msra.mxu0 %v457_v8  ;;  %449 = vmatpush3.bf16.msra.mxu1 %v457_v8 }
  0x1c   :  { %417 = vmatprep.subr.bf16.mxu0 %v458_v9  ;;  %442 = vmatprep.subr.bf16.mxu1 %v458_v9 }
  0x1f   :  { %418 = vmatpush3.bf16.msra.mxu0 %v458_v9  ;;  %450 = vmatpush3.bf16.msra.mxu1 %v458_v9 }
  0x22   :  { %420 = vmatmul.mubr.bf16.vlgmr.msra.gmra.mxu0 %v461_v10  ;;  %428 = vmatmul.mubr.bf16.vlgmr.msra.gmra.mxu1 %v462_v11 }
  0x23   :  { %423 = vmatprep.mubr.bf16.mxu0 %v463_v12  ;;  %431 = vmatprep.mubr.bf16.mxu1 %v464_v13 }
  0x2a   :  { %424 = vmatmul.mubr.bf16.gmra.mxu0 %v465_v14  ;;  %432 = vmatmul.mubr.bf16.gmra.mxu1 %v466_v15 }
  0xe2   :  { %v421_v17 = vpop.f32.mrf.mxu0  ;;  %v429_v18 = vpop.f32.mrf.mxu1 }
  0xe3   :  { %v336_v19 = vadd.f32 %v421_v17, %v386_v16  ;;  %v344_v20 = vadd.f32 %v429_v18, %v386_v16 }
  0xe4   :  { %v213_v21 = vpop.f32.mrf.mxu0  ;;  %v245_v22 = vpop.f32.mrf.mxu1 }
  0xe5   :  { %352 = vst [vmem:[%s589_s3 + $0x10] sm:$0xff] %v336_v19  ;;  %360 = vst [vmem:[%s589_s3 + $0x50] sm:$0xff] %v344_v20  ;;  %v334_v23 = vadd.f32 %v386_v16, %v213_v21  ;;  %v342_v24 = vadd.f32 %v386_v16, %v245_v22 }
  0xe6   :  { %v422_v25 = vpop.f32.mrf.mxu0  ;;  %v430_v26 = vpop.f32.mrf.mxu1 }
  0xe7   :  { %350 = vst [vmem:[%s589_s3] sm:$0xff] %v334_v23  ;;  %358 = vst [vmem:[%s589_s3 + $0x40] sm:$0xff] %v342_v24  ;;  %v337_v27 = vadd.f32 %v422_v25, %v386_v16  ;;  %v345_v28 = vadd.f32 %v430_v26, %v386_v16 }
  0xe8   :  { %v216_v29 = vpop.f32.mrf.mxu0  ;;  %v248_v30 = vpop.f32.mrf.mxu1 }
  0xe9   :  { %353 = vst [vmem:[%s589_s3 + $0x18] sm:$0xff] %v337_v27  ;;  %361 = vst [vmem:[%s589_s3 + $0x58] sm:$0xff] %v345_v28  ;;  %v335_v31 = vadd.f32 %v386_v16, %v216_v29  ;;  %v343_v32 = vadd.f32 %v386_v16, %v248_v30 }
  0xea   :  { %v425_v33 = vpop.f32.mrf.mxu0  ;;  %v433_v34 = vpop.f32.mrf.mxu1 }
  0xeb   :  { %351 = vst [vmem:[%s589_s3 + $0x8] sm:$0xff] %v335_v31  ;;  %359 = vst [vmem:[%s589_s3 + $0x48] sm:$0xff] %v343_v32  ;;  %v340_v35 = vadd.f32 %v425_v33, %v386_v16  ;;  %v348_v36 = vadd.f32 %v433_v34, %v386_v16 }
  0xec   :  { %v229_v37 = vpop.f32.mrf.mxu0  ;;  %v261_v38 = vpop.f32.mrf.mxu1 }
  0xed   :  { %356 = vst [vmem:[%s589_s3 + $0x30] sm:$0xff] %v340_v35  ;;  %364 = vst [vmem:[%s589_s3 + $0x70] sm:$0xff] %v348_v36  ;;  %v338_v39 = vadd.f32 %v386_v16, %v229_v37  ;;  %v346_v40 = vadd.f32 %v386_v16, %v261_v38 }
  0xee   :  { %v426_v41 = vpop.f32.mrf.mxu0  ;;  %v434_v42 = vpop.f32.mrf.mxu1 }
  0xef   :  { %354 = vst [vmem:[%s589_s3 + $0x20] sm:$0xff] %v338_v39  ;;  %362 = vst [vmem:[%s589_s3 + $0x60] sm:$0xff] %v346_v40  ;;  %v341_v43 = vadd.f32 %v426_v41, %v386_v16  ;;  %v349_v44 = vadd.f32 %v434_v42, %v386_v16 }
  0xf0   :  { %v232_v45 = vpop.f32.mrf.mxu0  ;;  %v264_v46 = vpop.f32.mrf.mxu1 }
  0xf1   :  { %357 = vst [vmem:[%s589_s3 + $0x38] sm:$0xff] %v341_v43  ;;  %365 = vst [vmem:[%s589_s3 + $0x78] sm:$0xff] %v349_v44  ;;  %v339_v47 = vadd.f32 %v386_v16, %v232_v45  ;;  %v347_v48 = vadd.f32 %v386_v16, %v264_v46 }
  0xf3   :  { %355 = vst [vmem:[%s589_s3 + $0x28] sm:$0xff] %v339_v47  ;;  %363 = vst [vmem:[%s589_s3 + $0x68] sm:$0xff] %v347_v48 }

// kernel: unet_generator2.36
= control target key start
LH: loop header
LB: loop body
LE: loop exit
PB: predicated region body
PF: predicated region fallthrough
CT: control target
= control target key end

     0   :  { %v122_v0 = vmov 0.0   ;;  %vm88_vm0 = vcmask 1040384   ;;  %s198_s1 = inlined_call_operand.vmem [shape: f32[2,128], index: 1, kind: output, shape index: {}]   ;;  %s199_s0 = inlined_call_operand.vmem [shape: f32[128,128], index: 0, kind: input, shape index: {}]  }
   0x1   :  { %12 = vst [vmem:[%s198_s1] sm:$0x3] %v122_v0  ;;  %v13_v1 = vld [vmem:[%s199_s0] sm:$0xff]  ;;  %v14_v2 = vld [vmem:[%s199_s0 + $0x8] sm:$0xff]  ;;  %v15_v3 = vld [vmem:[%s199_s0 + $0x10] sm:$0xff] }
   0x2   :  { %v16_v4 = vld [vmem:[%s199_s0 + $0x18] sm:$0xff]  ;;  %v29_v5 = vadd.f32 %v14_v2, %v13_v1  ;;  %v50_v6 = vmul.f32 %v13_v1, %v13_v1  ;;  %v51_v7 = vmul.f32 %v14_v2, %v14_v2  ;;  %v52_v8 = vmul.f32 %v15_v3, %v15_v3  ;;  %v17_v9 = vld [vmem:[%s199_s0 + $0x20] sm:$0xff]  ;;  %v18_v13 = vld [vmem:[%s199_s0 + $0x28] sm:$0xff] }
   0x3   :  { %v53_v11 = vmul.f32 %v16_v4, %v16_v4  ;;  %v54_v15 = vmul.f32 %v17_v9, %v17_v9  ;;  %v19_v17 = vld [vmem:[%s199_s0 + $0x30] sm:$0xff]  ;;  %v55_v19 = vmul.f32 %v18_v13, %v18_v13  ;;  %v20_v21 = vld [vmem:[%s199_s0 + $0x38] sm:$0xff]  ;;  %v21_v25 = vld [vmem:[%s199_s0 + $0x40] sm:$0xff] }
   0x4   :  { %v30_v10 = vadd.f32 %v29_v5, %v15_v3  ;;  %v66_v12 = vadd.f32 %v51_v7, %v50_v6  ;;  %v56_v23 = vmul.f32 %v19_v17, %v19_v17  ;;  %v57_v27 = vmul.f32 %v20_v21, %v20_v21  ;;  %v22_v29 = vld [vmem:[%s199_s0 + $0x48] sm:$0xff]  ;;  %v23_v33 = vld [vmem:[%s199_s0 + $0x50] sm:$0xff]  ;;  %v24_v37 = vld [vmem:[%s199_s0 + $0x58] sm:$0xff] }
   0x5   :  { %v58_v31 = vmul.f32 %v21_v25, %v21_v25  ;;  %v59_v35 = vmul.f32 %v22_v29, %v22_v29  ;;  %v60_v39 = vmul.f32 %v23_v33, %v23_v33  ;;  %v25_v41 = vld [vmem:[%s199_s0 + $0x60] sm:$0xff]  ;;  %v61_v43 = vmul.f32 %v24_v37, %v24_v37  ;;  %v26_v45 = vld [vmem:[%s199_s0 + $0x68] sm:$0xff]  ;;  %v27_v49 = vld [vmem:[%s199_s0 + $0x70] sm:$0xff] }
   0x6   :  { %v31_v14 = vadd.f32 %v30_v10, %v16_v4  ;;  %v67_v16 = vadd.f32 %v66_v12, %v52_v8  ;;  %v62_v47 = vmul.f32 %v25_v41, %v25_v41  ;;  %v63_v51 = vmul.f32 %v26_v45, %v26_v45  ;;  %v28_v53 = vld [vmem:[%s199_s0 + $0x78] sm:$0xff] }
   0x7   :  { %v64_v55 = vmul.f32 %v27_v49, %v27_v49  ;;  %v65_v58 = vmul.f32 %v28_v53, %v28_v53 }
   0x8   :  { %v32_v18 = vadd.f32 %v31_v14, %v17_v9  ;;  %v68_v20 = vadd.f32 %v67_v16, %v53_v11  ;;  %v87_v11 = vld [vmem:[%s198_s1] sm:$0x3] }
   0xa   :  { %v33_v22 = vadd.f32 %v32_v18, %v18_v13  ;;  %v69_v24 = vadd.f32 %v68_v20, %v54_v15 }
   0xc   :  { %v34_v26 = vadd.f32 %v33_v22, %v19_v17  ;;  %v70_v28 = vadd.f32 %v69_v24, %v55_v19 }
   0xe   :  { %v35_v30 = vadd.f32 %v34_v26, %v20_v21  ;;  %v71_v32 = vadd.f32 %v70_v28, %v56_v23 }
  0x10   :  { %v36_v34 = vadd.f32 %v35_v30, %v21_v25  ;;  %v72_v36 = vadd.f32 %v71_v32, %v57_v27 }
  0x12   :  { %v37_v38 = vadd.f32 %v36_v34, %v22_v29  ;;  %v73_v40 = vadd.f32 %v72_v36, %v58_v31 }
  0x14   :  { %v38_v42 = vadd.f32 %v37_v38, %v23_v33  ;;  %v74_v44 = vadd.f32 %v73_v40, %v59_v35 }
  0x16   :  { %v39_v46 = vadd.f32 %v38_v42, %v24_v37  ;;  %v75_v48 = vadd.f32 %v74_v44, %v60_v39 }
  0x18   :  { %v40_v50 = vadd.f32 %v39_v46, %v25_v41  ;;  %v76_v52 = vadd.f32 %v75_v48, %v61_v43 }
  0x1a   :  { %v41_v54 = vadd.f32 %v40_v50, %v26_v45  ;;  %v77_v56 = vadd.f32 %v76_v52, %v62_v47 }
  0x1c   :  { %v42_v57 = vadd.f32 %v41_v54, %v27_v49  ;;  %v78_v59 = vadd.f32 %v77_v56, %v63_v51 }
  0x1e   :  { %v43_v60 = vadd.f32 %v42_v57, %v28_v53  ;;  %v79_v61 = vadd.f32 %v78_v59, %v64_v55 }
  0x20   :  { %v44_v62 = vrot.slane %v43_v60, 4  ;;  %v80_v63 = vadd.f32 %v79_v61, %v65_v58 }
  0x22   :  { %v45_v0 = vadd.f32 %v44_v62, %v43_v60  ;;  %v81_v1 = vrot.slane %v80_v63, 4 }
  0x24   :  { %v46_v2 = vrot.slane %v45_v0, 2  ;;  %v82_v3 = vadd.f32 %v81_v1, %v80_v63 }
  0x26   :  { %v47_v4 = vadd.f32 %v46_v2, %v45_v0  ;;  %v83_v5 = vrot.slane %v82_v3, 2 }
  0x28   :  { %v48_v6 = vrot.slane %v47_v4, 1  ;;  %v84_v7 = vadd.f32 %v83_v5, %v82_v3 }
  0x2a   :  { %v49_v8 = vadd.f32 %v48_v6, %v47_v4  ;;  %v85_v9 = vrot.slane %v84_v7, 1 }
  0x2c   :  { %v86_v10 = vadd.f32 %v85_v9, %v84_v7 }
  0x2e   :  { %v89_v12 = vsel %vm88_vm0, %v49_v8, %v86_v10 }
  0x2f   :  { %v90_v13 = vadd.f32 %v89_v12, %v87_v11 }
  0x31   :  { %91 = vst [vmem:[%s198_s1] sm:$0x3] %v90_v13 }
  0x38   :  { %v95_v14 = vld [vmem:[%s198_s1] sm:$0x3] }
  0x39   :  { %v96_v15 = vmul.f32 0.0078125, %v95_v14 }
  0x3b   :  { %v97_v16 = vmul.f32 %v96_v15, %v96_v15  ;;  %v105_v22 = vsub.f32 0.0, %v96_v15 }
  0x3d   :  { %v99_v17 = vrot.slane %v97_v16, 7 }
  0x3f   :  { %v101_v18 = vsub.f32 %v96_v15, %v99_v17 }
  0x41   :  { %v102_v19 = vmax.f32 %v101_v18, 0.0 }
  0x43   :  { %v103_v20 = vadd.f32 1e-05, %v102_v19 }
  0x45   :  { %120 = vrsqrt.f32 %v103_v20 }
  0x52   :  { %v121_v21 = vpop.eup %120 }
  0x53   :  { %v107_v23 = vrot.slane %v121_v21, 1 }
  0x55   :  { %v109_v24 = vmul.f32 %v107_v23, %v105_v22 }
  0x57   :  { %v111_v25 = vrot.slane %v109_v24, 7 }
  0x59   :  { %v113_v26 = vsel %vm88_vm0, %v107_v23, %v111_v25 }
  0x5a   :  { %114 = vst [vmem:[%s198_s1] sm:$0x3] %v113_v26 }

// kernel: unet_generator2.38
= control target key start
LH: loop header
LB: loop body
LE: loop exit
PB: predicated region body
PF: predicated region fallthrough
CT: control target
= control target key end

     0   :  { %v74_v0 = vmov 0.0   ;;  %vm40_vm0 = vcmask 1040384   ;;  %s114_s1 = inlined_call_operand.vmem [shape: f32[2,128], index: 1, kind: output, shape index: {}]   ;;  %s115_s0 = inlined_call_operand.vmem [shape: f32[32,128], index: 0, kind: input, shape index: {}]  }
   0x1   :  { %12 = vst [vmem:[%s114_s1] sm:$0x3] %v74_v0  ;;  %v13_v1 = vld [vmem:[%s115_s0] sm:$0xff]  ;;  %v14_v2 = vld [vmem:[%s115_s0 + $0x8] sm:$0xff]  ;;  %v15_v3 = vld [vmem:[%s115_s0 + $0x10] sm:$0xff] }
   0x2   :  { %v16_v4 = vld [vmem:[%s115_s0 + $0x18] sm:$0xff]  ;;  %v17_v5 = vadd.f32 %v14_v2, %v13_v1  ;;  %v26_v6 = vmul.f32 %v13_v1, %v13_v1  ;;  %v27_v7 = vmul.f32 %v14_v2, %v14_v2  ;;  %v28_v8 = vmul.f32 %v15_v3, %v15_v3 }
   0x3   :  { %v29_v10 = vmul.f32 %v16_v4, %v16_v4 }
   0x4   :  { %v18_v9 = vadd.f32 %v17_v5, %v15_v3  ;;  %v30_v11 = vadd.f32 %v27_v7, %v26_v6 }
   0x6   :  { %v19_v12 = vadd.f32 %v18_v9, %v16_v4  ;;  %v31_v13 = vadd.f32 %v30_v11, %v28_v8 }
   0x8   :  { %v20_v14 = vrot.slane %v19_v12, 4  ;;  %v32_v15 = vadd.f32 %v31_v13, %v29_v10  ;;  %v39_v27 = vld [vmem:[%s114_s1] sm:$0x3] }
   0xa   :  { %v21_v16 = vadd.f32 %v20_v14, %v19_v12  ;;  %v33_v17 = vrot.slane %v32_v15, 4 }
   0xc   :  { %v22_v18 = vrot.slane %v21_v16, 2  ;;  %v34_v19 = vadd.f32 %v33_v17, %v32_v15 }
   0xe   :  { %v23_v20 = vadd.f32 %v22_v18, %v21_v16  ;;  %v35_v21 = vrot.slane %v34_v19, 2 }
  0x10   :  { %v24_v22 = vrot.slane %v23_v20, 1  ;;  %v36_v23 = vadd.f32 %v35_v21, %v34_v19 }
  0x12   :  { %v25_v24 = vadd.f32 %v24_v22, %v23_v20  ;;  %v37_v25 = vrot.slane %v36_v23, 1 }
  0x14   :  { %v38_v26 = vadd.f32 %v37_v25, %v36_v23 }
  0x16   :  { %v41_v28 = vsel %vm40_vm0, %v25_v24, %v38_v26 }
  0x17   :  { %v42_v29 = vadd.f32 %v41_v28, %v39_v27 }
  0x19   :  { %43 = vst [vmem:[%s114_s1] sm:$0x3] %v42_v29 }
  0x20   :  { %v47_v30 = vld [vmem:[%s114_s1] sm:$0x3] }
  0x21   :  { %v48_v31 = vmul.f32 0.03125, %v47_v30 }
  0x23   :  { %v49_v32 = vmul.f32 %v48_v31, %v48_v31  ;;  %v57_v38 = vsub.f32 0.0, %v48_v31 }
  0x25   :  { %v51_v33 = vrot.slane %v49_v32, 7 }
  0x27   :  { %v53_v34 = vsub.f32 %v48_v31, %v51_v33 }
  0x29   :  { %v54_v35 = vmax.f32 %v53_v34, 0.0 }
  0x2b   :  { %v55_v36 = vadd.f32 1e-05, %v54_v35 }
  0x2d   :  { %72 = vrsqrt.f32 %v55_v36 }
  0x3a   :  { %v73_v37 = vpop.eup %72 }
  0x3b   :  { %v59_v39 = vrot.slane %v73_v37, 1 }
  0x3d   :  { %v61_v40 = vmul.f32 %v59_v39, %v57_v38 }
  0x3f   :  { %v63_v41 = vrot.slane %v61_v40, 7 }
  0x41   :  { %v65_v42 = vsel %vm40_vm0, %v59_v39, %v63_v41 }
  0x42   :  { %66 = vst [vmem:[%s114_s1] sm:$0x3] %v65_v42 }

// kernel: unet_generator2.37
= control target key start
LH: loop header
LB: loop body
LE: loop exit
PB: predicated region body
PF: predicated region fallthrough
CT: control target
= control target key end

     0   :  { %s444_s1 = inlined_call_operand.vmem [shape: bf16[1,256,128], index: 1, kind: input, shape index: {}]   ;;  %s445_s0 = inlined_call_operand.vmem [shape: bf16[1,32,256], index: 0, kind: input, shape index: {}]   ;;  %s446_s2 = inlined_call_operand.vmem [shape: f32[1,128], index: 2, kind: input, shape index: {}]   ;;  %s447_s3 = inlined_call_operand.vmem [shape: f32[1,32,128], index: 3, kind: output, shape index: {}]  }
   0x1   :  { %v327_v0 = vld [vmem:[%s444_s1 + $0x78] sm:$0xff]   ;;  %v329_v2 = vld [vmem:[%s444_s1 + $0x70] sm:$0xff]   ;;  %v331_v4 = vld [vmem:[%s444_s1 + $0x68] sm:$0xff]  }
   0x2   :  { %v328_v1 = vld [vmem:[%s444_s1 + $0x38] sm:$0xff]   ;;  %283 = vmatprep.subr.bf16.mxu0 %v327_v0  ;;  %311 = vmatprep.subr.bf16.mxu1 %v327_v0  ;;  %v330_v3 = vld [vmem:[%s444_s1 + $0x30] sm:$0xff]   ;;  %v332_v5 = vld [vmem:[%s444_s1 + $0x28] sm:$0xff]  }
   0x3   :  { %284 = vmatpush3.bf16.msra.mxu0 %v328_v1  ;;  %319 = vmatpush3.bf16.msra.mxu1 %v328_v1  ;;  %v333_v6 = vld [vmem:[%s444_s1 + $0x60] sm:$0xff]   ;;  %v335_v8 = vld [vmem:[%s444_s1 + $0x58] sm:$0xff]   ;;  %v337_v10 = vld [vmem:[%s444_s1 + $0x50] sm:$0xff]  }
   0x4   :  { %285 = vmatprep.subr.bf16.mxu0 %v329_v2  ;;  %312 = vmatprep.subr.bf16.mxu1 %v329_v2  ;;  %v334_v7 = vld [vmem:[%s444_s1 + $0x20] sm:$0xff]   ;;  %v336_v9 = vld [vmem:[%s444_s1 + $0x18] sm:$0xff]   ;;  %v338_v13 = vld [vmem:[%s444_s1 + $0x10] sm:$0xff]  }
   0x5   :  { %v345_v11 = vld [vmem:[%s445_s0 + $0x4] ss:$8 sps:$4 sm:$0xff]   ;;  %v348_v12 = vld [vmem:[%s445_s0 + $0x14] ss:$8 sps:$4 sm:$0xff]   ;;  %v343_v18 = vld [vmem:[%s445_s0] ss:$8 sps:$4 sm:$0xff]  }
   0x6   :  { %v339_v14 = vld [vmem:[%s444_s1 + $0x48] sm:$0xff]   ;;  %211 = vmatprep.mubr.bf16.mxu0 %v345_v11  ;;  %219 = vmatprep.mubr.bf16.mxu1 %v348_v12  ;;  %v341_v16 = vld [vmem:[%s444_s1 + $0x40] sm:$0xff]   ;;  %v346_v19 = vld [vmem:[%s445_s0 + $0x10] ss:$8 sps:$4 sm:$0xff]  }
   0x7   :  { %286 = vmatpush3.bf16.msra.mxu0 %v330_v3  ;;  %320 = vmatpush3.bf16.msra.mxu1 %v330_v3  ;;  %v340_v15 = vld [vmem:[%s444_s1 + $0x8] sm:$0xff]   ;;  %v342_v17 = vld [vmem:[%s444_s1] sm:$0xff]  }
   0x8   :  { %287 = vmatprep.subr.bf16.mxu0 %v331_v4  ;;  %313 = vmatprep.subr.bf16.mxu1 %v331_v4  ;;  %v282_v23 = vld [vmem:[%s446_s2] ss:$0 sm:$0xff] }
   0xb   :  { %288 = vmatpush3.bf16.msra.mxu0 %v332_v5  ;;  %321 = vmatpush3.bf16.msra.mxu1 %v332_v5 }
   0xc   :  { %289 = vmatprep.subr.bf16.mxu0 %v333_v6  ;;  %314 = vmatprep.subr.bf16.mxu1 %v333_v6 }
   0xf   :  { %290 = vmatpush3.bf16.msra.mxu0 %v334_v7  ;;  %322 = vmatpush3.bf16.msra.mxu1 %v334_v7 }
  0x10   :  { %291 = vmatprep.subr.bf16.mxu0 %v335_v8  ;;  %315 = vmatprep.subr.bf16.mxu1 %v335_v8 }
  0x13   :  { %292 = vmatpush3.bf16.msra.mxu0 %v336_v9  ;;  %323 = vmatpush3.bf16.msra.mxu1 %v336_v9 }
  0x14   :  { %293 = vmatprep.subr.bf16.mxu0 %v337_v10  ;;  %316 = vmatprep.subr.bf16.mxu1 %v337_v10 }
  0x17   :  { %294 = vmatpush3.bf16.msra.mxu0 %v338_v13  ;;  %324 = vmatpush3.bf16.msra.mxu1 %v338_v13 }
  0x18   :  { %295 = vmatprep.subr.bf16.mxu0 %v339_v14  ;;  %317 = vmatprep.subr.bf16.mxu1 %v339_v14 }
  0x1b   :  { %296 = vmatpush3.bf16.msra.mxu0 %v340_v15  ;;  %325 = vmatpush3.bf16.msra.mxu1 %v340_v15 }
  0x1c   :  { %297 = vmatprep.subr.bf16.mxu0 %v341_v16  ;;  %318 = vmatprep.subr.bf16.mxu1 %v341_v16 }
  0x1f   :  { %298 = vmatpush3.bf16.msra.mxu0 %v342_v17  ;;  %326 = vmatpush3.bf16.msra.mxu1 %v342_v17 }
  0x22   :  { %212 = vmatmul.mubr.bf16.vlgmr.msra.gmra.mxu0 %v343_v18  ;;  %220 = vmatmul.mubr.bf16.vlgmr.msra.gmra.mxu1 %v346_v19 }
  0xe2   :  { %v299_v20 = vpop.f32.mrf.mxu0  ;;  %v305_v21 = vpop.f32.mrf.mxu1 }
  0xe4   :  { %v300_v22 = vpop.f32.mrf.mxu0  ;;  %v306_v24 = vpop.f32.mrf.mxu1 }
  0xe5   :  { %v301_v25 = vadd.f32 %v300_v22, %v299_v20  ;;  %v307_v26 = vadd.f32 %v306_v24, %v305_v21 }
  0xe6   :  { %v302_v27 = vpop.f32.mrf.mxu0  ;;  %v308_v28 = vpop.f32.mrf.mxu1 }
  0xe7   :  { %v250_v29 = vadd.f32 %v301_v25, %v282_v23  ;;  %v252_v30 = vadd.f32 %v307_v26, %v282_v23 }
  0xe8   :  { %v303_v31 = vpop.f32.mrf.mxu0  ;;  %v309_v32 = vpop.f32.mrf.mxu1 }
  0xe9   :  { %254 = vst [vmem:[%s447_s3] sm:$0xff] %v250_v29  ;;  %256 = vst [vmem:[%s447_s3 + $0x10] sm:$0xff] %v252_v30  ;;  %v304_v33 = vadd.f32 %v303_v31, %v302_v27  ;;  %v310_v34 = vadd.f32 %v309_v32, %v308_v28 }
  0xeb   :  { %v251_v35 = vadd.f32 %v304_v33, %v282_v23  ;;  %v253_v36 = vadd.f32 %v310_v34, %v282_v23 }
  0xed   :  { %255 = vst [vmem:[%s447_s3 + $0x8] sm:$0xff] %v251_v35  ;;  %257 = vst [vmem:[%s447_s3 + $0x18] sm:$0xff] %v253_v36 }

// kernel: unet_generator2.40
= control target key start
LH: loop header
LB: loop body
LE: loop exit
PB: predicated region body
PF: predicated region fallthrough
CT: control target
= control target key end

     0   :  { %v62_v0 = vmov 0.0   ;;  %vm28_vm0 = vcmask 1040384   ;;  %s93_s1 = inlined_call_operand.vmem [shape: f32[2,128], index: 1, kind: output, shape index: {}]   ;;  %s94_s0 = inlined_call_operand.vmem [shape: f32[8,128], index: 0, kind: input, shape index: {}]  }
   0x1   :  { %12 = vst [vmem:[%s93_s1] sm:$0x3] %v62_v0  ;;  %v13_v1 = vld [vmem:[%s94_s0] sm:$0xff] }
   0x2   :  { %v14_v2 = vrot.slane %v13_v1, 4  ;;  %v20_v3 = vmul.f32 %v13_v1, %v13_v1 }
   0x4   :  { %v15_v4 = vadd.f32 %v14_v2, %v13_v1  ;;  %v21_v5 = vrot.slane %v20_v3, 4 }
   0x6   :  { %v16_v6 = vrot.slane %v15_v4, 2  ;;  %v22_v7 = vadd.f32 %v21_v5, %v20_v3 }
   0x8   :  { %v17_v8 = vadd.f32 %v16_v6, %v15_v4  ;;  %v23_v9 = vrot.slane %v22_v7, 2  ;;  %v27_v15 = vld [vmem:[%s93_s1] sm:$0x3] }
   0xa   :  { %v18_v10 = vrot.slane %v17_v8, 1  ;;  %v24_v11 = vadd.f32 %v23_v9, %v22_v7 }
   0xc   :  { %v19_v12 = vadd.f32 %v18_v10, %v17_v8  ;;  %v25_v13 = vrot.slane %v24_v11, 1 }
   0xe   :  { %v26_v14 = vadd.f32 %v25_v13, %v24_v11 }
  0x10   :  { %v29_v16 = vsel %vm28_vm0, %v19_v12, %v26_v14 }
  0x11   :  { %v30_v17 = vadd.f32 %v29_v16, %v27_v15 }
  0x13   :  { %31 = vst [vmem:[%s93_s1] sm:$0x3] %v30_v17 }
  0x1a   :  { %v35_v18 = vld [vmem:[%s93_s1] sm:$0x3] }
  0x1b   :  { %v36_v19 = vmul.f32 0.125, %v35_v18 }
  0x1d   :  { %v37_v20 = vmul.f32 %v36_v19, %v36_v19  ;;  %v45_v26 = vsub.f32 0.0, %v36_v19 }
  0x1f   :  { %v39_v21 = vrot.slane %v37_v20, 7 }
  0x21   :  { %v41_v22 = vsub.f32 %v36_v19, %v39_v21 }
  0x23   :  { %v42_v23 = vmax.f32 %v41_v22, 0.0 }
  0x25   :  { %v43_v24 = vadd.f32 1e-05, %v42_v23 }
  0x27   :  { %60 = vrsqrt.f32 %v43_v24 }
  0x34   :  { %v61_v25 = vpop.eup %60 }
  0x35   :  { %v47_v27 = vrot.slane %v61_v25, 1 }
  0x37   :  { %v49_v28 = vmul.f32 %v47_v27, %v45_v26 }
  0x39   :  { %v51_v29 = vrot.slane %v49_v28, 7 }
  0x3b   :  { %v53_v30 = vsel %vm28_vm0, %v47_v27, %v51_v29 }
  0x3c   :  { %54 = vst [vmem:[%s93_s1] sm:$0x3] %v53_v30 }

// kernel: unet_generator2.39
= control target key start
LH: loop header
LB: loop body
LE: loop exit
PB: predicated region body
PF: predicated region fallthrough
CT: control target
= control target key end

     0   :  { %s637_s1 = inlined_call_operand.vmem [shape: bf16[1,512,128], index: 1, kind: input, shape index: {}]   ;;  %s638_s0 = inlined_call_operand.vmem [shape: bf16[1,8,512], index: 0, kind: input, shape index: {}]   ;;  %s639_s2 = inlined_call_operand.vmem [shape: f32[1,128], index: 2, kind: input, shape index: {}]   ;;  %s640_s3 = inlined_call_operand.vmem [shape: f32[1,8,128], index: 3, kind: output, shape index: {}]  }
   0x1   :  { %v473_v0 = vld [vmem:[%s637_s1 + $0x78] sm:$0xff]   ;;  %v477_v4 = vld [vmem:[%s637_s1 + $0x70] sm:$0xff]   ;;  %v481_v8 = vld [vmem:[%s637_s1 + $0x68] sm:$0xff]  }
   0x2   :  { %v474_v1 = vld [vmem:[%s637_s1 + $0xf8] sm:$0xff]   ;;  %429 = vmatprep.subr.bf16.mxu0 %v473_v0  ;;  %v478_v5 = vld [vmem:[%s637_s1 + $0xf0] sm:$0xff]   ;;  %v482_v9 = vld [vmem:[%s637_s1 + $0xe8] sm:$0xff]  }
   0x3   :  { %v475_v2 = vld [vmem:[%s637_s1 + $0x38] sm:$0xff]   ;;  %451 = vmatprep.subr.bf16.mxu1 %v474_v1  ;;  %v479_v6 = vld [vmem:[%s637_s1 + $0x30] sm:$0xff]   ;;  %v483_v10 = vld [vmem:[%s637_s1 + $0x28] sm:$0xff]  }
   0x4   :  { %v476_v3 = vld [vmem:[%s637_s1 + $0xb8] sm:$0xff]   ;;  %430 = vmatpush3.bf16.msra.mxu0 %v475_v2  ;;  %v480_v7 = vld [vmem:[%s637_s1 + $0xb0] sm:$0xff]   ;;  %v484_v11 = vld [vmem:[%s637_s1 + $0xa8] sm:$0xff]  }
   0x5   :  { %452 = vmatpush3.bf16.msra.mxu1 %v476_v3  ;;  %431 = vmatprep.subr.bf16.mxu0 %v477_v4  ;;  %v485_v12 = vld [vmem:[%s637_s1 + $0x60] sm:$0xff]   ;;  %v489_v16 = vld [vmem:[%s637_s1 + $0x58] sm:$0xff]   ;;  %v493_v20 = vld [vmem:[%s637_s1 + $0x50] sm:$0xff]  }
   0x6   :  { %453 = vmatprep.subr.bf16.mxu1 %v478_v5  ;;  %v486_v13 = vld [vmem:[%s637_s1 + $0xe0] sm:$0xff]   ;;  %v490_v17 = vld [vmem:[%s637_s1 + $0xd8] sm:$0xff]   ;;  %v494_v21 = vld [vmem:[%s637_s1 + $0xd0] sm:$0xff]  }
   0x7   :  { %v487_v14 = vld [vmem:[%s637_s1 + $0x20] sm:$0xff]   ;;  %v491_v18 = vld [vmem:[%s637_s1 + $0x18] sm:$0xff]   ;;  %v495_v22 = vld [vmem:[%s637_s1 + $0x10] sm:$0xff]  }
   0x8   :  { %432 = vmatpush3.bf16.msra.mxu0 %v479_v6  ;;  %v488_v15 = vld [vmem:[%s637_s1 + $0xa0] sm:$0xff]   ;;  %v492_v19 = vld [vmem:[%s637_s1 + $0x98] sm:$0xff]   ;;  %v496_v23 = vld [vmem:[%s637_s1 + $0x90] sm:$0xff]  }
   0x9   :  { %454 = vmatpush3.bf16.msra.mxu1 %v480_v7  ;;  %433 = vmatprep.subr.bf16.mxu0 %v481_v8  ;;  %v497_v24 = vld [vmem:[%s637_s1 + $0x48] sm:$0xff]   ;;  %v501_v28 = vld [vmem:[%s637_s1 + $0x40] sm:$0xff]  }
   0xa   :  { %455 = vmatprep.subr.bf16.mxu1 %v482_v9  ;;  %v498_v25 = vld [vmem:[%s637_s1 + $0xc8] sm:$0xff]   ;;  %v502_v29 = vld [vmem:[%s637_s1 + $0xc0] sm:$0xff]  }
   0xb   :  { %v499_v26 = vld [vmem:[%s637_s1 + $0x8] sm:$0xff]   ;;  %v503_v30 = vld [vmem:[%s637_s1] sm:$0xff]  }
   0xc   :  { %434 = vmatpush3.bf16.msra.mxu0 %v483_v10  ;;  %v500_v27 = vld [vmem:[%s637_s1 + $0x88] sm:$0xff]   ;;  %v504_v31 = vld [vmem:[%s637_s1 + $0x80] sm:$0xff]  }
   0xd   :  { %456 = vmatpush3.bf16.msra.mxu1 %v484_v11  ;;  %435 = vmatprep.subr.bf16.mxu0 %v485_v12  ;;  %v20_v32 = vld [vmem:[%s638_s0] sm:$0xff]  ;;  %v21_v33 = vld [vmem:[%s638_s0 + $0x8] sm:$0xff] }
   0xe   :  { %457 = vmatprep.subr.bf16.mxu1 %v486_v13  ;;  %v392_v34 = vcombine.low %v20_v32, %v20_v32  ;;  %v393_v35 = vcombine.high %v20_v32, %v20_v32  ;;  %v394_v36 = vcombine.low %v21_v33, %v21_v33  ;;  %v395_v37 = vcombine.high %v21_v33, %v21_v33  ;;  %v428_v44 = vld [vmem:[%s639_s2] ss:$0 sm:$0xff] }
  0x10   :  { %436 = vmatpush3.bf16.msra.mxu0 %v487_v14  ;;  %325 = vmatprep.mubr.bf16.mxu0 %v393_v35 }
  0x11   :  { %458 = vmatpush3.bf16.msra.mxu1 %v488_v15  ;;  %437 = vmatprep.subr.bf16.mxu0 %v489_v16 }
  0x12   :  { %459 = vmatprep.subr.bf16.mxu1 %v490_v17  ;;  %365 = vmatprep.mubr.bf16.mxu1 %v395_v37 }
  0x14   :  { %438 = vmatpush3.bf16.msra.mxu0 %v491_v18 }
  0x15   :  { %460 = vmatpush3.bf16.msra.mxu1 %v492_v19  ;;  %439 = vmatprep.subr.bf16.mxu0 %v493_v20 }
  0x16   :  { %461 = vmatprep.subr.bf16.mxu1 %v494_v21 }
  0x18   :  { %440 = vmatpush3.bf16.msra.mxu0 %v495_v22 }
  0x19   :  { %462 = vmatpush3.bf16.msra.mxu1 %v496_v23  ;;  %441 = vmatprep.subr.bf16.mxu0 %v497_v24 }
  0x1a   :  { %463 = vmatprep.subr.bf16.mxu1 %v498_v25 }
  0x1c   :  { %442 = vmatpush3.bf16.msra.mxu0 %v499_v26 }
  0x1d   :  { %464 = vmatpush3.bf16.msra.mxu1 %v500_v27  ;;  %443 = vmatprep.subr.bf16.mxu0 %v501_v28 }
  0x1e   :  { %465 = vmatprep.subr.bf16.mxu1 %v502_v29 }
  0x20   :  { %444 = vmatpush3.bf16.msra.mxu0 %v503_v30 }
  0x21   :  { %466 = vmatpush3.bf16.msra.mxu1 %v504_v31 }
  0x23   :  { %326 = vmatmul.mubr.bf16.vlgmr.msra.gmra.mxu0 %v392_v34 }
  0x24   :  { %366 = vmatmul.mubr.bf16.vlgmr.msra.gmra.mxu1 %v394_v36 }
  0xe3   :  { %v445_v38 = vpop.f32.mrf.mxu0 }
  0xe4   :  { %v467_v39 = vpop.f32.mrf.mxu1 }
  0xe5   :  { %v446_v40 = vpop.f32.mrf.mxu0 }
  0xe6   :  { %v468_v41 = vpop.f32.mrf.mxu1  ;;  %v447_v42 = vadd.f32 %v446_v40, %v445_v38 }
  0xe7   :  { %v469_v43 = vadd.f32 %v468_v41, %v467_v39  ;;  %v448_v45 = vpop.f32.mrf.mxu0 }
  0xe8   :  { %v470_v46 = vpop.f32.mrf.mxu1 }
  0xe9   :  { %v368_v47 = vadd.f32 %v469_v43, %v447_v42  ;;  %v449_v48 = vpop.f32.mrf.mxu0 }
  0xea   :  { %v471_v49 = vpop.f32.mrf.mxu1 }
  0xeb   :  { %v386_v50 = vadd.f32 %v428_v44, %v368_v47 }
  0xed   :  { %387 = vst [vmem:[%s640_s3] sm:$0xff] %v386_v50 }

// kernel: unet_generator2.41
= control target key start
LH: loop header
LB: loop body
LE: loop exit
PB: predicated region body
PF: predicated region fallthrough
CT: control target
= control target key end

     0   :  { %s1207_s1 = inlined_call_operand.vmem [shape: bf16[1,1024,128], index: 1, kind: input, shape index: {}]   ;;  %s1208_s0 = inlined_call_operand.vmem [shape: bf16[1,8,1024], index: 0, kind: input, shape index: {}]   ;;  %s1209_s2 = inlined_call_operand.vmem [shape: f32[1,128], index: 2, kind: input, shape index: {}]   ;;  %s1210_s3 = inlined_call_operand.vmem [shape: f32[1,8,128], index: 3, kind: output, shape index: {}]  }
   0x1   :  { %v905_v0 = vld [vmem:[%s1207_s1 + $0x78] sm:$0xff]   ;;  %v909_v4 = vld [vmem:[%s1207_s1 + $0x70] sm:$0xff]   ;;  %v913_v8 = vld [vmem:[%s1207_s1 + $0x68] sm:$0xff]  }
   0x2   :  { %v906_v1 = vld [vmem:[%s1207_s1 + $0xf8] sm:$0xff]   ;;  %817 = vmatprep.subr.bf16.mxu0 %v905_v0  ;;  %v910_v5 = vld [vmem:[%s1207_s1 + $0xf0] sm:$0xff]   ;;  %v914_v9 = vld [vmem:[%s1207_s1 + $0xe8] sm:$0xff]  }
   0x3   :  { %v907_v2 = vld [vmem:[%s1207_s1 + $0x38] sm:$0xff]   ;;  %839 = vmatprep.subr.bf16.mxu1 %v906_v1  ;;  %v911_v6 = vld [vmem:[%s1207_s1 + $0x30] sm:$0xff]   ;;  %v915_v10 = vld [vmem:[%s1207_s1 + $0x28] sm:$0xff]  }
   0x4   :  { %v908_v3 = vld [vmem:[%s1207_s1 + $0xb8] sm:$0xff]   ;;  %818 = vmatpush3.bf16.msra.mxu0 %v907_v2  ;;  %v912_v7 = vld [vmem:[%s1207_s1 + $0xb0] sm:$0xff]   ;;  %v916_v11 = vld [vmem:[%s1207_s1 + $0xa8] sm:$0xff]  }
   0x5   :  { %840 = vmatpush3.bf16.msra.mxu1 %v908_v3  ;;  %819 = vmatprep.subr.bf16.mxu0 %v909_v4  ;;  %v917_v12 = vld [vmem:[%s1207_s1 + $0x60] sm:$0xff]   ;;  %v921_v16 = vld [vmem:[%s1207_s1 + $0x58] sm:$0xff]   ;;  %v925_v20 = vld [vmem:[%s1207_s1 + $0x50] sm:$0xff]  }
   0x6   :  { %841 = vmatprep.subr.bf16.mxu1 %v910_v5  ;;  %v918_v13 = vld [vmem:[%s1207_s1 + $0xe0] sm:$0xff]   ;;  %v922_v17 = vld [vmem:[%s1207_s1 + $0xd8] sm:$0xff]   ;;  %v926_v21 = vld [vmem:[%s1207_s1 + $0xd0] sm:$0xff]  }
   0x7   :  { %v919_v14 = vld [vmem:[%s1207_s1 + $0x20] sm:$0xff]   ;;  %v923_v18 = vld [vmem:[%s1207_s1 + $0x18] sm:$0xff]   ;;  %v927_v22 = vld [vmem:[%s1207_s1 + $0x10] sm:$0xff]  }
   0x8   :  { %820 = vmatpush3.bf16.msra.mxu0 %v911_v6  ;;  %v920_v15 = vld [vmem:[%s1207_s1 + $0xa0] sm:$0xff]   ;;  %v924_v19 = vld [vmem:[%s1207_s1 + $0x98] sm:$0xff]   ;;  %v928_v23 = vld [vmem:[%s1207_s1 + $0x90] sm:$0xff]  }
   0x9   :  { %842 = vmatpush3.bf16.msra.mxu1 %v912_v7  ;;  %821 = vmatprep.subr.bf16.mxu0 %v913_v8  ;;  %v929_v24 = vld [vmem:[%s1207_s1 + $0x48] sm:$0xff]   ;;  %v933_v28 = vld [vmem:[%s1207_s1 + $0x40] sm:$0xff]   ;;  %v941_v38 = vld [vmem:[%s1207_s1 + $0x178] sm:$0xff]  }
   0xa   :  { %843 = vmatprep.subr.bf16.mxu1 %v914_v9  ;;  %v930_v25 = vld [vmem:[%s1207_s1 + $0xc8] sm:$0xff]   ;;  %v934_v29 = vld [vmem:[%s1207_s1 + $0xc0] sm:$0xff]   ;;  %v942_v39 = vld [vmem:[%s1207_s1 + $0x1f8] sm:$0xff]  }
   0xb   :  { %v931_v26 = vld [vmem:[%s1207_s1 + $0x8] sm:$0xff]   ;;  %v935_v30 = vld [vmem:[%s1207_s1] sm:$0xff]   ;;  %v943_v40 = vld [vmem:[%s1207_s1 + $0x138] sm:$0xff]  }
   0xc   :  { %822 = vmatpush3.bf16.msra.mxu0 %v915_v10  ;;  %v932_v27 = vld [vmem:[%s1207_s1 + $0x88] sm:$0xff]   ;;  %v936_v31 = vld [vmem:[%s1207_s1 + $0x80] sm:$0xff]   ;;  %v944_v41 = vld [vmem:[%s1207_s1 + $0x1b8] sm:$0xff]  }
   0xd   :  { %844 = vmatpush3.bf16.msra.mxu1 %v916_v11  ;;  %823 = vmatprep.subr.bf16.mxu0 %v917_v12  ;;  %v20_v32 = vld [vmem:[%s1208_s0] sm:$0xff]  ;;  %v21_v33 = vld [vmem:[%s1208_s0 + $0x8] sm:$0xff]  ;;  %v945_v42 = vld [vmem:[%s1207_s1 + $0x170] sm:$0xff]  }
   0xe   :  { %845 = vmatprep.subr.bf16.mxu1 %v918_v13  ;;  %v744_v34 = vcombine.low %v20_v32, %v20_v32  ;;  %v745_v35 = vcombine.high %v20_v32, %v20_v32  ;;  %v746_v36 = vcombine.low %v21_v33, %v21_v33  ;;  %v747_v37 = vcombine.high %v21_v33, %v21_v33  ;;  %v946_v43 = vld [vmem:[%s1207_s1 + $0x1f0] sm:$0xff]   ;;  %v949_v46 = vld [vmem:[%s1207_s1 + $0x168] sm:$0xff]   ;;  %v953_v50 = vld [vmem:[%s1207_s1 + $0x160] sm:$0xff]  }
   0xf   :  { %v947_v44 = vld [vmem:[%s1207_s1 + $0x130] sm:$0xff]   ;;  %v950_v47 = vld [vmem:[%s1207_s1 + $0x1e8] sm:$0xff]   ;;  %v954_v51 = vld [vmem:[%s1207_s1 + $0x1e0] sm:$0xff]  }
  0x10   :  { %824 = vmatpush3.bf16.msra.mxu0 %v919_v14  ;;  %597 = vmatprep.mubr.bf16.mxu0 %v745_v35  ;;  %v948_v45 = vld [vmem:[%s1207_s1 + $0x1b0] sm:$0xff]   ;;  %v951_v48 = vld [vmem:[%s1207_s1 + $0x128] sm:$0xff]   ;;  %v955_v52 = vld [vmem:[%s1207_s1 + $0x120] sm:$0xff]  }
  0x11   :  { %846 = vmatpush3.bf16.msra.mxu1 %v920_v15  ;;  %825 = vmatprep.subr.bf16.mxu0 %v921_v16  ;;  %v952_v49 = vld [vmem:[%s1207_s1 + $0x1a8] sm:$0xff]   ;;  %v956_v53 = vld [vmem:[%s1207_s1 + $0x1a0] sm:$0xff]   ;;  %v957_v54 = vld [vmem:[%s1207_s1 + $0x158] sm:$0xff]  }
  0x12   :  { %847 = vmatprep.subr.bf16.mxu1 %v922_v17  ;;  %637 = vmatprep.mubr.bf16.mxu1 %v747_v37  ;;  %v958_v55 = vld [vmem:[%s1207_s1 + $0x1d8] sm:$0xff]   ;;  %v961_v58 = vld [vmem:[%s1207_s1 + $0x150] sm:$0xff]   ;;  %v965_v62 = vld [vmem:[%s1207_s1 + $0x148] sm:$0xff]  }
  0x13   :  { %v959_v56 = vld [vmem:[%s1207_s1 + $0x118] sm:$0xff]   ;;  %v962_v59 = vld [vmem:[%s1207_s1 + $0x1d0] sm:$0xff]   ;;  %v966_v63 = vld [vmem:[%s1207_s1 + $0x1c8] sm:$0xff]  }
  0x14   :  { %826 = vmatpush3.bf16.msra.mxu0 %v923_v18  ;;  %v960_v57 = vld [vmem:[%s1207_s1 + $0x198] sm:$0xff]   ;;  %v963_v60 = vld [vmem:[%s1207_s1 + $0x110] sm:$0xff]   ;;  %v967_v0 = vld [vmem:[%s1207_s1 + $0x108] sm:$0xff]  }
  0x15   :  { %848 = vmatpush3.bf16.msra.mxu1 %v924_v19  ;;  %827 = vmatprep.subr.bf16.mxu0 %v925_v20  ;;  %v964_v61 = vld [vmem:[%s1207_s1 + $0x190] sm:$0xff]   ;;  %v968_v1 = vld [vmem:[%s1207_s1 + $0x188] sm:$0xff]   ;;  %v969_v2 = vld [vmem:[%s1207_s1 + $0x140] sm:$0xff]  }
  0x16   :  { %849 = vmatprep.subr.bf16.mxu1 %v926_v21  ;;  %v970_v3 = vld [vmem:[%s1207_s1 + $0x1c0] sm:$0xff]   ;;  %v22_v6 = vld [vmem:[%s1208_s0 + $0x10] sm:$0xff]  ;;  %v23_v9 = vld [vmem:[%s1208_s0 + $0x18] sm:$0xff] }
  0x17   :  { %v971_v4 = vld [vmem:[%s1207_s1 + $0x100] sm:$0xff]   ;;  %v748_v7 = vcombine.low %v22_v6, %v22_v6  ;;  %v749_v8 = vcombine.high %v22_v6, %v22_v6  ;;  %v750_v10 = vcombine.low %v23_v9, %v23_v9  ;;  %v751_v11 = vcombine.high %v23_v9, %v23_v9 }
  0x18   :  { %828 = vmatpush3.bf16.msra.mxu0 %v927_v22  ;;  %v972_v5 = vld [vmem:[%s1207_s1 + $0x180] sm:$0xff]  }
  0x19   :  { %850 = vmatpush3.bf16.msra.mxu1 %v928_v23  ;;  %829 = vmatprep.subr.bf16.mxu0 %v929_v24  ;;  %v816_v32 = vld [vmem:[%s1209_s2] ss:$0 sm:$0xff] }
  0x1a   :  { %851 = vmatprep.subr.bf16.mxu1 %v930_v25 }
  0x1c   :  { %830 = vmatpush3.bf16.msra.mxu0 %v931_v26 }
  0x1d   :  { %852 = vmatpush3.bf16.msra.mxu1 %v932_v27  ;;  %831 = vmatprep.subr.bf16.mxu0 %v933_v28 }
  0x1e   :  { %853 = vmatprep.subr.bf16.mxu1 %v934_v29 }
  0x20   :  { %832 = vmatpush3.bf16.msra.mxu0 %v935_v30 }
  0x21   :  { %854 = vmatpush3.bf16.msra.mxu1 %v936_v31  ;;  %861 = vmatprep.subr.bf16.mxu0 %v941_v38 }
  0x22   :  { %883 = vmatprep.subr.bf16.mxu1 %v942_v39 }
  0x23   :  { %598 = vmatmul.mubr.bf16.vlgmr.msra.gmra.mxu0 %v744_v34 }
  0x24   :  { %638 = vmatmul.mubr.bf16.vlgmr.msra.gmra.mxu1 %v746_v36  ;;  %862 = vmatpush3.bf16.msra.mxu0 %v943_v40 }
  0x25   :  { %884 = vmatpush3.bf16.msra.mxu1 %v944_v41  ;;  %863 = vmatprep.subr.bf16.mxu0 %v945_v42 }
  0x26   :  { %885 = vmatprep.subr.bf16.mxu1 %v946_v43  ;;  %677 = vmatprep.mubr.bf16.mxu0 %v749_v8 }
  0x27   :  { %717 = vmatprep.mubr.bf16.mxu1 %v751_v11 }
  0x28   :  { %864 = vmatpush3.bf16.msra.mxu0 %v947_v44 }
  0x29   :  { %886 = vmatpush3.bf16.msra.mxu1 %v948_v45  ;;  %865 = vmatprep.subr.bf16.mxu0 %v949_v46 }
  0x2a   :  { %887 = vmatprep.subr.bf16.mxu1 %v950_v47 }
  0x2c   :  { %866 = vmatpush3.bf16.msra.mxu0 %v951_v48 }
  0x2d   :  { %888 = vmatpush3.bf16.msra.mxu1 %v952_v49  ;;  %867 = vmatprep.subr.bf16.mxu0 %v953_v50 }
  0x2e   :  { %889 = vmatprep.subr.bf16.mxu1 %v954_v51 }
  0x30   :  { %868 = vmatpush3.bf16.msra.mxu0 %v955_v52 }
  0x31   :  { %890 = vmatpush3.bf16.msra.mxu1 %v956_v53  ;;  %869 = vmatprep.subr.bf16.mxu0 %v957_v54 }
  0x32   :  { %891 = vmatprep.subr.bf16.mxu1 %v958_v55 }
  0x34   :  { %870 = vmatpush3.bf16.msra.mxu0 %v959_v56 }
  0x35   :  { %892 = vmatpush3.bf16.msra.mxu1 %v960_v57  ;;  %871 = vmatprep.subr.bf16.mxu0 %v961_v58 }
  0x36   :  { %893 = vmatprep.subr.bf16.mxu1 %v962_v59 }
  0x38   :  { %872 = vmatpush3.bf16.msra.mxu0 %v963_v60 }
  0x39   :  { %894 = vmatpush3.bf16.msra.mxu1 %v964_v61  ;;  %873 = vmatprep.subr.bf16.mxu0 %v965_v62 }
  0x3a   :  { %895 = vmatprep.subr.bf16.mxu1 %v966_v63 }
  0x3c   :  { %874 = vmatpush3.bf16.msra.mxu0 %v967_v0 }
  0x3d   :  { %896 = vmatpush3.bf16.msra.mxu1 %v968_v1  ;;  %875 = vmatprep.subr.bf16.mxu0 %v969_v2 }
  0x3e   :  { %897 = vmatprep.subr.bf16.mxu1 %v970_v3 }
  0x40   :  { %876 = vmatpush3.bf16.msra.mxu0 %v971_v4 }
  0x41   :  { %898 = vmatpush3.bf16.msra.mxu1 %v972_v5 }
  0x43   :  { %678 = vmatmul.mubr.bf16.vlgmr.msra.gmra.mxu0 %v748_v7 }
  0x44   :  { %718 = vmatmul.mubr.bf16.vlgmr.msra.gmra.mxu1 %v750_v10 }
  0xe3   :  { %v833_v12 = vpop.f32.mrf.mxu0 }
  0xe4   :  { %v855_v13 = vpop.f32.mrf.mxu1 }
  0xe5   :  { %v834_v14 = vpop.f32.mrf.mxu0 }
  0xe6   :  { %v856_v15 = vpop.f32.mrf.mxu1  ;;  %v835_v20 = vadd.f32 %v834_v14, %v833_v12 }
  0xe7   :  { %v836_v16 = vpop.f32.mrf.mxu0  ;;  %v857_v21 = vadd.f32 %v856_v15, %v855_v13 }
  0xe8   :  { %v858_v17 = vpop.f32.mrf.mxu1 }
  0xe9   :  { %v837_v18 = vpop.f32.mrf.mxu0  ;;  %v640_v26 = vadd.f32 %v857_v21, %v835_v20 }
  0xea   :  { %v859_v19 = vpop.f32.mrf.mxu1 }
 0x103   :  { %v877_v22 = vpop.f32.mrf.mxu0 }
 0x104   :  { %v899_v23 = vpop.f32.mrf.mxu1 }
 0x105   :  { %v878_v24 = vpop.f32.mrf.mxu0 }
 0x106   :  { %v900_v25 = vpop.f32.mrf.mxu1  ;;  %v879_v27 = vadd.f32 %v878_v24, %v877_v22 }
 0x107   :  { %v880_v28 = vpop.f32.mrf.mxu0  ;;  %v901_v31 = vadd.f32 %v900_v25, %v899_v23 }
 0x108   :  { %v902_v29 = vpop.f32.mrf.mxu1  ;;  %v680_v30 = vadd.f32 %v879_v27, %v640_v26 }
 0x109   :  { %v881_v33 = vpop.f32.mrf.mxu0 }
 0x10a   :  { %v903_v34 = vpop.f32.mrf.mxu1  ;;  %v720_v35 = vadd.f32 %v901_v31, %v680_v30 }
 0x10c   :  { %v738_v36 = vadd.f32 %v816_v32, %v720_v35 }
 0x10e   :  { %739 = vst [vmem:[%s1210_s3] sm:$0xff] %v738_v36 }

// kernel: unet_generator2.42
= control target key start
LH: loop header
LB: loop body
LE: loop exit
PB: predicated region body
PF: predicated region fallthrough
CT: control target
= control target key end

     0   :  { %s775_s12 = smov 0   ;;  %s777_s13 = smov 0   ;;  %s840_s0 = inlined_call_operand.vmem [shape: bf16[4,8,256], index: 0, kind: input, shape index: {}]   ;;  %s841_s1 = inlined_call_operand.vmem [shape: bf16[4,256,128], index: 1, kind: input, shape index: {}]   ;;  %s842_s2 = inlined_call_operand.vmem [shape: f32[1,128], index: 2, kind: input, shape index: {}]   ;;  %s843_s3 = inlined_call_operand.vmem [shape: f32[4,8,128], index: 3, kind: output, shape index: {}]  }
   0x1   :  { %s779_s14 = smov 0  }
   0x2 LB: > { %s39_s15 = sadd.s32 1, %s749_s13  ;;  %p638_p0 = scmp.ge.s32.totalorder %s753_s14, 1  ;;  %s753_s14 = sphi %s779_s14, %s13_s14   ;;  %s749_s13 = sphi %s777_s13, %s845_s13   ;;  %s745_s12 = sphi %s775_s12, %s844_s12  }
   0x3   : > { %p41_p1 = scmp.ge.s32.totalorder %s39_s15, 4  ;;  %p210_p2 = scmp.lt.s32.totalorder %s753_s14, 5 }
   0x5   : > { %s847_s15 = smov (%p41_p1, %s39_s15), 0  ;;  %p211_p3 = pnand %p638_p0, %p210_p2 }
   0x6   : > { %p263_p4 = scmp.lt.s32.totalorder (!%p211_p3), %s745_s12, 3 }
   0x7   : > { %214 = sbr.rel (%p211_p3) target bundleno = 248 (0xf8), region = 32 }
   0xc   : > { %s849_s12 = smov (!%p263_p4, %s745_s12), 3  ;;  %v662_v21 = vld [vmem:[%s842_s2] ss:$0 sm:$0xff] }
   0xd   : > { %s666_s16 = sshll.u32 %s849_s12, 7  ;;  %s665_s20 = sshll.u32 %s849_s12, 3 }
   0xe   : > { %s799_s19 = scalar_lea.vmem %s841_s1, %s666_s16  ;;  %s274_s23 = scalar_lea.vmem %s840_s0, %s665_s20 }
   0xf   : > { %v713_v0 = vld [vmem:[%s799_s19 + $0x78] sm:$0xff]   ;;  %v715_v2 = vld [vmem:[%s799_s19 + $0x70] sm:$0xff]   ;;  %v717_v4 = vld [vmem:[%s799_s19 + $0x68] sm:$0xff]   ;;  %s301_s28 = scalar_lea.vmem %s843_s3, %s665_s20 }
  0x10   : > { %v714_v1 = vld [vmem:[%s799_s19 + $0x38] sm:$0xff]   ;;  %667 = vmatprep.subr.bf16.mxu0 %v713_v0  ;;  %v716_v3 = vld [vmem:[%s799_s19 + $0x30] sm:$0xff]   ;;  %v718_v5 = vld [vmem:[%s799_s19 + $0x28] sm:$0xff]  }
  0x11   : > { %668 = vmatpush3.bf16.msra.mxu0 %v714_v1  ;;  %v719_v6 = vld [vmem:[%s799_s19 + $0x60] sm:$0xff]   ;;  %v721_v8 = vld [vmem:[%s799_s19 + $0x58] sm:$0xff]   ;;  %v723_v10 = vld [vmem:[%s799_s19 + $0x50] sm:$0xff]  }
  0x12   : > { %669 = vmatprep.subr.bf16.mxu0 %v715_v2  ;;  %v720_v7 = vld [vmem:[%s799_s19 + $0x20] sm:$0xff]   ;;  %v722_v9 = vld [vmem:[%s799_s19 + $0x18] sm:$0xff]   ;;  %v724_v13 = vld [vmem:[%s799_s19 + $0x10] sm:$0xff]  }
  0x13   : > { %v308_v11 = vld [vmem:[%s274_s23] sm:$0xff]  ;;  %v725_v14 = vld [vmem:[%s799_s19 + $0x48] sm:$0xff]  }
  0x14   : > { %v645_v12 = vcombine.high %v308_v11, %v308_v11  ;;  %v726_v15 = vld [vmem:[%s799_s19 + $0x8] sm:$0xff]   ;;  %v727_v16 = vld [vmem:[%s799_s19 + $0x40] sm:$0xff]   ;;  %v644_v18 = vcombine.low %v308_v11, %v308_v11 }
  0x15   : > { %670 = vmatpush3.bf16.msra.mxu0 %v716_v3  ;;  %v728_v17 = vld [vmem:[%s799_s19] sm:$0xff]  }
  0x16   : > { %671 = vmatprep.subr.bf16.mxu0 %v717_v4  ;;  %477 = vmatprep.mubr.bf16.mxu0 %v645_v12 }
  0x19   : > { %672 = vmatpush3.bf16.msra.mxu0 %v718_v5 }
  0x1a   : > { %673 = vmatprep.subr.bf16.mxu0 %v719_v6 }
  0x1d   : > { %674 = vmatpush3.bf16.msra.mxu0 %v720_v7 }
  0x1e   : > { %675 = vmatprep.subr.bf16.mxu0 %v721_v8 }
  0x21   : > { %676 = vmatpush3.bf16.msra.mxu0 %v722_v9 }
  0x22   : > { %677 = vmatprep.subr.bf16.mxu0 %v723_v10 }
  0x25   : > { %678 = vmatpush3.bf16.msra.mxu0 %v724_v13 }
  0x26   : > { %679 = vmatprep.subr.bf16.mxu0 %v725_v14 }
  0x29   : > { %680 = vmatpush3.bf16.msra.mxu0 %v726_v15 }
  0x2a   : > { %681 = vmatprep.subr.bf16.mxu0 %v727_v16 }
  0x2d   : > { %682 = vmatpush3.bf16.msra.mxu0 %v728_v17 }
  0x30   : > { %478 = vmatmul.mubr.bf16.vlgmr.msra.gmra.mxu0 %v644_v18 }
  0xf0   : > { %v683_v19 = vpop.f32.mrf.mxu0 }
  0xf2   : > { %v684_v20 = vpop.f32.mrf.mxu0 }
  0xf3   : > { %v685_v22 = vadd.f32 %v684_v20, %v683_v19 }
  0xf4   : > { %v686_v23 = vpop.f32.mrf.mxu0 }
  0xf5   : > { %v498_v24 = vadd.f32 %v685_v22, %v662_v21 }
  0xf6   : > { %v687_v25 = vpop.f32.mrf.mxu0 }
  0xf7   : > { %499 = vst [vmem:[%s301_s28] sm:$0xff] %v498_v24 }
  0xf8 PF: > { %s13_s14 = sadd.s32 1, %s753_s14   ;;  %s844_s12 = smov %s749_s13 }
  0xf9   : > { %p10_p5 = scmp.ge.s32.totalorder %s13_s14, 6   ;;  %s845_s13 = smov %s847_s15 }
  0xfb   :  { %12 = sbr.rel (!%p10_p5) target bundleno = 2 (0x2), region = 76 }

// kernel: unet_generator2.44
= control target key start
LH: loop header
LB: loop body
LE: loop exit
PB: predicated region body
PF: predicated region fallthrough
CT: control target
= control target key end

     0   :  { %s1009_s12 = smov 0   ;;  %s1011_s13 = smov 0   ;;  %s1087_s0 = inlined_call_operand.vmem [shape: bf16[4,8,512], index: 0, kind: input, shape index: {}]   ;;  %s1088_s1 = inlined_call_operand.vmem [shape: bf16[4,512,128], index: 1, kind: input, shape index: {}]   ;;  %s1089_s2 = inlined_call_operand.vmem [shape: f32[1,128], index: 2, kind: input, shape index: {}]   ;;  %s1090_s3 = inlined_call_operand.vmem [shape: f32[4,8,128], index: 3, kind: output, shape index: {}]  }
   0x1   :  { %s1013_s14 = smov 0  }
   0x2 LB: > { %s39_s15 = sadd.s32 1, %s983_s13  ;;  %p814_p0 = scmp.ge.s32.totalorder %s987_s14, 1  ;;  %s987_s14 = sphi %s1013_s14, %s13_s14   ;;  %s983_s13 = sphi %s1011_s13, %s1092_s13   ;;  %s979_s12 = sphi %s1009_s12, %s1091_s12  }
   0x3   : > { %p41_p1 = scmp.ge.s32.totalorder %s39_s15, 4  ;;  %p210_p2 = scmp.lt.s32.totalorder %s987_s14, 5 }
   0x5   : > { %s1094_s15 = smov (%p41_p1, %s39_s15), 0  ;;  %p211_p3 = pnand %p814_p0, %p210_p2 }
   0x6   : > { %p263_p4 = scmp.lt.s32.totalorder (!%p211_p3), %s979_s12, 3 }
   0x7   : > { %214 = sbr.rel (%p211_p3) target bundleno = 252 (0xfc), region = 32 }
   0xc   : > { %s1096_s12 = smov (!%p263_p4, %s979_s12), 3  ;;  %v856_v44 = vld [vmem:[%s1089_s2] ss:$0 sm:$0xff] }
   0xd   : > { %s860_s16 = sshll.u32 %s1096_s12, 8  ;;  %s859_s20 = sshll.u32 %s1096_s12, 4 }
   0xe   : > { %s1033_s19 = scalar_lea.vmem %s1088_s1, %s860_s16  ;;  %s274_s23 = scalar_lea.vmem %s1087_s0, %s859_s20 }
   0xf   : > { %v929_v0 = vld [vmem:[%s1033_s19 + $0x78] sm:$0xff]   ;;  %v933_v4 = vld [vmem:[%s1033_s19 + $0x70] sm:$0xff]   ;;  %v937_v8 = vld [vmem:[%s1033_s19 + $0x68] sm:$0xff]   ;;  %s819_s24 = sshll.u32 %s1096_s12, 3 }
  0x10   : > { %v930_v1 = vld [vmem:[%s1033_s19 + $0xf8] sm:$0xff]   ;;  %861 = vmatprep.subr.bf16.mxu0 %v929_v0  ;;  %v934_v5 = vld [vmem:[%s1033_s19 + $0xf0] sm:$0xff]   ;;  %v938_v9 = vld [vmem:[%s1033_s19 + $0xe8] sm:$0xff]   ;;  %s301_s29 = scalar_lea.vmem %s1090_s3, %s819_s24 }
  0x11   : > { %v931_v2 = vld [vmem:[%s1033_s19 + $0x38] sm:$0xff]   ;;  %883 = vmatprep.subr.bf16.mxu1 %v930_v1  ;;  %v935_v6 = vld [vmem:[%s1033_s19 + $0x30] sm:$0xff]   ;;  %v939_v10 = vld [vmem:[%s1033_s19 + $0x28] sm:$0xff]  }
  0x12   : > { %v932_v3 = vld [vmem:[%s1033_s19 + $0xb8] sm:$0xff]   ;;  %862 = vmatpush3.bf16.msra.mxu0 %v931_v2  ;;  %v936_v7 = vld [vmem:[%s1033_s19 + $0xb0] sm:$0xff]   ;;  %v940_v11 = vld [vmem:[%s1033_s19 + $0xa8] sm:$0xff]  }
  0x13   : > { %884 = vmatpush3.bf16.msra.mxu1 %v932_v3  ;;  %863 = vmatprep.subr.bf16.mxu0 %v933_v4  ;;  %v941_v12 = vld [vmem:[%s1033_s19 + $0x60] sm:$0xff]   ;;  %v945_v16 = vld [vmem:[%s1033_s19 + $0x58] sm:$0xff]   ;;  %v949_v20 = vld [vmem:[%s1033_s19 + $0x50] sm:$0xff]  }
  0x14   : > { %885 = vmatprep.subr.bf16.mxu1 %v934_v5  ;;  %v942_v13 = vld [vmem:[%s1033_s19 + $0xe0] sm:$0xff]   ;;  %v946_v17 = vld [vmem:[%s1033_s19 + $0xd8] sm:$0xff]   ;;  %v950_v21 = vld [vmem:[%s1033_s19 + $0xd0] sm:$0xff]  }
  0x15   : > { %v943_v14 = vld [vmem:[%s1033_s19 + $0x20] sm:$0xff]   ;;  %v947_v18 = vld [vmem:[%s1033_s19 + $0x18] sm:$0xff]   ;;  %v951_v22 = vld [vmem:[%s1033_s19 + $0x10] sm:$0xff]  }
  0x16   : > { %864 = vmatpush3.bf16.msra.mxu0 %v935_v6  ;;  %v944_v15 = vld [vmem:[%s1033_s19 + $0xa0] sm:$0xff]   ;;  %v948_v19 = vld [vmem:[%s1033_s19 + $0x98] sm:$0xff]   ;;  %v952_v23 = vld [vmem:[%s1033_s19 + $0x90] sm:$0xff]  }
  0x17   : > { %886 = vmatpush3.bf16.msra.mxu1 %v936_v7  ;;  %865 = vmatprep.subr.bf16.mxu0 %v937_v8  ;;  %v953_v24 = vld [vmem:[%s1033_s19 + $0x48] sm:$0xff]   ;;  %v957_v28 = vld [vmem:[%s1033_s19 + $0x40] sm:$0xff]  }
  0x18   : > { %887 = vmatprep.subr.bf16.mxu1 %v938_v9  ;;  %v954_v25 = vld [vmem:[%s1033_s19 + $0xc8] sm:$0xff]   ;;  %v958_v29 = vld [vmem:[%s1033_s19 + $0xc0] sm:$0xff]  }
  0x19   : > { %v955_v26 = vld [vmem:[%s1033_s19 + $0x8] sm:$0xff]   ;;  %v959_v30 = vld [vmem:[%s1033_s19] sm:$0xff]  }
  0x1a   : > { %866 = vmatpush3.bf16.msra.mxu0 %v939_v10  ;;  %v956_v27 = vld [vmem:[%s1033_s19 + $0x88] sm:$0xff]   ;;  %v960_v31 = vld [vmem:[%s1033_s19 + $0x80] sm:$0xff]  }
  0x1b   : > { %888 = vmatpush3.bf16.msra.mxu1 %v940_v11  ;;  %867 = vmatprep.subr.bf16.mxu0 %v941_v12  ;;  %v308_v32 = vld [vmem:[%s274_s23] sm:$0xff]  ;;  %v309_v33 = vld [vmem:[%s274_s23 + $0x8] sm:$0xff] }
  0x1c   : > { %889 = vmatprep.subr.bf16.mxu1 %v942_v13  ;;  %v820_v34 = vcombine.low %v308_v32, %v308_v32  ;;  %v821_v35 = vcombine.high %v308_v32, %v308_v32  ;;  %v822_v36 = vcombine.low %v309_v33, %v309_v33  ;;  %v823_v37 = vcombine.high %v309_v33, %v309_v33 }
  0x1e   : > { %868 = vmatpush3.bf16.msra.mxu0 %v943_v14  ;;  %613 = vmatprep.mubr.bf16.mxu0 %v821_v35 }
  0x1f   : > { %890 = vmatpush3.bf16.msra.mxu1 %v944_v15  ;;  %869 = vmatprep.subr.bf16.mxu0 %v945_v16 }
  0x20   : > { %891 = vmatprep.subr.bf16.mxu1 %v946_v17  ;;  %653 = vmatprep.mubr.bf16.mxu1 %v823_v37 }
  0x22   : > { %870 = vmatpush3.bf16.msra.mxu0 %v947_v18 }
  0x23   : > { %892 = vmatpush3.bf16.msra.mxu1 %v948_v19  ;;  %871 = vmatprep.subr.bf16.mxu0 %v949_v20 }
  0x24   : > { %893 = vmatprep.subr.bf16.mxu1 %v950_v21 }
  0x26   : > { %872 = vmatpush3.bf16.msra.mxu0 %v951_v22 }
  0x27   : > { %894 = vmatpush3.bf16.msra.mxu1 %v952_v23  ;;  %873 = vmatprep.subr.bf16.mxu0 %v953_v24 }
  0x28   : > { %895 = vmatprep.subr.bf16.mxu1 %v954_v25 }
  0x2a   : > { %874 = vmatpush3.bf16.msra.mxu0 %v955_v26 }
  0x2b   : > { %896 = vmatpush3.bf16.msra.mxu1 %v956_v27  ;;  %875 = vmatprep.subr.bf16.mxu0 %v957_v28 }
  0x2c   : > { %897 = vmatprep.subr.bf16.mxu1 %v958_v29 }
  0x2e   : > { %876 = vmatpush3.bf16.msra.mxu0 %v959_v30 }
  0x2f   : > { %898 = vmatpush3.bf16.msra.mxu1 %v960_v31 }
  0x31   : > { %614 = vmatmul.mubr.bf16.vlgmr.msra.gmra.mxu0 %v820_v34 }
  0x32   : > { %654 = vmatmul.mubr.bf16.vlgmr.msra.gmra.mxu1 %v822_v36 }
  0xf1   : > { %v877_v38 = vpop.f32.mrf.mxu0 }
  0xf2   : > { %v899_v39 = vpop.f32.mrf.mxu1 }
  0xf3   : > { %v878_v40 = vpop.f32.mrf.mxu0 }
  0xf4   : > { %v900_v41 = vpop.f32.mrf.mxu1  ;;  %v879_v42 = vadd.f32 %v878_v40, %v877_v38 }
  0xf5   : > { %v901_v43 = vadd.f32 %v900_v41, %v899_v39  ;;  %v880_v45 = vpop.f32.mrf.mxu0 }
  0xf6   : > { %v902_v46 = vpop.f32.mrf.mxu1 }
  0xf7   : > { %v656_v47 = vadd.f32 %v901_v43, %v879_v42  ;;  %v881_v48 = vpop.f32.mrf.mxu0 }
  0xf8   : > { %v903_v49 = vpop.f32.mrf.mxu1 }
  0xf9   : > { %v674_v50 = vadd.f32 %v856_v44, %v656_v47 }
  0xfb   : > { %675 = vst [vmem:[%s301_s29] sm:$0xff] %v674_v50 }
  0xfc PF: > { %s13_s14 = sadd.s32 1, %s987_s14   ;;  %s1091_s12 = smov %s983_s13 }
  0xfd   : > { %p10_p5 = scmp.ge.s32.totalorder %s13_s14, 6   ;;  %s1092_s13 = smov %s1094_s15 }
  0xff   :  { %12 = sbr.rel (!%p10_p5) target bundleno = 2 (0x2), region = 76 }

// kernel: unet_generator2.46
= control target key start
LH: loop header
LB: loop body
LE: loop exit
PB: predicated region body
PF: predicated region fallthrough
CT: control target
= control target key end

     0   :  { %s870_s12 = smov 0   ;;  %s872_s13 = smov 0   ;;  %s935_s0 = inlined_call_operand.vmem [shape: bf16[4,32,256], index: 0, kind: input, shape index: {}]   ;;  %s936_s1 = inlined_call_operand.vmem [shape: bf16[4,256,128], index: 1, kind: input, shape index: {}]   ;;  %s937_s2 = inlined_call_operand.vmem [shape: f32[1,128], index: 2, kind: input, shape index: {}]   ;;  %s938_s3 = inlined_call_operand.vmem [shape: f32[4,32,128], index: 3, kind: output, shape index: {}]  }
   0x1   :  { %s874_s14 = smov 0  }
   0x2 LB: > { %s39_s15 = sadd.s32 1, %s844_s13  ;;  %p703_p0 = scmp.ge.s32.totalorder %s848_s14, 1  ;;  %s848_s14 = sphi %s874_s14, %s13_s14   ;;  %s844_s13 = sphi %s872_s13, %s940_s13   ;;  %s840_s12 = sphi %s870_s12, %s939_s12  }
   0x3   : > { %p41_p1 = scmp.ge.s32.totalorder %s39_s15, 4  ;;  %p212_p2 = scmp.lt.s32.totalorder %s848_s14, 5 }
   0x5   : > { %s942_s15 = smov (%p41_p1, %s39_s15), 0  ;;  %p213_p3 = pnand %p703_p0, %p212_p2 }
   0x6   : > { %p269_p4 = scmp.lt.s32.totalorder (!%p213_p3), %s840_s12, 3 }
   0x7   : > { %216 = sbr.rel (%p213_p3) target bundleno = 252 (0xfc), region = 32 }
   0xc   : > { %s944_s12 = smov (!%p269_p4, %s840_s12), 3  ;;  %v730_v23 = vld [vmem:[%s937_s2] ss:$0 sm:$0xff] }
   0xd   : > { %s734_s16 = sshll.u32 %s944_s12, 7  ;;  %s733_s20 = sshll.u32 %s944_s12, 5 }
   0xe   : > { %s894_s19 = scalar_lea.vmem %s936_s1, %s734_s16  ;;  %s280_s23 = scalar_lea.vmem %s935_s0, %s733_s20 }
   0xf   : > { %v804_v0 = vld [vmem:[%s894_s19 + $0x78] sm:$0xff]   ;;  %v806_v2 = vld [vmem:[%s894_s19 + $0x70] sm:$0xff]   ;;  %v808_v4 = vld [vmem:[%s894_s19 + $0x68] sm:$0xff]   ;;  %s310_s28 = scalar_lea.vmem %s938_s3, %s733_s20 }
  0x10   : > { %v805_v1 = vld [vmem:[%s894_s19 + $0x38] sm:$0xff]   ;;  %736 = vmatprep.subr.bf16.mxu0 %v804_v0  ;;  %764 = vmatprep.subr.bf16.mxu1 %v804_v0  ;;  %v807_v3 = vld [vmem:[%s894_s19 + $0x30] sm:$0xff]   ;;  %v809_v5 = vld [vmem:[%s894_s19 + $0x28] sm:$0xff]  }
  0x11   : > { %737 = vmatpush3.bf16.msra.mxu0 %v805_v1  ;;  %772 = vmatpush3.bf16.msra.mxu1 %v805_v1  ;;  %v810_v6 = vld [vmem:[%s894_s19 + $0x60] sm:$0xff]   ;;  %v812_v8 = vld [vmem:[%s894_s19 + $0x58] sm:$0xff]   ;;  %v814_v10 = vld [vmem:[%s894_s19 + $0x50] sm:$0xff]  }
  0x12   : > { %738 = vmatprep.subr.bf16.mxu0 %v806_v2  ;;  %765 = vmatprep.subr.bf16.mxu1 %v806_v2  ;;  %v811_v7 = vld [vmem:[%s894_s19 + $0x20] sm:$0xff]   ;;  %v813_v9 = vld [vmem:[%s894_s19 + $0x18] sm:$0xff]   ;;  %v815_v13 = vld [vmem:[%s894_s19 + $0x10] sm:$0xff]  }
  0x13   : > { %v822_v11 = vld [vmem:[%s280_s23 + $0x4] ss:$8 sps:$4 sm:$0xff]   ;;  %v825_v12 = vld [vmem:[%s280_s23 + $0x14] ss:$8 sps:$4 sm:$0xff]   ;;  %v820_v18 = vld [vmem:[%s280_s23] ss:$8 sps:$4 sm:$0xff]  }
  0x14   : > { %v816_v14 = vld [vmem:[%s894_s19 + $0x48] sm:$0xff]   ;;  %509 = vmatprep.mubr.bf16.mxu0 %v822_v11  ;;  %517 = vmatprep.mubr.bf16.mxu1 %v825_v12  ;;  %v818_v16 = vld [vmem:[%s894_s19 + $0x40] sm:$0xff]   ;;  %v823_v19 = vld [vmem:[%s280_s23 + $0x10] ss:$8 sps:$4 sm:$0xff]  }
  0x15   : > { %739 = vmatpush3.bf16.msra.mxu0 %v807_v3  ;;  %773 = vmatpush3.bf16.msra.mxu1 %v807_v3  ;;  %v817_v15 = vld [vmem:[%s894_s19 + $0x8] sm:$0xff]   ;;  %v819_v17 = vld [vmem:[%s894_s19] sm:$0xff]  }
  0x16   : > { %740 = vmatprep.subr.bf16.mxu0 %v808_v4  ;;  %766 = vmatprep.subr.bf16.mxu1 %v808_v4 }
  0x19   : > { %741 = vmatpush3.bf16.msra.mxu0 %v809_v5  ;;  %774 = vmatpush3.bf16.msra.mxu1 %v809_v5 }
  0x1a   : > { %742 = vmatprep.subr.bf16.mxu0 %v810_v6  ;;  %767 = vmatprep.subr.bf16.mxu1 %v810_v6 }
  0x1d   : > { %743 = vmatpush3.bf16.msra.mxu0 %v811_v7  ;;  %775 = vmatpush3.bf16.msra.mxu1 %v811_v7 }
  0x1e   : > { %744 = vmatprep.subr.bf16.mxu0 %v812_v8  ;;  %768 = vmatprep.subr.bf16.mxu1 %v812_v8 }
  0x21   : > { %745 = vmatpush3.bf16.msra.mxu0 %v813_v9  ;;  %776 = vmatpush3.bf16.msra.mxu1 %v813_v9 }
  0x22   : > { %746 = vmatprep.subr.bf16.mxu0 %v814_v10  ;;  %769 = vmatprep.subr.bf16.mxu1 %v814_v10 }
  0x25   : > { %747 = vmatpush3.bf16.msra.mxu0 %v815_v13  ;;  %777 = vmatpush3.bf16.msra.mxu1 %v815_v13 }
  0x26   : > { %748 = vmatprep.subr.bf16.mxu0 %v816_v14  ;;  %770 = vmatprep.subr.bf16.mxu1 %v816_v14 }
  0x29   : > { %749 = vmatpush3.bf16.msra.mxu0 %v817_v15  ;;  %778 = vmatpush3.bf16.msra.mxu1 %v817_v15 }
  0x2a   : > { %750 = vmatprep.subr.bf16.mxu0 %v818_v16  ;;  %771 = vmatprep.subr.bf16.mxu1 %v818_v16 }
  0x2d   : > { %751 = vmatpush3.bf16.msra.mxu0 %v819_v17  ;;  %779 = vmatpush3.bf16.msra.mxu1 %v819_v17 }
  0x30   : > { %510 = vmatmul.mubr.bf16.vlgmr.msra.gmra.mxu0 %v820_v18  ;;  %518 = vmatmul.mubr.bf16.vlgmr.msra.gmra.mxu1 %v823_v19 }
  0xf0   : > { %v752_v20 = vpop.f32.mrf.mxu0  ;;  %v758_v21 = vpop.f32.mrf.mxu1 }
  0xf2   : > { %v753_v22 = vpop.f32.mrf.mxu0  ;;  %v759_v24 = vpop.f32.mrf.mxu1 }
  0xf3   : > { %v754_v25 = vadd.f32 %v753_v22, %v752_v20  ;;  %v760_v26 = vadd.f32 %v759_v24, %v758_v21 }
  0xf4   : > { %v755_v27 = vpop.f32.mrf.mxu0  ;;  %v761_v28 = vpop.f32.mrf.mxu1 }
  0xf5   : > { %v548_v29 = vadd.f32 %v754_v25, %v730_v23  ;;  %v550_v30 = vadd.f32 %v760_v26, %v730_v23 }
  0xf6   : > { %v756_v31 = vpop.f32.mrf.mxu0  ;;  %v762_v32 = vpop.f32.mrf.mxu1 }
  0xf7   : > { %552 = vst [vmem:[%s310_s28] sm:$0xff] %v548_v29  ;;  %554 = vst [vmem:[%s310_s28 + $0x10] sm:$0xff] %v550_v30  ;;  %v757_v33 = vadd.f32 %v756_v31, %v755_v27  ;;  %v763_v34 = vadd.f32 %v762_v32, %v761_v28 }
  0xf9   : > { %v549_v35 = vadd.f32 %v757_v33, %v730_v23  ;;  %v551_v36 = vadd.f32 %v763_v34, %v730_v23 }
  0xfb   : > { %553 = vst [vmem:[%s310_s28 + $0x8] sm:$0xff] %v549_v35  ;;  %555 = vst [vmem:[%s310_s28 + $0x18] sm:$0xff] %v551_v36 }
  0xfc PF: > { %s13_s14 = sadd.s32 1, %s848_s14   ;;  %s939_s12 = smov %s844_s13 }
  0xfd   : > { %p10_p5 = scmp.ge.s32.totalorder %s13_s14, 6   ;;  %s940_s13 = smov %s942_s15 }
  0xff   :  { %12 = sbr.rel (!%p10_p5) target bundleno = 2 (0x2), region = 76 }

// kernel: unet_generator2.48
= control target key start
LH: loop header
LB: loop body
LE: loop exit
PB: predicated region body
PF: predicated region fallthrough
CT: control target
= control target key end

     0   :  { %s977_s12 = smov 0   ;;  %s979_s13 = smov 0   ;;  %s1058_s0 = inlined_call_operand.vmem [shape: bf16[4,128,128], index: 0, kind: input, shape index: {}]   ;;  %s1059_s1 = inlined_call_operand.vmem [shape: bf16[4,128,128], index: 1, kind: input, shape index: {}]   ;;  %s1060_s2 = inlined_call_operand.vmem [shape: f32[1,128], index: 2, kind: input, shape index: {}]   ;;  %s1061_s3 = inlined_call_operand.vmem [shape: f32[4,128,128], index: 3, kind: output, shape index: {}]  }
   0x1   :  { %s981_s14 = smov 0  }
   0x2 LB: > { %s39_s15 = sadd.s32 1, %s951_s13  ;;  %p800_p0 = scmp.ge.s32.totalorder %s955_s14, 1  ;;  %s955_s14 = sphi %s981_s14, %s13_s14   ;;  %s951_s13 = sphi %s979_s13, %s1063_s13   ;;  %s947_s12 = sphi %s977_s12, %s1062_s12  }
   0x3   : > { %p41_p1 = scmp.ge.s32.totalorder %s39_s15, 4  ;;  %p209_p2 = scmp.lt.s32.totalorder %s955_s14, 5 }
   0x5   : > { %s1065_s15 = smov (%p41_p1, %s39_s15), 0  ;;  %p210_p3 = pnand %p800_p0, %p209_p2 }
   0x6   : > { %p263_p4 = scmp.lt.s32.totalorder (!%p210_p3), %s947_s12, 3 }
   0x7   : > { %213 = sbr.rel (%p210_p3) target bundleno = 258 (0x102), region = 32 }
   0xc   : > { %s1067_s12 = smov (!%p263_p4, %s947_s12), 3  ;;  %v823_v16 = vld [vmem:[%s1060_s2] ss:$0 sm:$0xff] }
   0xd   : > { %s826_s16 = sshll.u32 %s1067_s12, 6  ;;  %s828_s23 = sshll.u32 %s1067_s12, 7 }
   0xe   : > { %s1001_s19 = scalar_lea.vmem %s1059_s1, %s826_s16  ;;  %s1009_s22 = scalar_lea.vmem %s1058_s0, %s826_s16 }
   0xf   : > { %v917_v0 = vld [vmem:[%s1001_s19 + $0x38] sm:$0xff]   ;;  %v918_v1 = vld [vmem:[%s1001_s19 + $0x30] sm:$0xff]   ;;  %v919_v2 = vld [vmem:[%s1001_s19 + $0x28] sm:$0xff]   ;;  %s1031_s28 = scalar_lea.vmem %s1061_s3, %s828_s23 }
  0x10   : > { %845 = vmatprep.subr.bf16.mxu0 %v917_v0  ;;  %877 = vmatprep.subr.bf16.mxu1 %v917_v0  ;;  %v920_v3 = vld [vmem:[%s1001_s19 + $0x20] sm:$0xff]   ;;  %v921_v6 = vld [vmem:[%s1001_s19 + $0x18] sm:$0xff]   ;;  %v922_v7 = vld [vmem:[%s1001_s19 + $0x10] sm:$0xff]  }
  0x11   : > { %846 = vmatpush3.bf16.msra.mxu0 %v917_v0  ;;  %885 = vmatpush3.bf16.msra.mxu1 %v917_v0  ;;  %v925_v4 = vld [vmem:[%s1009_s22] sm:$0xff]   ;;  %v923_v8 = vld [vmem:[%s1001_s19 + $0x8] sm:$0xff]   ;;  %v929_v12 = vld [vmem:[%s1009_s22 + $0x10] sm:$0xff]  }
  0x12   : > { %847 = vmatprep.subr.bf16.mxu0 %v918_v1  ;;  %878 = vmatprep.subr.bf16.mxu1 %v918_v1  ;;  %v926_v5 = vld [vmem:[%s1009_s22 + $0x20] sm:$0xff]   ;;  %v927_v10 = vld [vmem:[%s1009_s22 + $0x8] sm:$0xff]   ;;  %v930_v13 = vld [vmem:[%s1009_s22 + $0x30] sm:$0xff]  }
  0x13   : > { %861 = vmatprep.mubr.bf16.mxu0 %v925_v4  ;;  %869 = vmatprep.mubr.bf16.mxu1 %v926_v5  ;;  %v924_v9 = vld [vmem:[%s1001_s19] sm:$0xff]   ;;  %v928_v11 = vld [vmem:[%s1009_s22 + $0x28] sm:$0xff]   ;;  %v931_v14 = vld [vmem:[%s1009_s22 + $0x18] sm:$0xff]  }
  0x14   : > { %v932_v15 = vld [vmem:[%s1009_s22 + $0x38] sm:$0xff]  }
  0x15   : > { %848 = vmatpush3.bf16.msra.mxu0 %v918_v1  ;;  %886 = vmatpush3.bf16.msra.mxu1 %v918_v1 }
  0x16   : > { %849 = vmatprep.subr.bf16.mxu0 %v919_v2  ;;  %879 = vmatprep.subr.bf16.mxu1 %v919_v2 }
  0x19   : > { %850 = vmatpush3.bf16.msra.mxu0 %v919_v2  ;;  %887 = vmatpush3.bf16.msra.mxu1 %v919_v2 }
  0x1a   : > { %851 = vmatprep.subr.bf16.mxu0 %v920_v3  ;;  %880 = vmatprep.subr.bf16.mxu1 %v920_v3 }
  0x1d   : > { %852 = vmatpush3.bf16.msra.mxu0 %v920_v3  ;;  %888 = vmatpush3.bf16.msra.mxu1 %v920_v3 }
  0x1e   : > { %853 = vmatprep.subr.bf16.mxu0 %v921_v6  ;;  %881 = vmatprep.subr.bf16.mxu1 %v921_v6 }
  0x21   : > { %854 = vmatpush3.bf16.msra.mxu0 %v921_v6  ;;  %889 = vmatpush3.bf16.msra.mxu1 %v921_v6 }
  0x22   : > { %855 = vmatprep.subr.bf16.mxu0 %v922_v7  ;;  %882 = vmatprep.subr.bf16.mxu1 %v922_v7 }
  0x25   : > { %856 = vmatpush3.bf16.msra.mxu0 %v922_v7  ;;  %890 = vmatpush3.bf16.msra.mxu1 %v922_v7 }
  0x26   : > { %857 = vmatprep.subr.bf16.mxu0 %v923_v8  ;;  %883 = vmatprep.subr.bf16.mxu1 %v923_v8 }
  0x29   : > { %858 = vmatpush3.bf16.msra.mxu0 %v923_v8  ;;  %891 = vmatpush3.bf16.msra.mxu1 %v923_v8 }
  0x2a   : > { %859 = vmatprep.subr.bf16.mxu0 %v924_v9  ;;  %884 = vmatprep.subr.bf16.mxu1 %v924_v9 }
  0x2d   : > { %860 = vmatpush3.bf16.msra.mxu0 %v924_v9  ;;  %892 = vmatpush3.bf16.msra.mxu1 %v924_v9 }
  0x30   : > { %862 = vmatmul.mubr.bf16.vlgmr.msra.gmra.mxu0 %v927_v10  ;;  %870 = vmatmul.mubr.bf16.vlgmr.msra.gmra.mxu1 %v928_v11 }
  0x31   : > { %865 = vmatprep.mubr.bf16.mxu0 %v929_v12  ;;  %873 = vmatprep.mubr.bf16.mxu1 %v930_v13 }
  0x38   : > { %866 = vmatmul.mubr.bf16.gmra.mxu0 %v931_v14  ;;  %874 = vmatmul.mubr.bf16.gmra.mxu1 %v932_v15 }
  0xf0   : > { %v863_v17 = vpop.f32.mrf.mxu0  ;;  %v871_v18 = vpop.f32.mrf.mxu1 }
  0xf1   : > { %v626_v19 = vadd.f32 %v863_v17, %v823_v16  ;;  %v634_v20 = vadd.f32 %v871_v18, %v823_v16 }
  0xf2   : > { %v503_v21 = vpop.f32.mrf.mxu0  ;;  %v535_v22 = vpop.f32.mrf.mxu1 }
  0xf3   : > { %642 = vst [vmem:[%s1031_s28 + $0x10] sm:$0xff] %v626_v19  ;;  %650 = vst [vmem:[%s1031_s28 + $0x50] sm:$0xff] %v634_v20  ;;  %v624_v23 = vadd.f32 %v823_v16, %v503_v21  ;;  %v632_v24 = vadd.f32 %v823_v16, %v535_v22 }
  0xf4   : > { %v864_v25 = vpop.f32.mrf.mxu0  ;;  %v872_v26 = vpop.f32.mrf.mxu1 }
  0xf5   : > { %640 = vst [vmem:[%s1031_s28] sm:$0xff] %v624_v23  ;;  %648 = vst [vmem:[%s1031_s28 + $0x40] sm:$0xff] %v632_v24  ;;  %v627_v27 = vadd.f32 %v864_v25, %v823_v16  ;;  %v635_v28 = vadd.f32 %v872_v26, %v823_v16 }
  0xf6   : > { %v506_v29 = vpop.f32.mrf.mxu0  ;;  %v538_v30 = vpop.f32.mrf.mxu1 }
  0xf7   : > { %643 = vst [vmem:[%s1031_s28 + $0x18] sm:$0xff] %v627_v27  ;;  %651 = vst [vmem:[%s1031_s28 + $0x58] sm:$0xff] %v635_v28  ;;  %v625_v31 = vadd.f32 %v823_v16, %v506_v29  ;;  %v633_v32 = vadd.f32 %v823_v16, %v538_v30 }
  0xf8   : > { %v867_v33 = vpop.f32.mrf.mxu0  ;;  %v875_v34 = vpop.f32.mrf.mxu1 }
  0xf9   : > { %641 = vst [vmem:[%s1031_s28 + $0x8] sm:$0xff] %v625_v31  ;;  %649 = vst [vmem:[%s1031_s28 + $0x48] sm:$0xff] %v633_v32  ;;  %v630_v35 = vadd.f32 %v867_v33, %v823_v16  ;;  %v638_v36 = vadd.f32 %v875_v34, %v823_v16 }
  0xfa   : > { %v519_v37 = vpop.f32.mrf.mxu0  ;;  %v551_v38 = vpop.f32.mrf.mxu1 }
  0xfb   : > { %646 = vst [vmem:[%s1031_s28 + $0x30] sm:$0xff] %v630_v35  ;;  %654 = vst [vmem:[%s1031_s28 + $0x70] sm:$0xff] %v638_v36  ;;  %v628_v39 = vadd.f32 %v823_v16, %v519_v37  ;;  %v636_v40 = vadd.f32 %v823_v16, %v551_v38 }
  0xfc   : > { %v868_v41 = vpop.f32.mrf.mxu0  ;;  %v876_v42 = vpop.f32.mrf.mxu1 }
  0xfd   : > { %644 = vst [vmem:[%s1031_s28 + $0x20] sm:$0xff] %v628_v39  ;;  %652 = vst [vmem:[%s1031_s28 + $0x60] sm:$0xff] %v636_v40  ;;  %v631_v43 = vadd.f32 %v868_v41, %v823_v16  ;;  %v639_v44 = vadd.f32 %v876_v42, %v823_v16 }
  0xfe   : > { %v522_v45 = vpop.f32.mrf.mxu0  ;;  %v554_v46 = vpop.f32.mrf.mxu1 }
  0xff   : > { %647 = vst [vmem:[%s1031_s28 + $0x38] sm:$0xff] %v631_v43  ;;  %655 = vst [vmem:[%s1031_s28 + $0x78] sm:$0xff] %v639_v44  ;;  %v629_v47 = vadd.f32 %v823_v16, %v522_v45  ;;  %v637_v48 = vadd.f32 %v823_v16, %v554_v46 }
 0x101   : > { %645 = vst [vmem:[%s1031_s28 + $0x28] sm:$0xff] %v629_v47  ;;  %653 = vst [vmem:[%s1031_s28 + $0x68] sm:$0xff] %v637_v48 }
 0x102 PF: > { %s13_s14 = sadd.s32 1, %s955_s14   ;;  %s1062_s12 = smov %s951_s13 }
 0x103   : > { %p10_p5 = scmp.ge.s32.totalorder %s13_s14, 6   ;;  %s1063_s13 = smov %s1065_s15 }
 0x105   :  { %12 = sbr.rel (!%p10_p5) target bundleno = 2 (0x2), region = 76 }

// kernel: unet_generator2.49
= control target key start
LH: loop header
LB: loop body
LE: loop exit
PB: predicated region body
PF: predicated region fallthrough
CT: control target
= control target key end

     0   :  { %v314_v0 = vmov 0.0   ;;  %vm280_vm0 = vcmask 1040384   ;;  %s534_s0 = inlined_call_operand.vmem [shape: f32[512,128], index: 0, kind: input, shape index: {}]   ;;  %s535_s1 = inlined_call_operand.vmem [shape: f32[2,128], index: 1, kind: output, shape index: {}]  }
   0x1   :  { %12 = vst [vmem:[%s535_s1] sm:$0x3] %v314_v0  ;;  %v13_v1 = vld [vmem:[%s534_s0] sm:$0xff]  ;;  %v14_v2 = vld [vmem:[%s534_s0 + $0x8] sm:$0xff]  ;;  %v15_v3 = vld [vmem:[%s534_s0 + $0x10] sm:$0xff] }
   0x2   :  { %v16_v4 = vld [vmem:[%s534_s0 + $0x18] sm:$0xff]  ;;  %v77_v5 = vadd.f32 %v14_v2, %v13_v1  ;;  %v146_v6 = vmul.f32 %v13_v1, %v13_v1  ;;  %v147_v7 = vmul.f32 %v14_v2, %v14_v2  ;;  %v148_v8 = vmul.f32 %v15_v3, %v15_v3  ;;  %v17_v9 = vld [vmem:[%s534_s0 + $0x20] sm:$0xff]  ;;  %v18_v13 = vld [vmem:[%s534_s0 + $0x28] sm:$0xff] }
   0x3   :  { %v149_v11 = vmul.f32 %v16_v4, %v16_v4  ;;  %v150_v15 = vmul.f32 %v17_v9, %v17_v9  ;;  %v19_v17 = vld [vmem:[%s534_s0 + $0x30] sm:$0xff]  ;;  %v151_v19 = vmul.f32 %v18_v13, %v18_v13  ;;  %v20_v21 = vld [vmem:[%s534_s0 + $0x38] sm:$0xff]  ;;  %v21_v25 = vld [vmem:[%s534_s0 + $0x40] sm:$0xff] }
   0x4   :  { %v78_v10 = vadd.f32 %v77_v5, %v15_v3  ;;  %v210_v12 = vadd.f32 %v147_v7, %v146_v6  ;;  %v152_v23 = vmul.f32 %v19_v17, %v19_v17  ;;  %v153_v27 = vmul.f32 %v20_v21, %v20_v21  ;;  %v22_v29 = vld [vmem:[%s534_s0 + $0x48] sm:$0xff]  ;;  %v23_v33 = vld [vmem:[%s534_s0 + $0x50] sm:$0xff]  ;;  %v24_v37 = vld [vmem:[%s534_s0 + $0x58] sm:$0xff] }
   0x5   :  { %v154_v31 = vmul.f32 %v21_v25, %v21_v25  ;;  %v155_v35 = vmul.f32 %v22_v29, %v22_v29  ;;  %v156_v39 = vmul.f32 %v23_v33, %v23_v33  ;;  %v25_v41 = vld [vmem:[%s534_s0 + $0x60] sm:$0xff]  ;;  %v157_v43 = vmul.f32 %v24_v37, %v24_v37  ;;  %v26_v45 = vld [vmem:[%s534_s0 + $0x68] sm:$0xff]  ;;  %v27_v49 = vld [vmem:[%s534_s0 + $0x70] sm:$0xff] }
   0x6   :  { %v79_v14 = vadd.f32 %v78_v10, %v16_v4  ;;  %v211_v16 = vadd.f32 %v210_v12, %v148_v8  ;;  %v158_v47 = vmul.f32 %v25_v41, %v25_v41  ;;  %v159_v51 = vmul.f32 %v26_v45, %v26_v45  ;;  %v28_v53 = vld [vmem:[%s534_s0 + $0x78] sm:$0xff]  ;;  %v29_v57 = vld [vmem:[%s534_s0 + $0x80] sm:$0xff]  ;;  %v30_v61 = vld [vmem:[%s534_s0 + $0x88] sm:$0xff] }
   0x7   :  { %v160_v55 = vmul.f32 %v27_v49, %v27_v49  ;;  %v161_v59 = vmul.f32 %v28_v53, %v28_v53  ;;  %v162_v63 = vmul.f32 %v29_v57, %v29_v57  ;;  %v31_v1 = vld [vmem:[%s534_s0 + $0x90] sm:$0xff]  ;;  %v163_v3 = vmul.f32 %v30_v61, %v30_v61  ;;  %v32_v5 = vld [vmem:[%s534_s0 + $0x98] sm:$0xff] }
   0x8   :  { %v80_v18 = vadd.f32 %v79_v14, %v17_v9  ;;  %v212_v20 = vadd.f32 %v211_v16, %v149_v11  ;;  %v164_v7 = vmul.f32 %v31_v1, %v31_v1  ;;  %v33_v9 = vld [vmem:[%s534_s0 + $0xa0] sm:$0xff]  ;;  %v165_v11 = vmul.f32 %v32_v5, %v32_v5 }
   0xa   :  { %v81_v22 = vadd.f32 %v80_v18, %v18_v13  ;;  %v213_v24 = vadd.f32 %v212_v20, %v150_v15  ;;  %v34_v13 = vld [vmem:[%s534_s0 + $0xa8] sm:$0xff]  ;;  %v166_v15 = vmul.f32 %v33_v9, %v33_v9 }
   0xc   :  { %v82_v26 = vadd.f32 %v81_v22, %v19_v17  ;;  %v214_v28 = vadd.f32 %v213_v24, %v151_v19  ;;  %v35_v17 = vld [vmem:[%s534_s0 + $0xb0] sm:$0xff]  ;;  %v167_v19 = vmul.f32 %v34_v13, %v34_v13 }
   0xe   :  { %v83_v30 = vadd.f32 %v82_v26, %v20_v21  ;;  %v215_v32 = vadd.f32 %v214_v28, %v152_v23  ;;  %v36_v21 = vld [vmem:[%s534_s0 + $0xb8] sm:$0xff]  ;;  %v168_v23 = vmul.f32 %v35_v17, %v35_v17 }
  0x10   :  { %v84_v34 = vadd.f32 %v83_v30, %v21_v25  ;;  %v216_v36 = vadd.f32 %v215_v32, %v153_v27  ;;  %v37_v25 = vld [vmem:[%s534_s0 + $0xc0] sm:$0xff]  ;;  %v169_v27 = vmul.f32 %v36_v21, %v36_v21 }
  0x12   :  { %v85_v38 = vadd.f32 %v84_v34, %v22_v29  ;;  %v217_v40 = vadd.f32 %v216_v36, %v154_v31  ;;  %v38_v29 = vld [vmem:[%s534_s0 + $0xc8] sm:$0xff]  ;;  %v170_v31 = vmul.f32 %v37_v25, %v37_v25 }
  0x14   :  { %v86_v42 = vadd.f32 %v85_v38, %v23_v33  ;;  %v218_v44 = vadd.f32 %v217_v40, %v155_v35  ;;  %v39_v33 = vld [vmem:[%s534_s0 + $0xd0] sm:$0xff]  ;;  %v171_v35 = vmul.f32 %v38_v29, %v38_v29 }
  0x16   :  { %v87_v46 = vadd.f32 %v86_v42, %v24_v37  ;;  %v219_v48 = vadd.f32 %v218_v44, %v156_v39  ;;  %v40_v37 = vld [vmem:[%s534_s0 + $0xd8] sm:$0xff]  ;;  %v172_v39 = vmul.f32 %v39_v33, %v39_v33 }
  0x18   :  { %v88_v50 = vadd.f32 %v87_v46, %v25_v41  ;;  %v220_v52 = vadd.f32 %v219_v48, %v157_v43  ;;  %v41_v41 = vld [vmem:[%s534_s0 + $0xe0] sm:$0xff]  ;;  %v173_v43 = vmul.f32 %v40_v37, %v40_v37 }
  0x1a   :  { %v89_v54 = vadd.f32 %v88_v50, %v26_v45  ;;  %v221_v56 = vadd.f32 %v220_v52, %v158_v47  ;;  %v42_v45 = vld [vmem:[%s534_s0 + $0xe8] sm:$0xff]  ;;  %v174_v47 = vmul.f32 %v41_v41, %v41_v41 }
  0x1c   :  { %v90_v58 = vadd.f32 %v89_v54, %v27_v49  ;;  %v222_v60 = vadd.f32 %v221_v56, %v159_v51  ;;  %v43_v49 = vld [vmem:[%s534_s0 + $0xf0] sm:$0xff]  ;;  %v175_v51 = vmul.f32 %v42_v45, %v42_v45 }
  0x1e   :  { %v91_v62 = vadd.f32 %v90_v58, %v28_v53  ;;  %v223_v0 = vadd.f32 %v222_v60, %v160_v55  ;;  %v44_v53 = vld [vmem:[%s534_s0 + $0xf8] sm:$0xff]  ;;  %v176_v55 = vmul.f32 %v43_v49, %v43_v49 }
  0x20   :  { %v92_v2 = vadd.f32 %v91_v62, %v29_v57  ;;  %v224_v4 = vadd.f32 %v223_v0, %v161_v59  ;;  %v45_v57 = vld [vmem:[%s534_s0 + $0x100] sm:$0xff]  ;;  %v177_v59 = vmul.f32 %v44_v53, %v44_v53 }
  0x22   :  { %v93_v6 = vadd.f32 %v92_v2, %v30_v61  ;;  %v225_v8 = vadd.f32 %v224_v4, %v162_v63  ;;  %v46_v61 = vld [vmem:[%s534_s0 + $0x108] sm:$0xff]  ;;  %v178_v63 = vmul.f32 %v45_v57, %v45_v57 }
  0x24   :  { %v94_v10 = vadd.f32 %v93_v6, %v31_v1  ;;  %v226_v12 = vadd.f32 %v225_v8, %v163_v3  ;;  %v47_v1 = vld [vmem:[%s534_s0 + $0x110] sm:$0xff]  ;;  %v179_v3 = vmul.f32 %v46_v61, %v46_v61 }
  0x26   :  { %v95_v14 = vadd.f32 %v94_v10, %v32_v5  ;;  %v227_v16 = vadd.f32 %v226_v12, %v164_v7  ;;  %v48_v5 = vld [vmem:[%s534_s0 + $0x118] sm:$0xff]  ;;  %v180_v7 = vmul.f32 %v47_v1, %v47_v1 }
  0x28   :  { %v96_v18 = vadd.f32 %v95_v14, %v33_v9  ;;  %v228_v20 = vadd.f32 %v227_v16, %v165_v11  ;;  %v49_v9 = vld [vmem:[%s534_s0 + $0x120] sm:$0xff]  ;;  %v181_v11 = vmul.f32 %v48_v5, %v48_v5 }
  0x2a   :  { %v97_v22 = vadd.f32 %v96_v18, %v34_v13  ;;  %v229_v24 = vadd.f32 %v228_v20, %v166_v15  ;;  %v50_v13 = vld [vmem:[%s534_s0 + $0x128] sm:$0xff]  ;;  %v182_v15 = vmul.f32 %v49_v9, %v49_v9 }
  0x2c   :  { %v98_v26 = vadd.f32 %v97_v22, %v35_v17  ;;  %v230_v28 = vadd.f32 %v229_v24, %v167_v19  ;;  %v51_v17 = vld [vmem:[%s534_s0 + $0x130] sm:$0xff]  ;;  %v183_v19 = vmul.f32 %v50_v13, %v50_v13 }
  0x2e   :  { %v99_v30 = vadd.f32 %v98_v26, %v36_v21  ;;  %v231_v32 = vadd.f32 %v230_v28, %v168_v23  ;;  %v52_v21 = vld [vmem:[%s534_s0 + $0x138] sm:$0xff]  ;;  %v184_v23 = vmul.f32 %v51_v17, %v51_v17 }
  0x30   :  { %v100_v34 = vadd.f32 %v99_v30, %v37_v25  ;;  %v232_v36 = vadd.f32 %v231_v32, %v169_v27  ;;  %v53_v25 = vld [vmem:[%s534_s0 + $0x140] sm:$0xff]  ;;  %v185_v27 = vmul.f32 %v52_v21, %v52_v21 }
  0x32   :  { %v101_v38 = vadd.f32 %v100_v34, %v38_v29  ;;  %v233_v40 = vadd.f32 %v232_v36, %v170_v31  ;;  %v54_v29 = vld [vmem:[%s534_s0 + $0x148] sm:$0xff]  ;;  %v186_v31 = vmul.f32 %v53_v25, %v53_v25 }
  0x34   :  { %v102_v42 = vadd.f32 %v101_v38, %v39_v33  ;;  %v234_v44 = vadd.f32 %v233_v40, %v171_v35  ;;  %v55_v33 = vld [vmem:[%s534_s0 + $0x150] sm:$0xff]  ;;  %v187_v35 = vmul.f32 %v54_v29, %v54_v29 }
  0x36   :  { %v103_v46 = vadd.f32 %v102_v42, %v40_v37  ;;  %v235_v48 = vadd.f32 %v234_v44, %v172_v39  ;;  %v56_v37 = vld [vmem:[%s534_s0 + $0x158] sm:$0xff]  ;;  %v188_v39 = vmul.f32 %v55_v33, %v55_v33 }
  0x38   :  { %v104_v50 = vadd.f32 %v103_v46, %v41_v41  ;;  %v236_v52 = vadd.f32 %v235_v48, %v173_v43  ;;  %v57_v41 = vld [vmem:[%s534_s0 + $0x160] sm:$0xff]  ;;  %v189_v43 = vmul.f32 %v56_v37, %v56_v37 }
  0x3a   :  { %v105_v54 = vadd.f32 %v104_v50, %v42_v45  ;;  %v237_v56 = vadd.f32 %v236_v52, %v174_v47  ;;  %v58_v45 = vld [vmem:[%s534_s0 + $0x168] sm:$0xff]  ;;  %v190_v47 = vmul.f32 %v57_v41, %v57_v41 }
  0x3c   :  { %v106_v58 = vadd.f32 %v105_v54, %v43_v49  ;;  %v238_v60 = vadd.f32 %v237_v56, %v175_v51  ;;  %v59_v49 = vld [vmem:[%s534_s0 + $0x170] sm:$0xff]  ;;  %v191_v51 = vmul.f32 %v58_v45, %v58_v45 }
  0x3e   :  { %v107_v62 = vadd.f32 %v106_v58, %v44_v53  ;;  %v239_v0 = vadd.f32 %v238_v60, %v176_v55  ;;  %v60_v53 = vld [vmem:[%s534_s0 + $0x178] sm:$0xff]  ;;  %v192_v55 = vmul.f32 %v59_v49, %v59_v49 }
  0x40   :  { %v108_v2 = vadd.f32 %v107_v62, %v45_v57  ;;  %v240_v4 = vadd.f32 %v239_v0, %v177_v59  ;;  %v61_v57 = vld [vmem:[%s534_s0 + $0x180] sm:$0xff]  ;;  %v193_v59 = vmul.f32 %v60_v53, %v60_v53 }
  0x42   :  { %v109_v6 = vadd.f32 %v108_v2, %v46_v61  ;;  %v241_v8 = vadd.f32 %v240_v4, %v178_v63  ;;  %v62_v61 = vld [vmem:[%s534_s0 + $0x188] sm:$0xff]  ;;  %v194_v63 = vmul.f32 %v61_v57, %v61_v57 }
  0x44   :  { %v110_v10 = vadd.f32 %v109_v6, %v47_v1  ;;  %v242_v12 = vadd.f32 %v241_v8, %v179_v3  ;;  %v63_v1 = vld [vmem:[%s534_s0 + $0x190] sm:$0xff]  ;;  %v195_v3 = vmul.f32 %v62_v61, %v62_v61 }
  0x46   :  { %v111_v14 = vadd.f32 %v110_v10, %v48_v5  ;;  %v243_v16 = vadd.f32 %v242_v12, %v180_v7  ;;  %v64_v5 = vld [vmem:[%s534_s0 + $0x198] sm:$0xff]  ;;  %v196_v7 = vmul.f32 %v63_v1, %v63_v1 }
  0x48   :  { %v112_v18 = vadd.f32 %v111_v14, %v49_v9  ;;  %v244_v20 = vadd.f32 %v243_v16, %v181_v11  ;;  %v65_v9 = vld [vmem:[%s534_s0 + $0x1a0] sm:$0xff]  ;;  %v197_v11 = vmul.f32 %v64_v5, %v64_v5 }
  0x4a   :  { %v113_v22 = vadd.f32 %v112_v18, %v50_v13  ;;  %v245_v24 = vadd.f32 %v244_v20, %v182_v15  ;;  %v66_v13 = vld [vmem:[%s534_s0 + $0x1a8] sm:$0xff]  ;;  %v198_v15 = vmul.f32 %v65_v9, %v65_v9 }
  0x4c   :  { %v114_v26 = vadd.f32 %v113_v22, %v51_v17  ;;  %v246_v28 = vadd.f32 %v245_v24, %v183_v19  ;;  %v67_v17 = vld [vmem:[%s534_s0 + $0x1b0] sm:$0xff]  ;;  %v199_v19 = vmul.f32 %v66_v13, %v66_v13 }
  0x4e   :  { %v115_v30 = vadd.f32 %v114_v26, %v52_v21  ;;  %v247_v32 = vadd.f32 %v246_v28, %v184_v23  ;;  %v68_v21 = vld [vmem:[%s534_s0 + $0x1b8] sm:$0xff]  ;;  %v200_v23 = vmul.f32 %v67_v17, %v67_v17 }
  0x50   :  { %v116_v34 = vadd.f32 %v115_v30, %v53_v25  ;;  %v248_v36 = vadd.f32 %v247_v32, %v185_v27  ;;  %v69_v25 = vld [vmem:[%s534_s0 + $0x1c0] sm:$0xff]  ;;  %v201_v27 = vmul.f32 %v68_v21, %v68_v21 }
  0x52   :  { %v117_v38 = vadd.f32 %v116_v34, %v54_v29  ;;  %v249_v40 = vadd.f32 %v248_v36, %v186_v31  ;;  %v70_v29 = vld [vmem:[%s534_s0 + $0x1c8] sm:$0xff]  ;;  %v202_v31 = vmul.f32 %v69_v25, %v69_v25 }
  0x54   :  { %v118_v42 = vadd.f32 %v117_v38, %v55_v33  ;;  %v250_v44 = vadd.f32 %v249_v40, %v187_v35  ;;  %v71_v33 = vld [vmem:[%s534_s0 + $0x1d0] sm:$0xff]  ;;  %v203_v35 = vmul.f32 %v70_v29, %v70_v29 }
  0x56   :  { %v119_v46 = vadd.f32 %v118_v42, %v56_v37  ;;  %v251_v48 = vadd.f32 %v250_v44, %v188_v39  ;;  %v72_v37 = vld [vmem:[%s534_s0 + $0x1d8] sm:$0xff]  ;;  %v204_v39 = vmul.f32 %v71_v33, %v71_v33 }
  0x58   :  { %v120_v50 = vadd.f32 %v119_v46, %v57_v41  ;;  %v252_v52 = vadd.f32 %v251_v48, %v189_v43  ;;  %v73_v41 = vld [vmem:[%s534_s0 + $0x1e0] sm:$0xff]  ;;  %v205_v43 = vmul.f32 %v72_v37, %v72_v37 }
  0x5a   :  { %v121_v54 = vadd.f32 %v120_v50, %v58_v45  ;;  %v253_v56 = vadd.f32 %v252_v52, %v190_v47  ;;  %v74_v45 = vld [vmem:[%s534_s0 + $0x1e8] sm:$0xff]  ;;  %v206_v47 = vmul.f32 %v73_v41, %v73_v41 }
  0x5c   :  { %v122_v58 = vadd.f32 %v121_v54, %v59_v49  ;;  %v254_v60 = vadd.f32 %v253_v56, %v191_v51  ;;  %v75_v49 = vld [vmem:[%s534_s0 + $0x1f0] sm:$0xff]  ;;  %v207_v51 = vmul.f32 %v74_v45, %v74_v45 }
  0x5e   :  { %v123_v62 = vadd.f32 %v122_v58, %v60_v53  ;;  %v255_v0 = vadd.f32 %v254_v60, %v192_v55  ;;  %v76_v53 = vld [vmem:[%s534_s0 + $0x1f8] sm:$0xff]  ;;  %v208_v55 = vmul.f32 %v75_v49, %v75_v49 }
  0x5f   :  { %v209_v58 = vmul.f32 %v76_v53, %v76_v53 }
  0x60   :  { %v124_v2 = vadd.f32 %v123_v62, %v61_v57  ;;  %v256_v4 = vadd.f32 %v255_v0, %v193_v59 }
  0x62   :  { %v125_v6 = vadd.f32 %v124_v2, %v62_v61  ;;  %v257_v8 = vadd.f32 %v256_v4, %v194_v63 }
  0x64   :  { %v126_v10 = vadd.f32 %v125_v6, %v63_v1  ;;  %v258_v12 = vadd.f32 %v257_v8, %v195_v3 }
  0x66   :  { %v127_v14 = vadd.f32 %v126_v10, %v64_v5  ;;  %v259_v16 = vadd.f32 %v258_v12, %v196_v7 }
  0x68   :  { %v128_v18 = vadd.f32 %v127_v14, %v65_v9  ;;  %v260_v20 = vadd.f32 %v259_v16, %v197_v11  ;;  %v279_v11 = vld [vmem:[%s535_s1] sm:$0x3] }
  0x6a   :  { %v129_v22 = vadd.f32 %v128_v18, %v66_v13  ;;  %v261_v24 = vadd.f32 %v260_v20, %v198_v15 }
  0x6c   :  { %v130_v26 = vadd.f32 %v129_v22, %v67_v17  ;;  %v262_v28 = vadd.f32 %v261_v24, %v199_v19 }
  0x6e   :  { %v131_v30 = vadd.f32 %v130_v26, %v68_v21  ;;  %v263_v32 = vadd.f32 %v262_v28, %v200_v23 }
  0x70   :  { %v132_v34 = vadd.f32 %v131_v30, %v69_v25  ;;  %v264_v36 = vadd.f32 %v263_v32, %v201_v27 }
  0x72   :  { %v133_v38 = vadd.f32 %v132_v34, %v70_v29  ;;  %v265_v40 = vadd.f32 %v264_v36, %v202_v31 }
  0x74   :  { %v134_v42 = vadd.f32 %v133_v38, %v71_v33  ;;  %v266_v44 = vadd.f32 %v265_v40, %v203_v35 }
  0x76   :  { %v135_v46 = vadd.f32 %v134_v42, %v72_v37  ;;  %v267_v48 = vadd.f32 %v266_v44, %v204_v39 }
  0x78   :  { %v136_v50 = vadd.f32 %v135_v46, %v73_v41  ;;  %v268_v52 = vadd.f32 %v267_v48, %v205_v43 }
  0x7a   :  { %v137_v54 = vadd.f32 %v136_v50, %v74_v45  ;;  %v269_v56 = vadd.f32 %v268_v52, %v206_v47 }
  0x7c   :  { %v138_v57 = vadd.f32 %v137_v54, %v75_v49  ;;  %v270_v59 = vadd.f32 %v269_v56, %v207_v51 }
  0x7e   :  { %v139_v60 = vadd.f32 %v138_v57, %v76_v53  ;;  %v271_v61 = vadd.f32 %v270_v59, %v208_v55 }
  0x80   :  { %v140_v62 = vrot.slane %v139_v60, 4  ;;  %v272_v63 = vadd.f32 %v271_v61, %v209_v58 }
  0x82   :  { %v141_v0 = vadd.f32 %v140_v62, %v139_v60  ;;  %v273_v1 = vrot.slane %v272_v63, 4 }
  0x84   :  { %v142_v2 = vrot.slane %v141_v0, 2  ;;  %v274_v3 = vadd.f32 %v273_v1, %v272_v63 }
  0x86   :  { %v143_v4 = vadd.f32 %v142_v2, %v141_v0  ;;  %v275_v5 = vrot.slane %v274_v3, 2 }
  0x88   :  { %v144_v6 = vrot.slane %v143_v4, 1  ;;  %v276_v7 = vadd.f32 %v275_v5, %v274_v3 }
  0x8a   :  { %v145_v8 = vadd.f32 %v144_v6, %v143_v4  ;;  %v277_v9 = vrot.slane %v276_v7, 1 }
  0x8c   :  { %v278_v10 = vadd.f32 %v277_v9, %v276_v7 }
  0x8e   :  { %v281_v12 = vsel %vm280_vm0, %v145_v8, %v278_v10 }
  0x8f   :  { %v282_v13 = vadd.f32 %v281_v12, %v279_v11 }
  0x91   :  { %283 = vst [vmem:[%s535_s1] sm:$0x3] %v282_v13 }
  0x98   :  { %v287_v14 = vld [vmem:[%s535_s1] sm:$0x3] }
  0x99   :  { %v288_v15 = vmul.f32 0.001953125, %v287_v14 }
  0x9b   :  { %v289_v16 = vmul.f32 %v288_v15, %v288_v15  ;;  %v297_v22 = vsub.f32 0.0, %v288_v15 }
  0x9d   :  { %v291_v17 = vrot.slane %v289_v16, 7 }
  0x9f   :  { %v293_v18 = vsub.f32 %v288_v15, %v291_v17 }
  0xa1   :  { %v294_v19 = vmax.f32 %v293_v18, 0.0 }
  0xa3   :  { %v295_v20 = vadd.f32 1e-05, %v294_v19 }
  0xa5   :  { %312 = vrsqrt.f32 %v295_v20 }
  0xb2   :  { %v313_v21 = vpop.eup %312 }
  0xb3   :  { %v299_v23 = vrot.slane %v313_v21, 1 }
  0xb5   :  { %v301_v24 = vmul.f32 %v299_v23, %v297_v22 }
  0xb7   :  { %v303_v25 = vrot.slane %v301_v24, 7 }
  0xb9   :  { %v305_v26 = vsel %vm280_vm0, %v299_v23, %v303_v25 }
  0xba   :  { %306 = vst [vmem:[%s535_s1] sm:$0x3] %v305_v26 }

// kernel: unet_generator2.50
= control target key start
LH: loop header
LB: loop body
LE: loop exit
PB: predicated region body
PF: predicated region fallthrough
CT: control target
= control target key end

     0   :  { %s2009_s12 = smov 0   ;;  %s2011_s13 = smov 0   ;;  %s2229_s0 = inlined_call_operand.vmem [shape: bf16[4,512,128], index: 0, kind: input, shape index: {}]   ;;  %s2230_s1 = inlined_call_operand.vmem [shape: bf16[4,128,128], index: 1, kind: input, shape index: {}]   ;;  %s2231_s2 = inlined_call_operand.vmem [shape: f32[1,128], index: 2, kind: input, shape index: {}]   ;;  %s2232_s3 = inlined_call_operand.vmem [shape: f32[4,512,128], index: 3, kind: output, shape index: {}]  }
   0x1   :  { %s2013_s14 = smov 0  }
   0x2 LB: > { %s39_s15 = sadd.s32 1, %s1983_s13  ;;  %p1584_p0 = scmp.ge.s32.totalorder %s1987_s14, 1  ;;  %s1987_s14 = sphi %s2013_s14, %s13_s14   ;;  %s1983_s13 = sphi %s2011_s13, %s2234_s13   ;;  %s1979_s12 = sphi %s2009_s12, %s2233_s12  }
   0x3   : > { %p41_p1 = scmp.ge.s32.totalorder %s39_s15, 4  ;;  %p209_p2 = scmp.lt.s32.totalorder %s1987_s14, 5 }
   0x5   : > { %s2236_s15 = smov (%p41_p1, %s39_s15), 0  ;;  %p210_p3 = pnand %p1584_p0, %p209_p2 }
   0x6   : > { %p263_p4 = scmp.lt.s32.totalorder (!%p210_p3), %s1979_s12, 3 }
   0x7   : > { %213 = sbr.rel (%p210_p3) target bundleno = 321 (0x141), region = 32 }
   0xc   : > { %s2238_s12 = smov (!%p263_p4, %s1979_s12), 3  ;;  %v2084_v40 = vld [vmem:[%s2231_s2] ss:$0 sm:$0xff] }
   0xd   : > { %s1635_s16 = sshll.u32 %s2238_s12, 6  ;;  %s1634_s20 = sshll.u32 %s2238_s12, 8 }
   0xe   : > { %s2033_s19 = scalar_lea.vmem %s2230_s1, %s1635_s16  ;;  %s2042_s23 = scalar_lea.vmem %s2229_s0, %s1634_s20 }
   0xf   : > { %v1797_v0 = vld [vmem:[%s2033_s19 + $0x38] sm:$0xff]   ;;  %v1798_v1 = vld [vmem:[%s2033_s19 + $0x30] sm:$0xff]   ;;  %v1799_v2 = vld [vmem:[%s2033_s19 + $0x28] sm:$0xff]   ;;  %s1636_s26 = sshll.u32 %s2238_s12, 9 }
  0x10   : > { %1677 = vmatprep.subr.bf16.mxu0 %v1797_v0  ;;  %1757 = vmatprep.subr.bf16.mxu1 %v1797_v0  ;;  %v1800_v3 = vld [vmem:[%s2033_s19 + $0x20] sm:$0xff]   ;;  %v1801_v6 = vld [vmem:[%s2033_s19 + $0x18] sm:$0xff]   ;;  %v1802_v7 = vld [vmem:[%s2033_s19 + $0x10] sm:$0xff]   ;;  %s2104_s29 = scalar_lea.vmem %s2232_s3, %s1636_s26 }
  0x11   : > { %1678 = vmatpush3.bf16.msra.mxu0 %v1797_v0  ;;  %1765 = vmatpush3.bf16.msra.mxu1 %v1797_v0  ;;  %v1805_v4 = vld [vmem:[%s2042_s23] sm:$0xff]   ;;  %v1803_v8 = vld [vmem:[%s2033_s19 + $0x8] sm:$0xff]   ;;  %v1809_v12 = vld [vmem:[%s2042_s23 + $0x10] sm:$0xff]  }
  0x12   : > { %1679 = vmatprep.subr.bf16.mxu0 %v1798_v1  ;;  %1758 = vmatprep.subr.bf16.mxu1 %v1798_v1  ;;  %v1806_v5 = vld [vmem:[%s2042_s23 + $0x80] sm:$0xff]   ;;  %v1807_v10 = vld [vmem:[%s2042_s23 + $0x8] sm:$0xff]   ;;  %v1810_v13 = vld [vmem:[%s2042_s23 + $0x90] sm:$0xff]  }
  0x13   : > { %1693 = vmatprep.mubr.bf16.mxu0 %v1805_v4  ;;  %1725 = vmatprep.mubr.bf16.mxu1 %v1806_v5  ;;  %v1804_v9 = vld [vmem:[%s2033_s19] sm:$0xff]   ;;  %v1808_v11 = vld [vmem:[%s2042_s23 + $0x88] sm:$0xff]   ;;  %v1811_v14 = vld [vmem:[%s2042_s23 + $0x18] sm:$0xff]  }
  0x14   : > { %v1812_v15 = vld [vmem:[%s2042_s23 + $0x98] sm:$0xff]   ;;  %v1813_v16 = vld [vmem:[%s2042_s23 + $0x20] sm:$0xff]   ;;  %v1815_v18 = vld [vmem:[%s2042_s23 + $0x28] sm:$0xff]  }
  0x15   : > { %1680 = vmatpush3.bf16.msra.mxu0 %v1798_v1  ;;  %1766 = vmatpush3.bf16.msra.mxu1 %v1798_v1  ;;  %v1814_v17 = vld [vmem:[%s2042_s23 + $0xa0] sm:$0xff]   ;;  %v1816_v19 = vld [vmem:[%s2042_s23 + $0xa8] sm:$0xff]   ;;  %v1817_v20 = vld [vmem:[%s2042_s23 + $0x30] sm:$0xff]  }
  0x16   : > { %1681 = vmatprep.subr.bf16.mxu0 %v1799_v2  ;;  %1759 = vmatprep.subr.bf16.mxu1 %v1799_v2  ;;  %v1818_v21 = vld [vmem:[%s2042_s23 + $0xb0] sm:$0xff]   ;;  %v1819_v22 = vld [vmem:[%s2042_s23 + $0x38] sm:$0xff]   ;;  %v1821_v24 = vld [vmem:[%s2042_s23 + $0x40] sm:$0xff]  }
  0x17   : > { %v1820_v23 = vld [vmem:[%s2042_s23 + $0xb8] sm:$0xff]   ;;  %v1822_v25 = vld [vmem:[%s2042_s23 + $0xc0] sm:$0xff]   ;;  %v1823_v26 = vld [vmem:[%s2042_s23 + $0x48] sm:$0xff]  }
  0x18   : > { %v1824_v27 = vld [vmem:[%s2042_s23 + $0xc8] sm:$0xff]   ;;  %v1825_v28 = vld [vmem:[%s2042_s23 + $0x50] sm:$0xff]   ;;  %v1827_v30 = vld [vmem:[%s2042_s23 + $0x58] sm:$0xff]  }
  0x19   : > { %1682 = vmatpush3.bf16.msra.mxu0 %v1799_v2  ;;  %1767 = vmatpush3.bf16.msra.mxu1 %v1799_v2  ;;  %v1826_v29 = vld [vmem:[%s2042_s23 + $0xd0] sm:$0xff]   ;;  %v1828_v31 = vld [vmem:[%s2042_s23 + $0xd8] sm:$0xff]   ;;  %v1829_v32 = vld [vmem:[%s2042_s23 + $0x60] sm:$0xff]  }
  0x1a   : > { %1683 = vmatprep.subr.bf16.mxu0 %v1800_v3  ;;  %1760 = vmatprep.subr.bf16.mxu1 %v1800_v3  ;;  %v1830_v33 = vld [vmem:[%s2042_s23 + $0xe0] sm:$0xff]   ;;  %v1831_v34 = vld [vmem:[%s2042_s23 + $0x68] sm:$0xff]   ;;  %v1833_v36 = vld [vmem:[%s2042_s23 + $0x70] sm:$0xff]  }
  0x1b   : > { %v1832_v35 = vld [vmem:[%s2042_s23 + $0xe8] sm:$0xff]   ;;  %v1834_v37 = vld [vmem:[%s2042_s23 + $0xf0] sm:$0xff]   ;;  %v1835_v38 = vld [vmem:[%s2042_s23 + $0x78] sm:$0xff]  }
  0x1c   : > { %v1836_v39 = vld [vmem:[%s2042_s23 + $0xf8] sm:$0xff]  }
  0x1d   : > { %1684 = vmatpush3.bf16.msra.mxu0 %v1800_v3  ;;  %1768 = vmatpush3.bf16.msra.mxu1 %v1800_v3 }
  0x1e   : > { %1685 = vmatprep.subr.bf16.mxu0 %v1801_v6  ;;  %1761 = vmatprep.subr.bf16.mxu1 %v1801_v6 }
  0x21   : > { %1686 = vmatpush3.bf16.msra.mxu0 %v1801_v6  ;;  %1769 = vmatpush3.bf16.msra.mxu1 %v1801_v6 }
  0x22   : > { %1687 = vmatprep.subr.bf16.mxu0 %v1802_v7  ;;  %1762 = vmatprep.subr.bf16.mxu1 %v1802_v7 }
  0x25   : > { %1688 = vmatpush3.bf16.msra.mxu0 %v1802_v7  ;;  %1770 = vmatpush3.bf16.msra.mxu1 %v1802_v7 }
  0x26   : > { %1689 = vmatprep.subr.bf16.mxu0 %v1803_v8  ;;  %1763 = vmatprep.subr.bf16.mxu1 %v1803_v8 }
  0x29   : > { %1690 = vmatpush3.bf16.msra.mxu0 %v1803_v8  ;;  %1771 = vmatpush3.bf16.msra.mxu1 %v1803_v8 }
  0x2a   : > { %1691 = vmatprep.subr.bf16.mxu0 %v1804_v9  ;;  %1764 = vmatprep.subr.bf16.mxu1 %v1804_v9 }
  0x2d   : > { %1692 = vmatpush3.bf16.msra.mxu0 %v1804_v9  ;;  %1772 = vmatpush3.bf16.msra.mxu1 %v1804_v9 }
  0x30   : > { %1694 = vmatmul.mubr.bf16.vlgmr.msra.gmra.mxu0 %v1807_v10  ;;  %1726 = vmatmul.mubr.bf16.vlgmr.msra.gmra.mxu1 %v1808_v11 }
  0x31   : > { %1697 = vmatprep.mubr.bf16.mxu0 %v1809_v12  ;;  %1729 = vmatprep.mubr.bf16.mxu1 %v1810_v13 }
  0x38   : > { %1698 = vmatmul.mubr.bf16.gmra.mxu0 %v1811_v14  ;;  %1730 = vmatmul.mubr.bf16.gmra.mxu1 %v1812_v15 }
  0x39   : > { %1701 = vmatprep.mubr.bf16.mxu0 %v1813_v16  ;;  %1733 = vmatprep.mubr.bf16.mxu1 %v1814_v17 }
  0x40   : > { %1702 = vmatmul.mubr.bf16.gmra.mxu0 %v1815_v18  ;;  %1734 = vmatmul.mubr.bf16.gmra.mxu1 %v1816_v19 }
  0x41   : > { %1705 = vmatprep.mubr.bf16.mxu0 %v1817_v20  ;;  %1737 = vmatprep.mubr.bf16.mxu1 %v1818_v21 }
  0x48   : > { %1706 = vmatmul.mubr.bf16.gmra.mxu0 %v1819_v22  ;;  %1738 = vmatmul.mubr.bf16.gmra.mxu1 %v1820_v23 }
  0x49   : > { %1709 = vmatprep.mubr.bf16.mxu0 %v1821_v24  ;;  %1741 = vmatprep.mubr.bf16.mxu1 %v1822_v25 }
  0x50   : > { %1710 = vmatmul.mubr.bf16.gmra.mxu0 %v1823_v26  ;;  %1742 = vmatmul.mubr.bf16.gmra.mxu1 %v1824_v27 }
  0x51   : > { %1713 = vmatprep.mubr.bf16.mxu0 %v1825_v28  ;;  %1745 = vmatprep.mubr.bf16.mxu1 %v1826_v29 }
  0x58   : > { %1714 = vmatmul.mubr.bf16.gmra.mxu0 %v1827_v30  ;;  %1746 = vmatmul.mubr.bf16.gmra.mxu1 %v1828_v31 }
  0x59   : > { %1717 = vmatprep.mubr.bf16.mxu0 %v1829_v32  ;;  %1749 = vmatprep.mubr.bf16.mxu1 %v1830_v33 }
  0x60   : > { %1718 = vmatmul.mubr.bf16.gmra.mxu0 %v1831_v34  ;;  %1750 = vmatmul.mubr.bf16.gmra.mxu1 %v1832_v35 }
  0x61   : > { %1721 = vmatprep.mubr.bf16.mxu0 %v1833_v36  ;;  %1753 = vmatprep.mubr.bf16.mxu1 %v1834_v37 }
  0x68   : > { %1722 = vmatmul.mubr.bf16.gmra.mxu0 %v1835_v38  ;;  %1754 = vmatmul.mubr.bf16.gmra.mxu1 %v1836_v39 }
  0xf0   : > { %v1695_v41 = vpop.f32.mrf.mxu0  ;;  %v1727_v42 = vpop.f32.mrf.mxu1 }
  0xf1   : > { %v1250_v43 = vadd.f32 %v1695_v41, %v2084_v40  ;;  %v1282_v44 = vadd.f32 %v1727_v42, %v2084_v40 }
  0xf2   : > { %v791_v45 = vpop.f32.mrf.mxu0  ;;  %v919_v46 = vpop.f32.mrf.mxu1 }
  0xf3   : > { %1837 = vtanh.f32 %v1250_v43  ;;  %v1248_v47 = vadd.f32 %v2084_v40, %v791_v45  ;;  %v1280_v48 = vadd.f32 %v2084_v40, %v919_v46 }
  0xf4   : > { %1839 = vtanh.f32 %v1282_v44  ;;  %v1696_v49 = vpop.f32.mrf.mxu0  ;;  %v1728_v50 = vpop.f32.mrf.mxu1 }
  0xf5   : > { %1841 = vtanh.f32 %v1248_v47  ;;  %v1251_v51 = vadd.f32 %v1696_v49, %v2084_v40  ;;  %v1283_v52 = vadd.f32 %v1728_v50, %v2084_v40 }
  0xf6   : > { %1843 = vtanh.f32 %v1280_v48  ;;  %v794_v53 = vpop.f32.mrf.mxu0  ;;  %v922_v54 = vpop.f32.mrf.mxu1 }
  0xf7   : > { %1845 = vtanh.f32 %v1251_v51  ;;  %v1249_v55 = vadd.f32 %v2084_v40, %v794_v53  ;;  %v1281_v56 = vadd.f32 %v2084_v40, %v922_v54 }
  0xf8   : > { %1847 = vtanh.f32 %v1283_v52  ;;  %v1699_v57 = vpop.f32.mrf.mxu0  ;;  %v1731_v58 = vpop.f32.mrf.mxu1 }
  0xf9   : > { %1849 = vtanh.f32 %v1249_v55  ;;  %v1254_v59 = vadd.f32 %v1699_v57, %v2084_v40  ;;  %v1286_v60 = vadd.f32 %v1731_v58, %v2084_v40 }
  0xfa   : > { %1851 = vtanh.f32 %v1281_v56  ;;  %v807_v61 = vpop.f32.mrf.mxu0  ;;  %v935_v62 = vpop.f32.mrf.mxu1 }
  0xfb   : > { %1853 = vtanh.f32 %v1254_v59  ;;  %v1252_v63 = vadd.f32 %v2084_v40, %v807_v61  ;;  %v1284_v0 = vadd.f32 %v2084_v40, %v935_v62 }
  0xfc   : > { %1855 = vtanh.f32 %v1286_v60  ;;  %v1700_v1 = vpop.f32.mrf.mxu0  ;;  %v1732_v2 = vpop.f32.mrf.mxu1 }
  0xfd   : > { %1857 = vtanh.f32 %v1252_v63  ;;  %v1255_v3 = vadd.f32 %v1700_v1, %v2084_v40  ;;  %v1287_v4 = vadd.f32 %v1732_v2, %v2084_v40 }
  0xfe   : > { %1859 = vtanh.f32 %v1284_v0  ;;  %v810_v5 = vpop.f32.mrf.mxu0  ;;  %v938_v6 = vpop.f32.mrf.mxu1 }
  0xff   : > { %1861 = vtanh.f32 %v1255_v3  ;;  %v1253_v7 = vadd.f32 %v2084_v40, %v810_v5  ;;  %v1285_v8 = vadd.f32 %v2084_v40, %v938_v6 }
 0x100   : > { %v1838_v9 = vpop.eup %1837  ;;  %1863 = vtanh.f32 %v1287_v4  ;;  %v1703_v10 = vpop.f32.mrf.mxu0 }
 0x101   : > { %v1735_v11 = vpop.f32.mrf.mxu1  ;;  %v1840_v12 = vpop.eup %1839  ;;  %1378 = vst [vmem:[%s2104_s29 + $0x10] sm:$0xff] %v1838_v9  ;;  %1865 = vtanh.f32 %v1253_v7  ;;  %v1258_v13 = vadd.f32 %v1703_v10, %v2084_v40 }
 0x102   : > { %v1290_v14 = vadd.f32 %v1735_v11, %v2084_v40  ;;  %v1842_v15 = vpop.eup %1841  ;;  %1410 = vst [vmem:[%s2104_s29 + $0x110] sm:$0xff] %v1840_v12  ;;  %1867 = vtanh.f32 %v1285_v8  ;;  %v823_v16 = vpop.f32.mrf.mxu0 }
 0x103   : > { %v951_v17 = vpop.f32.mrf.mxu1  ;;  %v1844_v18 = vpop.eup %1843  ;;  %1376 = vst [vmem:[%s2104_s29] sm:$0xff] %v1842_v15  ;;  %1869 = vtanh.f32 %v1258_v13  ;;  %v1256_v19 = vadd.f32 %v2084_v40, %v823_v16 }
 0x104   : > { %v1288_v20 = vadd.f32 %v2084_v40, %v951_v17  ;;  %v1846_v21 = vpop.eup %1845  ;;  %1408 = vst [vmem:[%s2104_s29 + $0x100] sm:$0xff] %v1844_v18  ;;  %1871 = vtanh.f32 %v1290_v14  ;;  %v1704_v22 = vpop.f32.mrf.mxu0 }
 0x105   : > { %v1736_v23 = vpop.f32.mrf.mxu1  ;;  %v1848_v24 = vpop.eup %1847  ;;  %1379 = vst [vmem:[%s2104_s29 + $0x18] sm:$0xff] %v1846_v21  ;;  %1873 = vtanh.f32 %v1256_v19  ;;  %v1259_v25 = vadd.f32 %v1704_v22, %v2084_v40 }
 0x106   : > { %v1291_v26 = vadd.f32 %v1736_v23, %v2084_v40  ;;  %v1850_v27 = vpop.eup %1849  ;;  %1411 = vst [vmem:[%s2104_s29 + $0x118] sm:$0xff] %v1848_v24  ;;  %1875 = vtanh.f32 %v1288_v20  ;;  %v826_v28 = vpop.f32.mrf.mxu0 }
 0x107   : > { %v954_v29 = vpop.f32.mrf.mxu1  ;;  %v1852_v30 = vpop.eup %1851  ;;  %1377 = vst [vmem:[%s2104_s29 + $0x8] sm:$0xff] %v1850_v27  ;;  %1877 = vtanh.f32 %v1259_v25  ;;  %v1257_v31 = vadd.f32 %v2084_v40, %v826_v28 }
 0x108   : > { %v1289_v32 = vadd.f32 %v2084_v40, %v954_v29  ;;  %v1854_v33 = vpop.eup %1853  ;;  %1409 = vst [vmem:[%s2104_s29 + $0x108] sm:$0xff] %v1852_v30  ;;  %1879 = vtanh.f32 %v1291_v26  ;;  %v1707_v34 = vpop.f32.mrf.mxu0 }
 0x109   : > { %v1739_v35 = vpop.f32.mrf.mxu1  ;;  %v1856_v36 = vpop.eup %1855  ;;  %1382 = vst [vmem:[%s2104_s29 + $0x30] sm:$0xff] %v1854_v33  ;;  %1881 = vtanh.f32 %v1257_v31  ;;  %v1262_v37 = vadd.f32 %v1707_v34, %v2084_v40 }
 0x10a   : > { %v1294_v38 = vadd.f32 %v1739_v35, %v2084_v40  ;;  %v1858_v39 = vpop.eup %1857  ;;  %1414 = vst [vmem:[%s2104_s29 + $0x130] sm:$0xff] %v1856_v36  ;;  %1883 = vtanh.f32 %v1289_v32  ;;  %v839_v41 = vpop.f32.mrf.mxu0 }
 0x10b   : > { %v967_v42 = vpop.f32.mrf.mxu1  ;;  %v1860_v43 = vpop.eup %1859  ;;  %1380 = vst [vmem:[%s2104_s29 + $0x20] sm:$0xff] %v1858_v39  ;;  %1885 = vtanh.f32 %v1262_v37  ;;  %v1260_v44 = vadd.f32 %v2084_v40, %v839_v41 }
 0x10c   : > { %v1292_v45 = vadd.f32 %v2084_v40, %v967_v42  ;;  %v1862_v46 = vpop.eup %1861  ;;  %1412 = vst [vmem:[%s2104_s29 + $0x120] sm:$0xff] %v1860_v43  ;;  %1887 = vtanh.f32 %v1294_v38  ;;  %v1708_v47 = vpop.f32.mrf.mxu0 }
 0x10d   : > { %v1740_v48 = vpop.f32.mrf.mxu1  ;;  %v1864_v49 = vpop.eup %1863  ;;  %1383 = vst [vmem:[%s2104_s29 + $0x38] sm:$0xff] %v1862_v46  ;;  %1889 = vtanh.f32 %v1260_v44  ;;  %v1263_v50 = vadd.f32 %v1708_v47, %v2084_v40 }
 0x10e   : > { %v1295_v51 = vadd.f32 %v1740_v48, %v2084_v40  ;;  %v1866_v52 = vpop.eup %1865  ;;  %1415 = vst [vmem:[%s2104_s29 + $0x138] sm:$0xff] %v1864_v49  ;;  %1891 = vtanh.f32 %v1292_v45  ;;  %v842_v53 = vpop.f32.mrf.mxu0 }
 0x10f   : > { %v970_v54 = vpop.f32.mrf.mxu1  ;;  %v1868_v55 = vpop.eup %1867  ;;  %1381 = vst [vmem:[%s2104_s29 + $0x28] sm:$0xff] %v1866_v52  ;;  %1893 = vtanh.f32 %v1263_v50  ;;  %v1261_v56 = vadd.f32 %v2084_v40, %v842_v53 }
 0x110   : > { %v1293_v57 = vadd.f32 %v2084_v40, %v970_v54  ;;  %v1870_v58 = vpop.eup %1869  ;;  %1413 = vst [vmem:[%s2104_s29 + $0x128] sm:$0xff] %v1868_v55  ;;  %1895 = vtanh.f32 %v1295_v51  ;;  %v1711_v59 = vpop.f32.mrf.mxu0 }
 0x111   : > { %v1743_v60 = vpop.f32.mrf.mxu1  ;;  %v1872_v61 = vpop.eup %1871  ;;  %1386 = vst [vmem:[%s2104_s29 + $0x50] sm:$0xff] %v1870_v58  ;;  %1897 = vtanh.f32 %v1261_v56  ;;  %v1266_v62 = vadd.f32 %v1711_v59, %v2084_v40 }
 0x112   : > { %v1298_v63 = vadd.f32 %v1743_v60, %v2084_v40  ;;  %v1874_v0 = vpop.eup %1873  ;;  %1418 = vst [vmem:[%s2104_s29 + $0x150] sm:$0xff] %v1872_v61  ;;  %1899 = vtanh.f32 %v1293_v57  ;;  %v855_v1 = vpop.f32.mrf.mxu0 }
 0x113   : > { %v983_v2 = vpop.f32.mrf.mxu1  ;;  %v1876_v3 = vpop.eup %1875  ;;  %1384 = vst [vmem:[%s2104_s29 + $0x40] sm:$0xff] %v1874_v0  ;;  %1901 = vtanh.f32 %v1266_v62  ;;  %v1264_v4 = vadd.f32 %v2084_v40, %v855_v1 }
 0x114   : > { %v1296_v5 = vadd.f32 %v2084_v40, %v983_v2  ;;  %v1878_v6 = vpop.eup %1877  ;;  %1416 = vst [vmem:[%s2104_s29 + $0x140] sm:$0xff] %v1876_v3  ;;  %1903 = vtanh.f32 %v1298_v63  ;;  %v1712_v7 = vpop.f32.mrf.mxu0 }
 0x115   : > { %v1744_v8 = vpop.f32.mrf.mxu1  ;;  %v1880_v9 = vpop.eup %1879  ;;  %1387 = vst [vmem:[%s2104_s29 + $0x58] sm:$0xff] %v1878_v6  ;;  %1905 = vtanh.f32 %v1264_v4  ;;  %v1267_v10 = vadd.f32 %v1712_v7, %v2084_v40 }
 0x116   : > { %v1299_v11 = vadd.f32 %v1744_v8, %v2084_v40  ;;  %v1882_v12 = vpop.eup %1881  ;;  %1419 = vst [vmem:[%s2104_s29 + $0x158] sm:$0xff] %v1880_v9  ;;  %1907 = vtanh.f32 %v1296_v5  ;;  %v858_v13 = vpop.f32.mrf.mxu0 }
 0x117   : > { %v986_v14 = vpop.f32.mrf.mxu1  ;;  %v1884_v15 = vpop.eup %1883  ;;  %1385 = vst [vmem:[%s2104_s29 + $0x48] sm:$0xff] %v1882_v12  ;;  %1909 = vtanh.f32 %v1267_v10  ;;  %v1265_v16 = vadd.f32 %v2084_v40, %v858_v13 }
 0x118   : > { %v1297_v17 = vadd.f32 %v2084_v40, %v986_v14  ;;  %v1886_v18 = vpop.eup %1885  ;;  %1417 = vst [vmem:[%s2104_s29 + $0x148] sm:$0xff] %v1884_v15  ;;  %1911 = vtanh.f32 %v1299_v11  ;;  %v1715_v19 = vpop.f32.mrf.mxu0 }
 0x119   : > { %v1747_v20 = vpop.f32.mrf.mxu1  ;;  %v1888_v21 = vpop.eup %1887  ;;  %1390 = vst [vmem:[%s2104_s29 + $0x70] sm:$0xff] %v1886_v18  ;;  %1913 = vtanh.f32 %v1265_v16  ;;  %v1270_v22 = vadd.f32 %v1715_v19, %v2084_v40 }
 0x11a   : > { %v1302_v23 = vadd.f32 %v1747_v20, %v2084_v40  ;;  %v1890_v24 = vpop.eup %1889  ;;  %1422 = vst [vmem:[%s2104_s29 + $0x170] sm:$0xff] %v1888_v21  ;;  %1915 = vtanh.f32 %v1297_v17  ;;  %v871_v25 = vpop.f32.mrf.mxu0 }
 0x11b   : > { %v999_v26 = vpop.f32.mrf.mxu1  ;;  %v1892_v27 = vpop.eup %1891  ;;  %1388 = vst [vmem:[%s2104_s29 + $0x60] sm:$0xff] %v1890_v24  ;;  %1917 = vtanh.f32 %v1270_v22  ;;  %v1268_v28 = vadd.f32 %v2084_v40, %v871_v25 }
 0x11c   : > { %v1300_v29 = vadd.f32 %v2084_v40, %v999_v26  ;;  %v1894_v30 = vpop.eup %1893  ;;  %1420 = vst [vmem:[%s2104_s29 + $0x160] sm:$0xff] %v1892_v27  ;;  %1919 = vtanh.f32 %v1302_v23  ;;  %v1716_v31 = vpop.f32.mrf.mxu0 }
 0x11d   : > { %v1748_v32 = vpop.f32.mrf.mxu1  ;;  %v1896_v33 = vpop.eup %1895  ;;  %1391 = vst [vmem:[%s2104_s29 + $0x78] sm:$0xff] %v1894_v30  ;;  %1921 = vtanh.f32 %v1268_v28  ;;  %v1271_v34 = vadd.f32 %v1716_v31, %v2084_v40 }
 0x11e   : > { %v1303_v35 = vadd.f32 %v1748_v32, %v2084_v40  ;;  %v1898_v36 = vpop.eup %1897  ;;  %1423 = vst [vmem:[%s2104_s29 + $0x178] sm:$0xff] %v1896_v33  ;;  %1923 = vtanh.f32 %v1300_v29  ;;  %v874_v37 = vpop.f32.mrf.mxu0 }
 0x11f   : > { %v1002_v38 = vpop.f32.mrf.mxu1  ;;  %v1900_v39 = vpop.eup %1899  ;;  %1389 = vst [vmem:[%s2104_s29 + $0x68] sm:$0xff] %v1898_v36  ;;  %1925 = vtanh.f32 %v1271_v34  ;;  %v1269_v41 = vadd.f32 %v2084_v40, %v874_v37 }
 0x120   : > { %v1301_v42 = vadd.f32 %v2084_v40, %v1002_v38  ;;  %v1902_v43 = vpop.eup %1901  ;;  %1421 = vst [vmem:[%s2104_s29 + $0x168] sm:$0xff] %v1900_v39  ;;  %1927 = vtanh.f32 %v1303_v35  ;;  %v1719_v44 = vpop.f32.mrf.mxu0 }
 0x121   : > { %v1751_v45 = vpop.f32.mrf.mxu1  ;;  %v1904_v46 = vpop.eup %1903  ;;  %1394 = vst [vmem:[%s2104_s29 + $0x90] sm:$0xff] %v1902_v43  ;;  %1929 = vtanh.f32 %v1269_v41  ;;  %v1274_v47 = vadd.f32 %v1719_v44, %v2084_v40 }
 0x122   : > { %v1306_v48 = vadd.f32 %v1751_v45, %v2084_v40  ;;  %v1906_v49 = vpop.eup %1905  ;;  %1426 = vst [vmem:[%s2104_s29 + $0x190] sm:$0xff] %v1904_v46  ;;  %1931 = vtanh.f32 %v1301_v42  ;;  %v887_v50 = vpop.f32.mrf.mxu0 }
 0x123   : > { %v1015_v51 = vpop.f32.mrf.mxu1  ;;  %v1908_v52 = vpop.eup %1907  ;;  %1392 = vst [vmem:[%s2104_s29 + $0x80] sm:$0xff] %v1906_v49  ;;  %1933 = vtanh.f32 %v1274_v47  ;;  %v1272_v53 = vadd.f32 %v2084_v40, %v887_v50 }
 0x124   : > { %v1304_v54 = vadd.f32 %v2084_v40, %v1015_v51  ;;  %v1910_v55 = vpop.eup %1909  ;;  %1424 = vst [vmem:[%s2104_s29 + $0x180] sm:$0xff] %v1908_v52  ;;  %1935 = vtanh.f32 %v1306_v48  ;;  %v1720_v56 = vpop.f32.mrf.mxu0 }
 0x125   : > { %v1752_v57 = vpop.f32.mrf.mxu1  ;;  %v1912_v58 = vpop.eup %1911  ;;  %1395 = vst [vmem:[%s2104_s29 + $0x98] sm:$0xff] %v1910_v55  ;;  %1937 = vtanh.f32 %v1272_v53  ;;  %v1275_v59 = vadd.f32 %v1720_v56, %v2084_v40 }
 0x126   : > { %v1307_v60 = vadd.f32 %v1752_v57, %v2084_v40  ;;  %v1914_v61 = vpop.eup %1913  ;;  %1427 = vst [vmem:[%s2104_s29 + $0x198] sm:$0xff] %v1912_v58  ;;  %1939 = vtanh.f32 %v1304_v54  ;;  %v890_v62 = vpop.f32.mrf.mxu0 }
 0x127   : > { %v1018_v63 = vpop.f32.mrf.mxu1  ;;  %v1916_v0 = vpop.eup %1915  ;;  %1393 = vst [vmem:[%s2104_s29 + $0x88] sm:$0xff] %v1914_v61  ;;  %1941 = vtanh.f32 %v1275_v59  ;;  %v1273_v1 = vadd.f32 %v2084_v40, %v890_v62 }
 0x128   : > { %v1305_v2 = vadd.f32 %v2084_v40, %v1018_v63  ;;  %v1918_v3 = vpop.eup %1917  ;;  %1425 = vst [vmem:[%s2104_s29 + $0x188] sm:$0xff] %v1916_v0  ;;  %1943 = vtanh.f32 %v1307_v60  ;;  %v1723_v4 = vpop.f32.mrf.mxu0 }
 0x129   : > { %v1755_v5 = vpop.f32.mrf.mxu1  ;;  %v1920_v6 = vpop.eup %1919  ;;  %1398 = vst [vmem:[%s2104_s29 + $0xb0] sm:$0xff] %v1918_v3  ;;  %1945 = vtanh.f32 %v1273_v1  ;;  %v1278_v7 = vadd.f32 %v1723_v4, %v2084_v40 }
 0x12a   : > { %v1310_v8 = vadd.f32 %v1755_v5, %v2084_v40  ;;  %v1922_v9 = vpop.eup %1921  ;;  %1430 = vst [vmem:[%s2104_s29 + $0x1b0] sm:$0xff] %v1920_v6  ;;  %1947 = vtanh.f32 %v1305_v2  ;;  %v903_v10 = vpop.f32.mrf.mxu0 }
 0x12b   : > { %v1031_v11 = vpop.f32.mrf.mxu1  ;;  %v1924_v12 = vpop.eup %1923  ;;  %1396 = vst [vmem:[%s2104_s29 + $0xa0] sm:$0xff] %v1922_v9  ;;  %1949 = vtanh.f32 %v1278_v7  ;;  %v1276_v13 = vadd.f32 %v2084_v40, %v903_v10 }
 0x12c   : > { %v1308_v14 = vadd.f32 %v2084_v40, %v1031_v11  ;;  %v1926_v15 = vpop.eup %1925  ;;  %1428 = vst [vmem:[%s2104_s29 + $0x1a0] sm:$0xff] %v1924_v12  ;;  %1951 = vtanh.f32 %v1310_v8  ;;  %v1724_v16 = vpop.f32.mrf.mxu0 }
 0x12d   : > { %v1756_v17 = vpop.f32.mrf.mxu1  ;;  %v1928_v18 = vpop.eup %1927  ;;  %1399 = vst [vmem:[%s2104_s29 + $0xb8] sm:$0xff] %v1926_v15  ;;  %1953 = vtanh.f32 %v1276_v13  ;;  %v1279_v19 = vadd.f32 %v1724_v16, %v2084_v40 }
 0x12e   : > { %v1311_v20 = vadd.f32 %v1756_v17, %v2084_v40  ;;  %v1930_v21 = vpop.eup %1929  ;;  %1431 = vst [vmem:[%s2104_s29 + $0x1b8] sm:$0xff] %v1928_v18  ;;  %1955 = vtanh.f32 %v1308_v14  ;;  %v906_v22 = vpop.f32.mrf.mxu0 }
 0x12f   : > { %v1034_v23 = vpop.f32.mrf.mxu1  ;;  %v1932_v24 = vpop.eup %1931  ;;  %1397 = vst [vmem:[%s2104_s29 + $0xa8] sm:$0xff] %v1930_v21  ;;  %1957 = vtanh.f32 %v1279_v19  ;;  %v1277_v25 = vadd.f32 %v2084_v40, %v906_v22 }
 0x130   : > { %v1309_v26 = vadd.f32 %v2084_v40, %v1034_v23  ;;  %v1934_v27 = vpop.eup %1933  ;;  %1429 = vst [vmem:[%s2104_s29 + $0x1a8] sm:$0xff] %v1932_v24  ;;  %1959 = vtanh.f32 %v1311_v20 }
 0x131   : > { %v1936_v28 = vpop.eup %1935  ;;  %1402 = vst [vmem:[%s2104_s29 + $0xd0] sm:$0xff] %v1934_v27  ;;  %1961 = vtanh.f32 %v1277_v25 }
 0x132   : > { %v1938_v29 = vpop.eup %1937  ;;  %1434 = vst [vmem:[%s2104_s29 + $0x1d0] sm:$0xff] %v1936_v28  ;;  %1963 = vtanh.f32 %v1309_v26 }
 0x133   : > { %v1940_v30 = vpop.eup %1939  ;;  %1400 = vst [vmem:[%s2104_s29 + $0xc0] sm:$0xff] %v1938_v29 }
 0x134   : > { %v1942_v31 = vpop.eup %1941  ;;  %1432 = vst [vmem:[%s2104_s29 + $0x1c0] sm:$0xff] %v1940_v30 }
 0x135   : > { %v1944_v40 = vpop.eup %1943  ;;  %1403 = vst [vmem:[%s2104_s29 + $0xd8] sm:$0xff] %v1942_v31 }
 0x136   : > { %v1946_v32 = vpop.eup %1945  ;;  %1435 = vst [vmem:[%s2104_s29 + $0x1d8] sm:$0xff] %v1944_v40 }
 0x137   : > { %v1948_v33 = vpop.eup %1947  ;;  %1401 = vst [vmem:[%s2104_s29 + $0xc8] sm:$0xff] %v1946_v32 }
 0x138   : > { %v1950_v34 = vpop.eup %1949  ;;  %1433 = vst [vmem:[%s2104_s29 + $0x1c8] sm:$0xff] %v1948_v33 }
 0x139   : > { %v1952_v35 = vpop.eup %1951  ;;  %1406 = vst [vmem:[%s2104_s29 + $0xf0] sm:$0xff] %v1950_v34 }
 0x13a   : > { %v1954_v36 = vpop.eup %1953  ;;  %1438 = vst [vmem:[%s2104_s29 + $0x1f0] sm:$0xff] %v1952_v35 }
 0x13b   : > { %v1956_v37 = vpop.eup %1955  ;;  %1404 = vst [vmem:[%s2104_s29 + $0xe0] sm:$0xff] %v1954_v36 }
 0x13c   : > { %v1958_v38 = vpop.eup %1957  ;;  %1436 = vst [vmem:[%s2104_s29 + $0x1e0] sm:$0xff] %v1956_v37 }
 0x13d   : > { %v1960_v39 = vpop.eup %1959  ;;  %1407 = vst [vmem:[%s2104_s29 + $0xf8] sm:$0xff] %v1958_v38 }
 0x13e   : > { %v1962_v41 = vpop.eup %1961  ;;  %1439 = vst [vmem:[%s2104_s29 + $0x1f8] sm:$0xff] %v1960_v39 }
 0x13f   : > { %v1964_v42 = vpop.eup %1963  ;;  %1405 = vst [vmem:[%s2104_s29 + $0xe8] sm:$0xff] %v1962_v41 }
 0x140   : > { %1437 = vst [vmem:[%s2104_s29 + $0x1e8] sm:$0xff] %v1964_v42 }
 0x141 PF: > { %s13_s14 = sadd.s32 1, %s1987_s14   ;;  %s2233_s12 = smov %s1983_s13 }
 0x142   : > { %p10_p5 = scmp.ge.s32.totalorder %s13_s14, 6   ;;  %s2234_s13 = smov %s2236_s15 }
 0x144   :  { %12 = sbr.rel (!%p10_p5) target bundleno = 2 (0x2), region = 76 }

</bundles_post_ra>
